<compile_context>
chip_gen: v7x
topology: tpu7x:2x2x1
jax: 0.10.0
libtpu: 0.0.40
codegen_flags: <defaults>
</compile_context>

<pallas_src>
from functools import partial

import jax
import jax.numpy as jnp
from jax.experimental import pallas as pl
from jax.experimental.pallas import tpu as pltpu

HIDDEN = 300                                    # fixed by nn.LSTM(300, 300, 2)
WIDTH = HIDDEN                                  # feature-map width == LSTM input size
LANES = 128
W_PAD = ((WIDTH + LANES - 1) // LANES) * LANES  # 384: padded width / hidden size
EPS_BN = 1e-5
NEG = -1e30                                     # stands in for -inf (pool pad, masked softmax)


# ----------------------------------------------------------------------------
# Fused kernel: 3x(Conv2d(1,1,3,p=1) -> MaxPool2d(3,1,1)) -> BatchNorm2d(1)
#               -> 2-layer LSTM (1 step, zero init state) -> Linear -> softmax
# ----------------------------------------------------------------------------
def maad_kernel(x_ref, cw_ref, cb_ref,
                w0_hbm, b0_hbm, w1_hbm, b1_hbm, wc_hbm, bc_hbm,
                h_ref, cls_ref,
                w0b, b0b, w1b, b1b, wcb, bcb, sem):
    # x_ref : (H, W_PAD) f32 VMEM, lanes >= WIDTH hold zero.
    # cw_ref: (27,) f32 SMEM -- 3 convs x 3x3 kernel, row-major (c, ki, kj).
    # cb_ref: (3,)  f32 SMEM
    # w0/w1 : (W_PAD, 3*W_PAD) bf16 in HBM -- per-gate (i, g, o) W_ih^T, K zero-padded.
    # b0/b1 : (1, 3*W_PAD) f32 in HBM      -- per-gate b_ih + b_hh, zero-padded.
    # wc    : (W_PAD, CP) bf16, bc: (1, CP) f32 in HBM -- classifier, pad lanes bias NEG.
    H, WP = x_ref.shape

    # Kick off all weight DMAs now; they overlap the conv/pool/BN (+ LSTM-0) compute.
    cps = [pltpu.make_async_copy(w0_hbm, w0b, sem.at[0]),
           pltpu.make_async_copy(b0_hbm, b0b, sem.at[1]),
           pltpu.make_async_copy(w1_hbm, w1b, sem.at[2]),
           pltpu.make_async_copy(b1_hbm, b1b, sem.at[3]),
           pltpu.make_async_copy(wc_hbm, wcb, sem.at[4]),
           pltpu.make_async_copy(bc_hbm, bcb, sem.at[5])]
    for cp in cps:
        cp.start()

    # Hoisted masks, reused by every conv/pool stage.
    col = jax.lax.broadcasted_iota(jnp.int32, (H, WP), 1)
    row = jax.lax.broadcasted_iota(jnp.int32, (H, WP), 0)
    valid = col < WIDTH
    is_top = row == 0
    is_bot = row == H - 1

    # Row (sublane) shifts: XLU sublane roll + cheap VPU select of the boundary row.
    def rows_above(a, fill):                     # y[i, :] = a[i-1, :], row 0 := fill
        return jnp.where(is_top, fill, pltpu.roll(a, 1, 0))

    def rows_below(a, fill):                     # y[i, :] = a[i+1, :], row H-1 := fill
        return jnp.where(is_bot, fill, pltpu.roll(a, H - 1, 0))

    # Lane shifts: XLU rolls; the wrapped lane lands in / comes from the pad region,
    # which already holds the correct boundary value (0 for conv taps, NEG for pool).
    def lanes_from_left(a):                      # y[:, j] = a[:, j-1]
        return pltpu.roll(a, 1, 1)

    def lanes_from_right(a):                     # y[:, j] = a[:, j+1]
        return pltpu.roll(a, WP - 1, 1)

    x = x_ref[...]

    for c in range(3):
        # Conv2d(1,1,3,padding=1): combine the three row taps, then shift the three
        # column taps by one lane each.  Zero padding is free: pad lanes of t_* are
        # zero and the boundary-row fills are zero.
        up = rows_above(x, 0.0)                  # x[i-1, j]
        dn = rows_below(x, 0.0)                  # x[i+1, j]
        w = lambda ki, kj, c=c: cw_ref[c * 9 + ki * 3 + kj]
        t_m1 = w(0, 0) * up + w(1, 0) * x + w(2, 0) * dn    # column tap j-1
        t_0 = w(0, 1) * up + w(1, 1) * x + w(2, 1) * dn     # column tap j
        t_p1 = w(0, 2) * up + w(1, 2) * x + w(2, 2) * dn    # column tap j+1
        conv = lanes_from_left(t_m1) + t_0 + lanes_from_right(t_p1) + cb_ref[c]

        # MaxPool2d(3, stride=1, padding=1), separable column-max then row-max.
        a = jnp.where(valid, conv, NEG)          # pad lanes act as -inf
        rmax = jnp.maximum(a, jnp.maximum(lanes_from_left(a), lanes_from_right(a)))
        pooled = jnp.maximum(rmax, jnp.maximum(rows_above(rmax, NEG),
                                               rows_below(rmax, NEG)))
        x = jnp.where(valid, pooled, 0.0)        # restore zero pad lanes

    # BatchNorm2d(1): training-mode batch statistics, two-pass (biased) variance,
    # affine params at default init (gamma=1, beta=0).  Pad lanes are zero so the
    # whole-array sum equals the valid-region sum; the centered pass is masked.
    # TODO(synk): running-stat buffer updates are a training-time side effect that
    # does not affect the forward output; they are not reproduced here.
    n = H * WIDTH
    mean = jnp.sum(x) / n
    d = jnp.where(valid, x - mean, 0.0)
    var = jnp.sum(d * d) / n
    inv_std = jax.lax.rsqrt(var + EPS_BN)

    # Only the last batch row is consumed downstream (output[:, -1, :]); keep the
    # full 384-lane row -- pad lanes multiply zero-padded K rows of the weights.
    last = (x[H - 1:H, :] - mean) * inv_std                  # (1, W_PAD)

    # 2-layer LSTM, single time step, zero initial state: c = i*g, h = o*tanh(c).
    # One fused (1, 384) x (384, 1152) MXU dot per layer; gate blocks are
    # lane-aligned 384-column slices (free views).  Pad lanes of h come out 0.
    def cell(xrow, w_buf, b_buf):
        g = jnp.dot(xrow.astype(jnp.bfloat16), w_buf[...],
                    preferred_element_type=jnp.float32) + b_buf[...]
        gi = g[:, 0 * WP:1 * WP]
        gg = g[:, 1 * WP:2 * WP]
        go = g[:, 2 * WP:3 * WP]
        return jax.nn.sigmoid(go) * jnp.tanh(jax.nn.sigmoid(gi) * jnp.tanh(gg))

    cps[0].wait(); cps[1].wait()                 # layer-0 weights (hidden by conv/pool/BN)
    h1 = cell(last, w0b, b0b)
    cps[2].wait(); cps[3].wait()                 # layer-1 weights (hidden by layer 0)
    h2 = cell(h1, w1b, b1b)
    h_ref[...] = h2                              # lane-dense (1, 384) store == lstm_out[:, -1, :]

    # Linear(300, E) padded to a full 128-lane tile + exact softmax (pad lanes have
    # bias NEG so they vanish under softmax).
    cps[4].wait(); cps[5].wait()
    logits = jnp.dot(h2.astype(jnp.bfloat16), wcb[...],
                     preferred_element_type=jnp.float32) + bcb[...]
    m = jnp.max(logits, axis=-1, keepdims=True)
    e = jnp.exp(logits - m)
    cls_ref[...] = e / jnp.sum(e, axis=-1, keepdims=True)


# ----------------------------------------------------------------------------
# Wrappers
# ----------------------------------------------------------------------------
def maad_fused(x2d, params):
    """x2d: (H, 300) f32. Returns (last hidden row (1, 300), padded softmax (1, CP))."""
    H, W = x2d.shape
    assert W == WIDTH
    xp = jnp.pad(x2d, ((0, 0), (0, W_PAD - W)))              # zero pad lanes once
    cp = params["wc"].shape[1]
    vmem = pl.BlockSpec(memory_space=pltpu.MemorySpace.VMEM)
    smem = pl.BlockSpec(memory_space=pltpu.MemorySpace.SMEM)
    hbm = pl.BlockSpec(memory_space=pl.ANY)                   # weights: manual overlapped DMA
    h_pad, cls = pl.pallas_call(
        maad_kernel,
        out_shape=(jax.ShapeDtypeStruct((1, W_PAD), jnp.float32),   # lane-dense hidden row
                   jax.ShapeDtypeStruct((1, cp), jnp.float32)),     # padded softmax
        in_specs=[vmem, smem, smem, hbm, hbm, hbm, hbm, hbm, hbm],
        out_specs=(vmem, vmem),
        scratch_shapes=[
            pltpu.VMEM((W_PAD, 3 * W_PAD), jnp.bfloat16),     # w0 double of layer weights
            pltpu.VMEM((1, 3 * W_PAD), jnp.float32),          # b0
            pltpu.VMEM((W_PAD, 3 * W_PAD), jnp.bfloat16),     # w1
            pltpu.VMEM((1, 3 * W_PAD), jnp.float32),          # b1
            pltpu.VMEM((W_PAD, cp), jnp.bfloat16),            # wc
            pltpu.VMEM((1, cp), jnp.float32),                 # bc
            pltpu.SemaphoreType.DMA((6,)),
        ],
    )(xp, params["conv_w"].reshape(27), params["conv_b"],
      params["w0"], params["b0"], params["w1"], params["b1"],
      params["wc"], params["bc"])
    return h_pad[:, :HIDDEN], cls


@partial(jax.jit, static_argnames=("error_types",))
def maad_agent_forward(x, params, *, error_types):
    # x: (1, 1, H, 300) float32, NCHW like the PyTorch module (N must be 1).
    x2d = x[0, 0].astype(jnp.float32)
    h_last, cls_pad = maad_fused(x2d, params)
    output = h_last.reshape(1, 1, 1, HIDDEN)     # output[:, -1, :].unsqueeze(0).unsqueeze(0)
    classification = cls_pad[:, :error_types]
    return output, classification


def init_params(key, error_types):
    ks = jax.random.split(key, 10)
    p = {}
    p["conv_w"] = 0.2 * jax.random.normal(ks[0], (3, 3, 3), jnp.float32)   # 3 convs, 3x3
    p["conv_b"] = 0.1 * jax.random.normal(ks[1], (3,), jnp.float32)

    def lstm_layer(kw, kb1, kb2):
        # PyTorch layout: W_ih (1200, 300), b_ih/b_hh (1200,), gate order [i, f, g, o].
        # The forget gate multiplies the zero initial cell state (seq_len == 1) and
        # W_hh multiplies the zero initial hidden state, so both drop out exactly.
        # Pack the surviving gates (i, g, o) into one K-padded, lane-aligned matrix.
        w_ih = 0.05 * jax.random.normal(kw, (4 * HIDDEN, HIDDEN), jnp.float32)
        b_ih = 0.05 * jax.random.normal(kb1, (4 * HIDDEN,), jnp.float32)
        b_hh = 0.05 * jax.random.normal(kb2, (4 * HIDDEN,), jnp.float32)
        wp = jnp.zeros((W_PAD, 3 * W_PAD), jnp.float32)
        bp = jnp.zeros((1, 3 * W_PAD), jnp.float32)
        for slot, g in enumerate((0, 2, 3)):                 # i, g, o
            wg = w_ih[g * HIDDEN:(g + 1) * HIDDEN, :].T      # (300 in, 300 out)
            bg = (b_ih + b_hh)[g * HIDDEN:(g + 1) * HIDDEN]
            wp = wp.at[:HIDDEN, slot * W_PAD:slot * W_PAD + HIDDEN].set(wg)
            bp = bp.at[0, slot * W_PAD:slot * W_PAD + HIDDEN].set(bg)
        return wp.astype(jnp.bfloat16), bp

    p["w0"], p["b0"] = lstm_layer(ks[2], ks[3], ks[4])
    p["w1"], p["b1"] = lstm_layer(ks[5], ks[6], ks[7])

    w_cls = 0.05 * jax.random.normal(ks[8], (error_types, HIDDEN), jnp.float32)
    b_cls = 0.05 * jax.random.normal(ks[9], (error_types,), jnp.float32)
    cp = -(-error_types // LANES) * LANES                    # pad classes to a lane tile
    wc = jnp.zeros((W_PAD, cp), jnp.float32).at[:HIDDEN, :error_types].set(w_cls.T)
    bc = jnp.full((1, cp), NEG, jnp.float32).at[0, :error_types].set(b_cls)
    p["wc"] = wc.astype(jnp.bfloat16)
    p["bc"] = bc
    return p


# ----------------------------------------------------------------------------
# Pure-JAX reference of the same forward pass (for verification only).
# ----------------------------------------------------------------------------
def reference_forward(x2d, params):
    x = x2d.astype(jnp.float32)
    H, W = x.shape
    cw, cb = params["conv_w"], params["conv_b"]
    for c in range(3):
        xp = jnp.pad(x, 1)
        acc = jnp.zeros_like(x)
        for ki in range(3):
            for kj in range(3):
                acc = acc + cw[c, ki, kj] * xp[ki:ki + H, kj:kj + W]
        acc = acc + cb[c]
        mp = jnp.pad(acc, 1, constant_values=-jnp.inf)
        pooled = jnp.full_like(x, -jnp.inf)
        for ki in range(3):
            for kj in range(3):
                pooled = jnp.maximum(pooled, mp[ki:ki + H, kj:kj + W])
        x = pooled
    mean = jnp.mean(x)
    var = jnp.mean((x - mean) ** 2)
    y = (x - mean) * jax.lax.rsqrt(var + EPS_BN)
    last = y[H - 1:H, :]

    def cell(xrow, wp, bp):
        xb = xrow.astype(jnp.bfloat16).astype(jnp.float32)
        wf = wp.astype(jnp.float32)

        def gate(s):
            return (xb @ wf[:HIDDEN, s * W_PAD:s * W_PAD + HIDDEN]
                    + bp[0, s * W_PAD:s * W_PAD + HIDDEN])

        gi, gg, go = gate(0), gate(1), gate(2)
        return jax.nn.sigmoid(go) * jnp.tanh(jax.nn.sigmoid(gi) * jnp.tanh(gg))

    h1 = cell(last, params["w0"], params["b0"])
    h2 = cell(h1, params["w1"], params["b1"])
    logits = (h2.astype(jnp.bfloat16).astype(jnp.float32)
              @ params["wc"].astype(jnp.float32)[:HIDDEN, :] + params["bc"])
    probs = jax.nn.softmax(logits, axis=-1)
    return h2, probs


if __name__ == "__main__":
    error_types = 5
    H = 8                      # spatial height (= LSTM batch dim), one sublane tile
    key = jax.random.PRNGKey(0)
    k_x, k_p = jax.random.split(key)
    x = jax.random.normal(k_x, (1, 1, H, WIDTH), jnp.float32)
    params = init_params(k_p, error_types)

    out, cls = maad_agent_forward(x, params, error_types=error_types)
    out, cls = jax.block_until_ready((out, cls))

    # Cross-check against the pure-JAX reference.
    h_ref, cls_full_ref = reference_forward(x[0, 0], params)
    out_ref = h_ref.reshape(1, 1, 1, HIDDEN)
    cls_ref = cls_full_ref[:, :error_types]

    assert out.shape == (1, 1, 1, HIDDEN)
    assert cls.shape == (1, error_types)
    assert bool(jnp.isfinite(out).all()) and bool(jnp.isfinite(cls).all())
    assert abs(float(cls.sum()) - 1.0) < 1e-3                # exact softmax normalization
    assert bool(jnp.allclose(out, out_ref, rtol=1e-2, atol=1e-2)), \
        float(jnp.max(jnp.abs(out - out_ref)))
    assert bool(jnp.allclose(cls, cls_ref, rtol=1e-2, atol=1e-2)), \
        float(jnp.max(jnp.abs(cls - cls_ref)))
    print("KERNEL_OK")
</pallas_src>

<mosaic_0001>
module attributes {stable_mosaic.version = 11 : i64} {
  func.func @maad_kernel(%arg0: memref<8x384xf32, #tpu.memory_space<vmem>>, %arg1: memref<27xf32, #tpu.memory_space<smem>>, %arg2: memref<3xf32, #tpu.memory_space<smem>>, %arg3: memref<384x1152xbf16, #tpu.memory_space<any>>, %arg4: memref<1x1152xf32, #tpu.memory_space<any>>, %arg5: memref<384x1152xbf16, #tpu.memory_space<any>>, %arg6: memref<1x1152xf32, #tpu.memory_space<any>>, %arg7: memref<384x128xbf16, #tpu.memory_space<any>>, %arg8: memref<1x128xf32, #tpu.memory_space<any>>, %arg9: memref<1x384xf32, #tpu.memory_space<vmem>>, %arg10: memref<1x128xf32, #tpu.memory_space<vmem>>, %arg11: memref<384x1152xbf16, #tpu.memory_space<vmem>>, %arg12: memref<1x1152xf32, #tpu.memory_space<vmem>>, %arg13: memref<384x1152xbf16, #tpu.memory_space<vmem>>, %arg14: memref<1x1152xf32, #tpu.memory_space<vmem>>, %arg15: memref<384x128xbf16, #tpu.memory_space<vmem>>, %arg16: memref<1x128xf32, #tpu.memory_space<vmem>>, %arg17: memref<6x!tpu.dma_semaphore, #tpu.memory_space<semaphore_mem>>) attributes {dimension_semantics = [], scalar_prefetch = 0 : i64, scratch_operands = 7 : i64, tpu.core_type = #tpu.core_type<tc>} {
    %c0_i32 = arith.constant 0 : i32
    %0 = tpu.memref_slice %arg17[%c0_i32] : memref<6x!tpu.dma_semaphore, #tpu.memory_space<semaphore_mem>> -> memref<1x!tpu.dma_semaphore, #tpu.memory_space<semaphore_mem>>
    %1 = tpu.memref_squeeze %0 : memref<1x!tpu.dma_semaphore, #tpu.memory_space<semaphore_mem>> -> memref<!tpu.dma_semaphore, #tpu.memory_space<semaphore_mem>>
    tpu.enqueue_dma source(%arg3 : memref<384x1152xbf16, #tpu.memory_space<any>>) target(%arg11 : memref<384x1152xbf16, #tpu.memory_space<vmem>>) target_semaphore(%1 : memref<!tpu.dma_semaphore, #tpu.memory_space<semaphore_mem>>)
    %c1_i32 = arith.constant 1 : i32
    %2 = tpu.memref_slice %arg17[%c1_i32] : memref<6x!tpu.dma_semaphore, #tpu.memory_space<semaphore_mem>> -> memref<1x!tpu.dma_semaphore, #tpu.memory_space<semaphore_mem>>
    %3 = tpu.memref_squeeze %2 : memref<1x!tpu.dma_semaphore, #tpu.memory_space<semaphore_mem>> -> memref<!tpu.dma_semaphore, #tpu.memory_space<semaphore_mem>>
    tpu.enqueue_dma source(%arg4 : memref<1x1152xf32, #tpu.memory_space<any>>) target(%arg12 : memref<1x1152xf32, #tpu.memory_space<vmem>>) target_semaphore(%3 : memref<!tpu.dma_semaphore, #tpu.memory_space<semaphore_mem>>)
    %c2_i32 = arith.constant 2 : i32
    %4 = tpu.memref_slice %arg17[%c2_i32] : memref<6x!tpu.dma_semaphore, #tpu.memory_space<semaphore_mem>> -> memref<1x!tpu.dma_semaphore, #tpu.memory_space<semaphore_mem>>
    %5 = tpu.memref_squeeze %4 : memref<1x!tpu.dma_semaphore, #tpu.memory_space<semaphore_mem>> -> memref<!tpu.dma_semaphore, #tpu.memory_space<semaphore_mem>>
    tpu.enqueue_dma source(%arg5 : memref<384x1152xbf16, #tpu.memory_space<any>>) target(%arg13 : memref<384x1152xbf16, #tpu.memory_space<vmem>>) target_semaphore(%5 : memref<!tpu.dma_semaphore, #tpu.memory_space<semaphore_mem>>)
    %c3_i32 = arith.constant 3 : i32
    %6 = tpu.memref_slice %arg17[%c3_i32] : memref<6x!tpu.dma_semaphore, #tpu.memory_space<semaphore_mem>> -> memref<1x!tpu.dma_semaphore, #tpu.memory_space<semaphore_mem>>
    %7 = tpu.memref_squeeze %6 : memref<1x!tpu.dma_semaphore, #tpu.memory_space<semaphore_mem>> -> memref<!tpu.dma_semaphore, #tpu.memory_space<semaphore_mem>>
    tpu.enqueue_dma source(%arg6 : memref<1x1152xf32, #tpu.memory_space<any>>) target(%arg14 : memref<1x1152xf32, #tpu.memory_space<vmem>>) target_semaphore(%7 : memref<!tpu.dma_semaphore, #tpu.memory_space<semaphore_mem>>)
    %c4_i32 = arith.constant 4 : i32
    %8 = tpu.memref_slice %arg17[%c4_i32] : memref<6x!tpu.dma_semaphore, #tpu.memory_space<semaphore_mem>> -> memref<1x!tpu.dma_semaphore, #tpu.memory_space<semaphore_mem>>
    %9 = tpu.memref_squeeze %8 : memref<1x!tpu.dma_semaphore, #tpu.memory_space<semaphore_mem>> -> memref<!tpu.dma_semaphore, #tpu.memory_space<semaphore_mem>>
    tpu.enqueue_dma source(%arg7 : memref<384x128xbf16, #tpu.memory_space<any>>) target(%arg15 : memref<384x128xbf16, #tpu.memory_space<vmem>>) target_semaphore(%9 : memref<!tpu.dma_semaphore, #tpu.memory_space<semaphore_mem>>)
    %c5_i32 = arith.constant 5 : i32
    %10 = tpu.memref_slice %arg17[%c5_i32] : memref<6x!tpu.dma_semaphore, #tpu.memory_space<semaphore_mem>> -> memref<1x!tpu.dma_semaphore, #tpu.memory_space<semaphore_mem>>
    %11 = tpu.memref_squeeze %10 : memref<1x!tpu.dma_semaphore, #tpu.memory_space<semaphore_mem>> -> memref<!tpu.dma_semaphore, #tpu.memory_space<semaphore_mem>>
    tpu.enqueue_dma source(%arg8 : memref<1x128xf32, #tpu.memory_space<any>>) target(%arg16 : memref<1x128xf32, #tpu.memory_space<vmem>>) target_semaphore(%11 : memref<!tpu.dma_semaphore, #tpu.memory_space<semaphore_mem>>)
    %12 = tpu.iota {dimensions = array<i32: 1>} : vector<8x384xi32>
    %13 = tpu.iota {dimensions = array<i32: 0>} : vector<8x384xi32>
    %c300_i32 = arith.constant 300 : i32
    %14 = vector.broadcast %c300_i32 : i32 to vector<8x384xi32>
    %15 = arith.cmpi slt, %12, %14 : vector<8x384xi32>
    %c0_i32_0 = arith.constant 0 : i32
    %16 = vector.broadcast %c0_i32_0 : i32 to vector<8x384xi32>
    %17 = arith.cmpi eq, %13, %16 : vector<8x384xi32>
    %c7_i32 = arith.constant 7 : i32
    %18 = vector.broadcast %c7_i32 : i32 to vector<8x384xi32>
    %19 = arith.cmpi eq, %13, %18 : vector<8x384xi32>
    %c0 = arith.constant 0 : index
    %c0_1 = arith.constant 0 : index
    %20 = vector.load %arg0[%c0, %c0_1] : memref<8x384xf32, #tpu.memory_space<vmem>>, vector<8x384xf32>
    %c1_i32_2 = arith.constant 1 : i32
    %21 = tpu.dynamic_rotate %20 by %c1_i32_2 dim 0 : vector<8x384xf32>, i32 -> vector<8x384xf32>
    %cst = arith.constant 0.000000e+00 : f32
    %22 = vector.broadcast %cst : f32 to vector<8x384xf32>
    %23 = arith.select %17, %22, %21 : vector<8x384xi1>, vector<8x384xf32>
    %c7_i32_3 = arith.constant 7 : i32
    %24 = tpu.dynamic_rotate %20 by %c7_i32_3 dim 0 : vector<8x384xf32>, i32 -> vector<8x384xf32>
    %cst_4 = arith.constant 0.000000e+00 : f32
    %25 = vector.broadcast %cst_4 : f32 to vector<8x384xf32>
    %26 = arith.select %19, %25, %24 : vector<8x384xi1>, vector<8x384xf32>
    %c0_5 = arith.constant 0 : index
    %27 = memref.load %arg1[%c0_5] : memref<27xf32, #tpu.memory_space<smem>>
    %28 = vector.broadcast %27 : f32 to vector<8x384xf32>
    %29 = arith.mulf %28, %23 : vector<8x384xf32>
    %c3 = arith.constant 3 : index
    %30 = memref.load %arg1[%c3] : memref<27xf32, #tpu.memory_space<smem>>
    %31 = vector.broadcast %30 : f32 to vector<8x384xf32>
    %32 = arith.mulf %31, %20 : vector<8x384xf32>
    %33 = arith.addf %29, %32 : vector<8x384xf32>
    %c6 = arith.constant 6 : index
    %34 = memref.load %arg1[%c6] : memref<27xf32, #tpu.memory_space<smem>>
    %35 = vector.broadcast %34 : f32 to vector<8x384xf32>
    %36 = arith.mulf %35, %26 : vector<8x384xf32>
    %37 = arith.addf %33, %36 : vector<8x384xf32>
    %c1 = arith.constant 1 : index
    %38 = memref.load %arg1[%c1] : memref<27xf32, #tpu.memory_space<smem>>
    %39 = vector.broadcast %38 : f32 to vector<8x384xf32>
    %40 = arith.mulf %39, %23 : vector<8x384xf32>
    %c4 = arith.constant 4 : index
    %41 = memref.load %arg1[%c4] : memref<27xf32, #tpu.memory_space<smem>>
    %42 = vector.broadcast %41 : f32 to vector<8x384xf32>
    %43 = arith.mulf %42, %20 : vector<8x384xf32>
    %44 = arith.addf %40, %43 : vector<8x384xf32>
    %c7 = arith.constant 7 : index
    %45 = memref.load %arg1[%c7] : memref<27xf32, #tpu.memory_space<smem>>
    %46 = vector.broadcast %45 : f32 to vector<8x384xf32>
    %47 = arith.mulf %46, %26 : vector<8x384xf32>
    %48 = arith.addf %44, %47 : vector<8x384xf32>
    %c2 = arith.constant 2 : index
    %49 = memref.load %arg1[%c2] : memref<27xf32, #tpu.memory_space<smem>>
    %50 = vector.broadcast %49 : f32 to vector<8x384xf32>
    %51 = arith.mulf %50, %23 : vector<8x384xf32>
    %c5 = arith.constant 5 : index
    %52 = memref.load %arg1[%c5] : memref<27xf32, #tpu.memory_space<smem>>
    %53 = vector.broadcast %52 : f32 to vector<8x384xf32>
    %54 = arith.mulf %53, %20 : vector<8x384xf32>
    %55 = arith.addf %51, %54 : vector<8x384xf32>
    %c8 = arith.constant 8 : index
    %56 = memref.load %arg1[%c8] : memref<27xf32, #tpu.memory_space<smem>>
    %57 = vector.broadcast %56 : f32 to vector<8x384xf32>
    %58 = arith.mulf %57, %26 : vector<8x384xf32>
    %59 = arith.addf %55, %58 : vector<8x384xf32>
    %c1_i32_6 = arith.constant 1 : i32
    %60 = tpu.dynamic_rotate %37 by %c1_i32_6 dim 1 : vector<8x384xf32>, i32 -> vector<8x384xf32>
    %61 = arith.addf %60, %48 : vector<8x384xf32>
    %c383_i32 = arith.constant 383 : i32
    %62 = tpu.dynamic_rotate %59 by %c383_i32 dim 1 : vector<8x384xf32>, i32 -> vector<8x384xf32>
    %63 = arith.addf %61, %62 : vector<8x384xf32>
    %c0_7 = arith.constant 0 : index
    %64 = memref.load %arg2[%c0_7] : memref<3xf32, #tpu.memory_space<smem>>
    %65 = vector.broadcast %64 : f32 to vector<8x384xf32>
    %66 = arith.addf %63, %65 : vector<8x384xf32>
    %cst_8 = arith.constant -1.000000e+30 : f32
    %67 = vector.broadcast %cst_8 : f32 to vector<8x384xf32>
    %68 = arith.select %15, %66, %67 : vector<8x384xi1>, vector<8x384xf32>
    %c1_i32_9 = arith.constant 1 : i32
    %69 = tpu.dynamic_rotate %68 by %c1_i32_9 dim 1 : vector<8x384xf32>, i32 -> vector<8x384xf32>
    %c383_i32_10 = arith.constant 383 : i32
    %70 = tpu.dynamic_rotate %68 by %c383_i32_10 dim 1 : vector<8x384xf32>, i32 -> vector<8x384xf32>
    %71 = arith.maximumf %69, %70 : vector<8x384xf32>
    %72 = arith.maximumf %68, %71 : vector<8x384xf32>
    %c1_i32_11 = arith.constant 1 : i32
    %73 = tpu.dynamic_rotate %72 by %c1_i32_11 dim 0 : vector<8x384xf32>, i32 -> vector<8x384xf32>
    %cst_12 = arith.constant -1.000000e+30 : f32
    %74 = vector.broadcast %cst_12 : f32 to vector<8x384xf32>
    %75 = arith.select %17, %74, %73 : vector<8x384xi1>, vector<8x384xf32>
    %c7_i32_13 = arith.constant 7 : i32
    %76 = tpu.dynamic_rotate %72 by %c7_i32_13 dim 0 : vector<8x384xf32>, i32 -> vector<8x384xf32>
    %cst_14 = arith.constant -1.000000e+30 : f32
    %77 = vector.broadcast %cst_14 : f32 to vector<8x384xf32>
    %78 = arith.select %19, %77, %76 : vector<8x384xi1>, vector<8x384xf32>
    %79 = arith.maximumf %75, %78 : vector<8x384xf32>
    %80 = arith.maximumf %72, %79 : vector<8x384xf32>
    %cst_15 = arith.constant 0.000000e+00 : f32
    %81 = vector.broadcast %cst_15 : f32 to vector<8x384xf32>
    %82 = arith.select %15, %80, %81 : vector<8x384xi1>, vector<8x384xf32>
    %c1_i32_16 = arith.constant 1 : i32
    %83 = tpu.dynamic_rotate %82 by %c1_i32_16 dim 0 : vector<8x384xf32>, i32 -> vector<8x384xf32>
    %cst_17 = arith.constant 0.000000e+00 : f32
    %84 = vector.broadcast %cst_17 : f32 to vector<8x384xf32>
    %85 = arith.select %17, %84, %83 : vector<8x384xi1>, vector<8x384xf32>
    %c7_i32_18 = arith.constant 7 : i32
    %86 = tpu.dynamic_rotate %82 by %c7_i32_18 dim 0 : vector<8x384xf32>, i32 -> vector<8x384xf32>
    %cst_19 = arith.constant 0.000000e+00 : f32
    %87 = vector.broadcast %cst_19 : f32 to vector<8x384xf32>
    %88 = arith.select %19, %87, %86 : vector<8x384xi1>, vector<8x384xf32>
    %c9 = arith.constant 9 : index
    %89 = memref.load %arg1[%c9] : memref<27xf32, #tpu.memory_space<smem>>
    %90 = vector.broadcast %89 : f32 to vector<8x384xf32>
    %91 = arith.mulf %90, %85 : vector<8x384xf32>
    %c12 = arith.constant 12 : index
    %92 = memref.load %arg1[%c12] : memref<27xf32, #tpu.memory_space<smem>>
    %93 = vector.broadcast %92 : f32 to vector<8x384xf32>
    %94 = arith.mulf %93, %82 : vector<8x384xf32>
    %95 = arith.addf %91, %94 : vector<8x384xf32>
    %c15 = arith.constant 15 : index
    %96 = memref.load %arg1[%c15] : memref<27xf32, #tpu.memory_space<smem>>
    %97 = vector.broadcast %96 : f32 to vector<8x384xf32>
    %98 = arith.mulf %97, %88 : vector<8x384xf32>
    %99 = arith.addf %95, %98 : vector<8x384xf32>
    %c10 = arith.constant 10 : index
    %100 = memref.load %arg1[%c10] : memref<27xf32, #tpu.memory_space<smem>>
    %101 = vector.broadcast %100 : f32 to vector<8x384xf32>
    %102 = arith.mulf %101, %85 : vector<8x384xf32>
    %c13 = arith.constant 13 : index
    %103 = memref.load %arg1[%c13] : memref<27xf32, #tpu.memory_space<smem>>
    %104 = vector.broadcast %103 : f32 to vector<8x384xf32>
    %105 = arith.mulf %104, %82 : vector<8x384xf32>
    %106 = arith.addf %102, %105 : vector<8x384xf32>
    %c16 = arith.constant 16 : index
    %107 = memref.load %arg1[%c16] : memref<27xf32, #tpu.memory_space<smem>>
    %108 = vector.broadcast %107 : f32 to vector<8x384xf32>
    %109 = arith.mulf %108, %88 : vector<8x384xf32>
    %110 = arith.addf %106, %109 : vector<8x384xf32>
    %c11 = arith.constant 11 : index
    %111 = memref.load %arg1[%c11] : memref<27xf32, #tpu.memory_space<smem>>
    %112 = vector.broadcast %111 : f32 to vector<8x384xf32>
    %113 = arith.mulf %112, %85 : vector<8x384xf32>
    %c14 = arith.constant 14 : index
    %114 = memref.load %arg1[%c14] : memref<27xf32, #tpu.memory_space<smem>>
    %115 = vector.broadcast %114 : f32 to vector<8x384xf32>
    %116 = arith.mulf %115, %82 : vector<8x384xf32>
    %117 = arith.addf %113, %116 : vector<8x384xf32>
    %c17 = arith.constant 17 : index
    %118 = memref.load %arg1[%c17] : memref<27xf32, #tpu.memory_space<smem>>
    %119 = vector.broadcast %118 : f32 to vector<8x384xf32>
    %120 = arith.mulf %119, %88 : vector<8x384xf32>
    %121 = arith.addf %117, %120 : vector<8x384xf32>
    %c1_i32_20 = arith.constant 1 : i32
    %122 = tpu.dynamic_rotate %99 by %c1_i32_20 dim 1 : vector<8x384xf32>, i32 -> vector<8x384xf32>
    %123 = arith.addf %122, %110 : vector<8x384xf32>
    %c383_i32_21 = arith.constant 383 : i32
    %124 = tpu.dynamic_rotate %121 by %c383_i32_21 dim 1 : vector<8x384xf32>, i32 -> vector<8x384xf32>
    %125 = arith.addf %123, %124 : vector<8x384xf32>
    %c1_22 = arith.constant 1 : index
    %126 = memref.load %arg2[%c1_22] : memref<3xf32, #tpu.memory_space<smem>>
    %127 = vector.broadcast %126 : f32 to vector<8x384xf32>
    %128 = arith.addf %125, %127 : vector<8x384xf32>
    %cst_23 = arith.constant -1.000000e+30 : f32
    %129 = vector.broadcast %cst_23 : f32 to vector<8x384xf32>
    %130 = arith.select %15, %128, %129 : vector<8x384xi1>, vector<8x384xf32>
    %c1_i32_24 = arith.constant 1 : i32
    %131 = tpu.dynamic_rotate %130 by %c1_i32_24 dim 1 : vector<8x384xf32>, i32 -> vector<8x384xf32>
    %c383_i32_25 = arith.constant 383 : i32
    %132 = tpu.dynamic_rotate %130 by %c383_i32_25 dim 1 : vector<8x384xf32>, i32 -> vector<8x384xf32>
    %133 = arith.maximumf %131, %132 : vector<8x384xf32>
    %134 = arith.maximumf %130, %133 : vector<8x384xf32>
    %c1_i32_26 = arith.constant 1 : i32
    %135 = tpu.dynamic_rotate %134 by %c1_i32_26 dim 0 : vector<8x384xf32>, i32 -> vector<8x384xf32>
    %cst_27 = arith.constant -1.000000e+30 : f32
    %136 = vector.broadcast %cst_27 : f32 to vector<8x384xf32>
    %137 = arith.select %17, %136, %135 : vector<8x384xi1>, vector<8x384xf32>
    %c7_i32_28 = arith.constant 7 : i32
    %138 = tpu.dynamic_rotate %134 by %c7_i32_28 dim 0 : vector<8x384xf32>, i32 -> vector<8x384xf32>
    %cst_29 = arith.constant -1.000000e+30 : f32
    %139 = vector.broadcast %cst_29 : f32 to vector<8x384xf32>
    %140 = arith.select %19, %139, %138 : vector<8x384xi1>, vector<8x384xf32>
    %141 = arith.maximumf %137, %140 : vector<8x384xf32>
    %142 = arith.maximumf %134, %141 : vector<8x384xf32>
    %cst_30 = arith.constant 0.000000e+00 : f32
    %143 = vector.broadcast %cst_30 : f32 to vector<8x384xf32>
    %144 = arith.select %15, %142, %143 : vector<8x384xi1>, vector<8x384xf32>
    %c1_i32_31 = arith.constant 1 : i32
    %145 = tpu.dynamic_rotate %144 by %c1_i32_31 dim 0 : vector<8x384xf32>, i32 -> vector<8x384xf32>
    %cst_32 = arith.constant 0.000000e+00 : f32
    %146 = vector.broadcast %cst_32 : f32 to vector<8x384xf32>
    %147 = arith.select %17, %146, %145 : vector<8x384xi1>, vector<8x384xf32>
    %c7_i32_33 = arith.constant 7 : i32
    %148 = tpu.dynamic_rotate %144 by %c7_i32_33 dim 0 : vector<8x384xf32>, i32 -> vector<8x384xf32>
    %cst_34 = arith.constant 0.000000e+00 : f32
    %149 = vector.broadcast %cst_34 : f32 to vector<8x384xf32>
    %150 = arith.select %19, %149, %148 : vector<8x384xi1>, vector<8x384xf32>
    %c18 = arith.constant 18 : index
    %151 = memref.load %arg1[%c18] : memref<27xf32, #tpu.memory_space<smem>>
    %152 = vector.broadcast %151 : f32 to vector<8x384xf32>
    %153 = arith.mulf %152, %147 : vector<8x384xf32>
    %c21 = arith.constant 21 : index
    %154 = memref.load %arg1[%c21] : memref<27xf32, #tpu.memory_space<smem>>
    %155 = vector.broadcast %154 : f32 to vector<8x384xf32>
    %156 = arith.mulf %155, %144 : vector<8x384xf32>
    %157 = arith.addf %153, %156 : vector<8x384xf32>
    %c24 = arith.constant 24 : index
    %158 = memref.load %arg1[%c24] : memref<27xf32, #tpu.memory_space<smem>>
    %159 = vector.broadcast %158 : f32 to vector<8x384xf32>
    %160 = arith.mulf %159, %150 : vector<8x384xf32>
    %161 = arith.addf %157, %160 : vector<8x384xf32>
    %c19 = arith.constant 19 : index
    %162 = memref.load %arg1[%c19] : memref<27xf32, #tpu.memory_space<smem>>
    %163 = vector.broadcast %162 : f32 to vector<8x384xf32>
    %164 = arith.mulf %163, %147 : vector<8x384xf32>
    %c22 = arith.constant 22 : index
    %165 = memref.load %arg1[%c22] : memref<27xf32, #tpu.memory_space<smem>>
    %166 = vector.broadcast %165 : f32 to vector<8x384xf32>
    %167 = arith.mulf %166, %144 : vector<8x384xf32>
    %168 = arith.addf %164, %167 : vector<8x384xf32>
    %c25 = arith.constant 25 : index
    %169 = memref.load %arg1[%c25] : memref<27xf32, #tpu.memory_space<smem>>
    %170 = vector.broadcast %169 : f32 to vector<8x384xf32>
    %171 = arith.mulf %170, %150 : vector<8x384xf32>
    %172 = arith.addf %168, %171 : vector<8x384xf32>
    %c20 = arith.constant 20 : index
    %173 = memref.load %arg1[%c20] : memref<27xf32, #tpu.memory_space<smem>>
    %174 = vector.broadcast %173 : f32 to vector<8x384xf32>
    %175 = arith.mulf %174, %147 : vector<8x384xf32>
    %c23 = arith.constant 23 : index
    %176 = memref.load %arg1[%c23] : memref<27xf32, #tpu.memory_space<smem>>
    %177 = vector.broadcast %176 : f32 to vector<8x384xf32>
    %178 = arith.mulf %177, %144 : vector<8x384xf32>
    %179 = arith.addf %175, %178 : vector<8x384xf32>
    %c26 = arith.constant 26 : index
    %180 = memref.load %arg1[%c26] : memref<27xf32, #tpu.memory_space<smem>>
    %181 = vector.broadcast %180 : f32 to vector<8x384xf32>
    %182 = arith.mulf %181, %150 : vector<8x384xf32>
    %183 = arith.addf %179, %182 : vector<8x384xf32>
    %c1_i32_35 = arith.constant 1 : i32
    %184 = tpu.dynamic_rotate %161 by %c1_i32_35 dim 1 : vector<8x384xf32>, i32 -> vector<8x384xf32>
    %185 = arith.addf %184, %172 : vector<8x384xf32>
    %c383_i32_36 = arith.constant 383 : i32
    %186 = tpu.dynamic_rotate %183 by %c383_i32_36 dim 1 : vector<8x384xf32>, i32 -> vector<8x384xf32>
    %187 = arith.addf %185, %186 : vector<8x384xf32>
    %c2_37 = arith.constant 2 : index
    %188 = memref.load %arg2[%c2_37] : memref<3xf32, #tpu.memory_space<smem>>
    %189 = vector.broadcast %188 : f32 to vector<8x384xf32>
    %190 = arith.addf %187, %189 : vector<8x384xf32>
    %cst_38 = arith.constant -1.000000e+30 : f32
    %191 = vector.broadcast %cst_38 : f32 to vector<8x384xf32>
    %192 = arith.select %15, %190, %191 : vector<8x384xi1>, vector<8x384xf32>
    %c1_i32_39 = arith.constant 1 : i32
    %193 = tpu.dynamic_rotate %192 by %c1_i32_39 dim 1 : vector<8x384xf32>, i32 -> vector<8x384xf32>
    %c383_i32_40 = arith.constant 383 : i32
    %194 = tpu.dynamic_rotate %192 by %c383_i32_40 dim 1 : vector<8x384xf32>, i32 -> vector<8x384xf32>
    %195 = arith.maximumf %193, %194 : vector<8x384xf32>
    %196 = arith.maximumf %192, %195 : vector<8x384xf32>
    %c1_i32_41 = arith.constant 1 : i32
    %197 = tpu.dynamic_rotate %196 by %c1_i32_41 dim 0 : vector<8x384xf32>, i32 -> vector<8x384xf32>
    %cst_42 = arith.constant -1.000000e+30 : f32
    %198 = vector.broadcast %cst_42 : f32 to vector<8x384xf32>
    %199 = arith.select %17, %198, %197 : vector<8x384xi1>, vector<8x384xf32>
    %c7_i32_43 = arith.constant 7 : i32
    %200 = tpu.dynamic_rotate %196 by %c7_i32_43 dim 0 : vector<8x384xf32>, i32 -> vector<8x384xf32>
    %cst_44 = arith.constant -1.000000e+30 : f32
    %201 = vector.broadcast %cst_44 : f32 to vector<8x384xf32>
    %202 = arith.select %19, %201, %200 : vector<8x384xi1>, vector<8x384xf32>
    %203 = arith.maximumf %199, %202 : vector<8x384xf32>
    %204 = arith.maximumf %196, %203 : vector<8x384xf32>
    %cst_45 = arith.constant 0.000000e+00 : f32
    %205 = vector.broadcast %cst_45 : f32 to vector<8x384xf32>
    %206 = arith.select %15, %204, %205 : vector<8x384xi1>, vector<8x384xf32>
    %207 = vector.shape_cast %206 : vector<8x384xf32> to vector<1x8x384xf32>
    %cst_46 = arith.constant dense<0.000000e+00> : vector<1xf32>
    %208 = vector.multi_reduction <add>, %207, %cst_46 [1, 2] : vector<1x8x384xf32> to vector<1xf32>
    %209 = vector.shape_cast %208 : vector<1xf32> to vector<1x1x1xf32>
    %210 = vector.extract %209[0, 0, 0] : f32 from vector<1x1x1xf32>
    %cst_47 = arith.constant 2.400000e+03 : f32
    %211 = arith.divf %210, %cst_47 : f32
    %212 = vector.broadcast %211 : f32 to vector<8x384xf32>
    %213 = arith.subf %206, %212 : vector<8x384xf32>
    %cst_48 = arith.constant 0.000000e+00 : f32
    %214 = vector.broadcast %cst_48 : f32 to vector<8x384xf32>
    %215 = arith.select %15, %213, %214 : vector<8x384xi1>, vector<8x384xf32>
    %216 = arith.mulf %215, %215 : vector<8x384xf32>
    %217 = vector.shape_cast %216 : vector<8x384xf32> to vector<1x8x384xf32>
    %cst_49 = arith.constant dense<0.000000e+00> : vector<1xf32>
    %218 = vector.multi_reduction <add>, %217, %cst_49 [1, 2] : vector<1x8x384xf32> to vector<1xf32>
    %219 = vector.shape_cast %218 : vector<1xf32> to vector<1x1x1xf32>
    %220 = vector.extract %219[0, 0, 0] : f32 from vector<1x1x1xf32>
    %cst_50 = arith.constant 2.400000e+03 : f32
    %221 = arith.divf %220, %cst_50 : f32
    %cst_51 = arith.constant 9.99999974E-6 : f32
    %222 = arith.addf %221, %cst_51 : f32
    %223 = math.rsqrt %222 : f32
    %224 = vector.extract_strided_slice %206 {offsets = [7, 0], sizes = [1, 384], strides = [1, 1]} : vector<8x384xf32> to vector<1x384xf32>
    %225 = vector.broadcast %211 : f32 to vector<1x384xf32>
    %226 = arith.subf %224, %225 : vector<1x384xf32>
    %227 = vector.broadcast %223 : f32 to vector<1x384xf32>
    %228 = arith.mulf %226, %227 : vector<1x384xf32>
    %c0_i32_52 = arith.constant 0 : i32
    %229 = tpu.memref_slice %arg17[%c0_i32_52] : memref<6x!tpu.dma_semaphore, #tpu.memory_space<semaphore_mem>> -> memref<1x!tpu.dma_semaphore, #tpu.memory_space<semaphore_mem>>
    %230 = tpu.memref_squeeze %229 : memref<1x!tpu.dma_semaphore, #tpu.memory_space<semaphore_mem>> -> memref<!tpu.dma_semaphore, #tpu.memory_space<semaphore_mem>>
    tpu.wait_dma2 semaphore(%230 : memref<!tpu.dma_semaphore, #tpu.memory_space<semaphore_mem>>) src(%arg3 : memref<384x1152xbf16, #tpu.memory_space<any>>) dst(%arg11 : memref<384x1152xbf16, #tpu.memory_space<vmem>>)
    %c1_i32_53 = arith.constant 1 : i32
    %231 = tpu.memref_slice %arg17[%c1_i32_53] : memref<6x!tpu.dma_semaphore, #tpu.memory_space<semaphore_mem>> -> memref<1x!tpu.dma_semaphore, #tpu.memory_space<semaphore_mem>>
    %232 = tpu.memref_squeeze %231 : memref<1x!tpu.dma_semaphore, #tpu.memory_space<semaphore_mem>> -> memref<!tpu.dma_semaphore, #tpu.memory_space<semaphore_mem>>
    tpu.wait_dma2 semaphore(%232 : memref<!tpu.dma_semaphore, #tpu.memory_space<semaphore_mem>>) src(%arg4 : memref<1x1152xf32, #tpu.memory_space<any>>) dst(%arg12 : memref<1x1152xf32, #tpu.memory_space<vmem>>)
    %233 = arith.truncf %228 : vector<1x384xf32> to vector<1x384xbf16>
    %c0_54 = arith.constant 0 : index
    %c0_55 = arith.constant 0 : index
    %234 = vector.load %arg11[%c0_54, %c0_55] : memref<384x1152xbf16, #tpu.memory_space<vmem>>, vector<384x1152xbf16>
    %cst_56 = arith.constant dense<0.000000e+00> : vector<1x1152xf32>
    %235 = tpu.matmul %233, %234, %cst_56 {dimension_numbers = #tpu.dot_dimension_numbers<[1], [0], [0], [1], [0, 0, 1, 1], [], []>} : vector<1x384xbf16>, vector<384x1152xbf16>, vector<1x1152xf32> -> vector<1x1152xf32>
    %c0_57 = arith.constant 0 : index
    %c0_58 = arith.constant 0 : index
    %236 = vector.load %arg12[%c0_57, %c0_58] : memref<1x1152xf32, #tpu.memory_space<vmem>>, vector<1x1152xf32>
    %237 = arith.addf %235, %236 : vector<1x1152xf32>
    %238 = vector.extract_strided_slice %237 {offsets = [0, 0], sizes = [1, 384], strides = [1, 1]} : vector<1x1152xf32> to vector<1x384xf32>
    %239 = vector.extract_strided_slice %237 {offsets = [0, 384], sizes = [1, 384], strides = [1, 1]} : vector<1x1152xf32> to vector<1x384xf32>
    %240 = vector.extract_strided_slice %237 {offsets = [0, 768], sizes = [1, 384], strides = [1, 1]} : vector<1x1152xf32> to vector<1x384xf32>
    %241 = arith.negf %240 : vector<1x384xf32>
    %242 = math.exp %241 : vector<1x384xf32>
    %cst_59 = arith.constant 1.000000e+00 : f32
    %243 = vector.broadcast %cst_59 : f32 to vector<1x384xf32>
    %244 = arith.addf %243, %242 : vector<1x384xf32>
    %245 = arith.divf %243, %244 : vector<1x384xf32>
    %246 = arith.negf %238 : vector<1x384xf32>
    %247 = math.exp %246 : vector<1x384xf32>
    %cst_60 = arith.constant 1.000000e+00 : f32
    %248 = vector.broadcast %cst_60 : f32 to vector<1x384xf32>
    %249 = arith.addf %248, %247 : vector<1x384xf32>
    %250 = arith.divf %248, %249 : vector<1x384xf32>
    %251 = math.tanh %239 : vector<1x384xf32>
    %252 = arith.mulf %250, %251 : vector<1x384xf32>
    %253 = math.tanh %252 : vector<1x384xf32>
    %254 = arith.mulf %245, %253 : vector<1x384xf32>
    %c2_i32_61 = arith.constant 2 : i32
    %255 = tpu.memref_slice %arg17[%c2_i32_61] : memref<6x!tpu.dma_semaphore, #tpu.memory_space<semaphore_mem>> -> memref<1x!tpu.dma_semaphore, #tpu.memory_space<semaphore_mem>>
    %256 = tpu.memref_squeeze %255 : memref<1x!tpu.dma_semaphore, #tpu.memory_space<semaphore_mem>> -> memref<!tpu.dma_semaphore, #tpu.memory_space<semaphore_mem>>
    tpu.wait_dma2 semaphore(%256 : memref<!tpu.dma_semaphore, #tpu.memory_space<semaphore_mem>>) src(%arg5 : memref<384x1152xbf16, #tpu.memory_space<any>>) dst(%arg13 : memref<384x1152xbf16, #tpu.memory_space<vmem>>)
    %c3_i32_62 = arith.constant 3 : i32
    %257 = tpu.memref_slice %arg17[%c3_i32_62] : memref<6x!tpu.dma_semaphore, #tpu.memory_space<semaphore_mem>> -> memref<1x!tpu.dma_semaphore, #tpu.memory_space<semaphore_mem>>
    %258 = tpu.memref_squeeze %257 : memref<1x!tpu.dma_semaphore, #tpu.memory_space<semaphore_mem>> -> memref<!tpu.dma_semaphore, #tpu.memory_space<semaphore_mem>>
    tpu.wait_dma2 semaphore(%258 : memref<!tpu.dma_semaphore, #tpu.memory_space<semaphore_mem>>) src(%arg6 : memref<1x1152xf32, #tpu.memory_space<any>>) dst(%arg14 : memref<1x1152xf32, #tpu.memory_space<vmem>>)
    %259 = arith.truncf %254 : vector<1x384xf32> to vector<1x384xbf16>
    %c0_63 = arith.constant 0 : index
    %c0_64 = arith.constant 0 : index
    %260 = vector.load %arg13[%c0_63, %c0_64] : memref<384x1152xbf16, #tpu.memory_space<vmem>>, vector<384x1152xbf16>
    %cst_65 = arith.constant dense<0.000000e+00> : vector<1x1152xf32>
    %261 = tpu.matmul %259, %260, %cst_65 {dimension_numbers = #tpu.dot_dimension_numbers<[1], [0], [0], [1], [0, 0, 1, 1], [], []>} : vector<1x384xbf16>, vector<384x1152xbf16>, vector<1x1152xf32> -> vector<1x1152xf32>
    %c0_66 = arith.constant 0 : index
    %c0_67 = arith.constant 0 : index
    %262 = vector.load %arg14[%c0_66, %c0_67] : memref<1x1152xf32, #tpu.memory_space<vmem>>, vector<1x1152xf32>
    %263 = arith.addf %261, %262 : vector<1x1152xf32>
    %264 = vector.extract_strided_slice %263 {offsets = [0, 0], sizes = [1, 384], strides = [1, 1]} : vector<1x1152xf32> to vector<1x384xf32>
    %265 = vector.extract_strided_slice %263 {offsets = [0, 384], sizes = [1, 384], strides = [1, 1]} : vector<1x1152xf32> to vector<1x384xf32>
    %266 = vector.extract_strided_slice %263 {offsets = [0, 768], sizes = [1, 384], strides = [1, 1]} : vector<1x1152xf32> to vector<1x384xf32>
    %267 = arith.negf %266 : vector<1x384xf32>
    %268 = math.exp %267 : vector<1x384xf32>
    %cst_68 = arith.constant 1.000000e+00 : f32
    %269 = vector.broadcast %cst_68 : f32 to vector<1x384xf32>
    %270 = arith.addf %269, %268 : vector<1x384xf32>
    %271 = arith.divf %269, %270 : vector<1x384xf32>
    %272 = arith.negf %264 : vector<1x384xf32>
    %273 = math.exp %272 : vector<1x384xf32>
    %cst_69 = arith.constant 1.000000e+00 : f32
    %274 = vector.broadcast %cst_69 : f32 to vector<1x384xf32>
    %275 = arith.addf %274, %273 : vector<1x384xf32>
    %276 = arith.divf %274, %275 : vector<1x384xf32>
    %277 = math.tanh %265 : vector<1x384xf32>
    %278 = arith.mulf %276, %277 : vector<1x384xf32>
    %279 = math.tanh %278 : vector<1x384xf32>
    %280 = arith.mulf %271, %279 : vector<1x384xf32>
    %c0_70 = arith.constant 0 : index
    %c0_71 = arith.constant 0 : index
    %281 = vector.load %arg9[%c0_70, %c0_71] : memref<1x384xf32, #tpu.memory_space<vmem>>, vector<1x384xf32>
    tpu.vector_store %arg9[%c0_70, %c0_71], %280 {strides = array<i32>} : memref<1x384xf32, #tpu.memory_space<vmem>>, vector<1x384xf32>,
    %c4_i32_72 = arith.constant 4 : i32
    %282 = tpu.memref_slice %arg17[%c4_i32_72] : memref<6x!tpu.dma_semaphore, #tpu.memory_space<semaphore_mem>> -> memref<1x!tpu.dma_semaphore, #tpu.memory_space<semaphore_mem>>
    %283 = tpu.memref_squeeze %282 : memref<1x!tpu.dma_semaphore, #tpu.memory_space<semaphore_mem>> -> memref<!tpu.dma_semaphore, #tpu.memory_space<semaphore_mem>>
    tpu.wait_dma2 semaphore(%283 : memref<!tpu.dma_semaphore, #tpu.memory_space<semaphore_mem>>) src(%arg7 : memref<384x128xbf16, #tpu.memory_space<any>>) dst(%arg15 : memref<384x128xbf16, #tpu.memory_space<vmem>>)
    %c5_i32_73 = arith.constant 5 : i32
    %284 = tpu.memref_slice %arg17[%c5_i32_73] : memref<6x!tpu.dma_semaphore, #tpu.memory_space<semaphore_mem>> -> memref<1x!tpu.dma_semaphore, #tpu.memory_space<semaphore_mem>>
    %285 = tpu.memref_squeeze %284 : memref<1x!tpu.dma_semaphore, #tpu.memory_space<semaphore_mem>> -> memref<!tpu.dma_semaphore, #tpu.memory_space<semaphore_mem>>
    tpu.wait_dma2 semaphore(%285 : memref<!tpu.dma_semaphore, #tpu.memory_space<semaphore_mem>>) src(%arg8 : memref<1x128xf32, #tpu.memory_space<any>>) dst(%arg16 : memref<1x128xf32, #tpu.memory_space<vmem>>)
    %286 = arith.truncf %280 : vector<1x384xf32> to vector<1x384xbf16>
    %c0_74 = arith.constant 0 : index
    %c0_75 = arith.constant 0 : index
    %287 = vector.load %arg15[%c0_74, %c0_75] : memref<384x128xbf16, #tpu.memory_space<vmem>>, vector<384x128xbf16>
    %cst_76 = arith.constant dense<0.000000e+00> : vector<1x128xf32>
    %288 = tpu.matmul %286, %287, %cst_76 {dimension_numbers = #tpu.dot_dimension_numbers<[1], [0], [0], [1], [0, 0, 1, 1], [], []>} : vector<1x384xbf16>, vector<384x128xbf16>, vector<1x128xf32> -> vector<1x128xf32>
    %c0_77 = arith.constant 0 : index
    %c0_78 = arith.constant 0 : index
    %289 = vector.load %arg16[%c0_77, %c0_78] : memref<1x128xf32, #tpu.memory_space<vmem>>, vector<1x128xf32>
    %290 = arith.addf %288, %289 : vector<1x128xf32>
    %cst_79 = arith.constant dense<0xFF800000> : vector<1xf32>
    %291 = vector.multi_reduction <maximumf>, %290, %cst_79 [1] : vector<1x128xf32> to vector<1xf32>
    %292 = vector.shape_cast %291 : vector<1xf32> to vector<1x1xf32>
    %293 = vector.broadcast %292 : vector<1x1xf32> to vector<1x128xf32>
    %294 = arith.subf %290, %293 : vector<1x128xf32>
    %295 = math.exp %294 : vector<1x128xf32>
    %cst_80 = arith.constant dense<0.000000e+00> : vector<1xf32>
    %296 = vector.multi_reduction <add>, %295, %cst_80 [1] : vector<1x128xf32> to vector<1xf32>
    %297 = vector.shape_cast %296 : vector<1xf32> to vector<1x1xf32>
    %298 = vector.broadcast %297 : vector<1x1xf32> to vector<1x128xf32>
    %299 = arith.divf %295, %298 : vector<1x128xf32>
    %c0_81 = arith.constant 0 : index
    %c0_82 = arith.constant 0 : index
    %300 = vector.load %arg10[%c0_81, %c0_82] : memref<1x128xf32, #tpu.memory_space<vmem>>, vector<1x128xf32>
    tpu.vector_store %arg10[%c0_81, %c0_82], %299 {strides = array<i32>} : memref<1x128xf32, #tpu.memory_space<vmem>>, vector<1x128xf32>,
    return
  }
}

</mosaic_0001>

<bundles_post_ra>
// kernel: maad_agent_forward.1
= control target key start
LH: loop header
LB: loop body
LE: loop exit
PB: predicated region body
PF: predicated region fallthrough
CT: control target
= control target key end

     0   :  { %16 = vsyncpa [#allocation11], 0  ;;  %s3524_s0 = inlined_call_operand.vmem [shape: f32[8,384], index: 0, kind: input, shape index: {}]   ;;  %s3525_s1 = inlined_call_operand.vmem [shape: f32[27], index: 1, kind: input, shape index: {}]   ;;  %s3526_s2 = inlined_call_operand.vmem [shape: f32[3], index: 2, kind: input, shape index: {}]   ;;  %s3527_s3 = inlined_call_operand.hbm [shape: bf16[384,1152], index: 3, kind: input, shape index: {}]   ;;  %s3528_s4 = inlined_call_operand.vmem [shape: f32[1,1152], index: 4, kind: input, shape index: {}]   ;;  %s3529_s5 = inlined_call_operand.hbm [shape: bf16[384,1152], index: 5, kind: input, shape index: {}]   ;;  %s3530_s6 = inlined_call_operand.vmem [shape: f32[1,1152], index: 6, kind: input, shape index: {}]   ;;  %s3531_s7 = inlined_call_operand.hbm [shape: bf16[384,128], index: 7, kind: input, shape index: {}]   ;;  %s3532_s8 = inlined_call_operand.vmem [shape: f32[1,128], index: 8, kind: input, shape index: {}]   ;;  %s3533_s9 = inlined_call_operand.vmem [shape: f32[1,384], index: 9, kind: output, shape index: {0}]   ;;  %s3534_s10 = inlined_call_operand.hbm [shape: f32[1,128], index: 10, kind: output, shape index: {1}]  }
   0x1   :  { %17 = vsyncpa [#allocation13], 0 }
   0x2   :  { %18 = vsyncpa [#allocation10], 0  ;;  %s27_s15 = sshll.u32 %s3525_s1, 4  ;;  %s37_s18 = sshll.u32 %s3526_s2, 4  ;;  %s28_s15 = int_to_ptr.vmem [resolvable:$true] %s27_s15  ;;  %s38_s18 = int_to_ptr.vmem [resolvable:$true] %s37_s18 }
   0x3   :  { %s2898_s19 = scalar_lea.vmem %s28_s15, 16  ;;  %p2903_p1 = scmp.lt.s32.totalorder %s28_s15, %s28_s15 }
   0x4   :  { %p2899_p0 = scmp.ne.s32.totalorder %s28_s15, %s2898_s19  ;;  %p2904_p2 = scmp.lt.s32.totalorder %s2898_s19, %s2898_s19 }
   0x6   :  { %p2905_p3 = por %p2904_p2, %p2903_p1 }
   0x8   :  { %p2906_p4 = pnand %p2905_p3, %p2899_p0 }
   0xa   :  { %2909 = shalt.err (!%p2906_p4)
}
   0xb   :  { %s2984_s20 = smov [#allocation9]   ;;  %s2910_s21 = scalar_lea.vmem %s38_s18, 16 }
   0xc   :  { %30 = dma.vmem_to_smem %s28_s15, 16, %s2984_s20, [#allocation11]  }
   0xd   :  { %p2911_p5 = scmp.ne.s32.totalorder %s38_s18, %s2910_s21  ;;  %p2915_p6 = scmp.lt.s32.totalorder %s38_s18, %s38_s18 }
   0xe   :  { %p2916_p7 = scmp.lt.s32.totalorder %s2910_s21, %s2910_s21 }
  0x10   :  { %p2917_p8 = por %p2916_p7, %p2915_p6 }
  0x12   :  { %p2918_p9 = pnand %p2917_p8, %p2911_p5 }
  0x14   :  { %2921 = shalt.err (!%p2918_p9)
}
  0x15   :  { %s2985_s1 = smov [#allocation12]  }
  0x16   :  { %40 = dma.vmem_to_smem %s38_s18, 16, %s2985_s1, [#allocation13]  }
  0x17   :  { %2966 = dma.done.wait [#allocation11], 16  }
  0x18   :  { %2967 = vsyncadd [#allocation11], 4294967280 }
  0x19   :  { %2968 = dma.done.wait [#allocation13], 16  }
  0x1a   :  { %2969 = vsyncadd [#allocation13], 4294967280 }
  0x1b   :  { %47 = sfence }
  0x1c   :  { %s53_s2 = sld [smem:[#allocation0]]   ;;  %s2986_s22 = smov [#allocation2]  }
  0x1d   :  { %s61_s23 = sshll.u32 %s2986_s22, 4  ;;  %s2987_s24 = smov 1152   ;;  %s62_s23 = int_to_ptr.vmem [resolvable:$true] %s61_s23 }
  0x1e   :  { %65 = sst [smem:[#allocation16]] %s2987_s24  ;;  %s2988_s25 = smov 9  }
  0x1f   :  { %67 = sst [smem:[#allocation16 + $0x1]] %s2987_s24  ;;  %s2989_s26 = smov 64  }
  0x20   :  { %69 = sst [smem:[#allocation16 + $0x2]] %s2988_s25  ;;  %s2990_s28 = smov 128  }
  0x21   :  { %71 = sst [smem:[#allocation16 + $0x3]] %s2989_s26  ;;  %s2991_s30 = smov 2  }
  0x22   :  { %s2536_s27 = sshll.u32 %s53_s2, 26  ;;  %73 = sst [smem:[#allocation16 + $0x4]] %s2990_s28 }
  0x23   :  { %s3069_s29 = sadd.s32 134217728, %s2536_s27  ;;  %75 = sst [smem:[#allocation16 + $0x5]] %s2991_s30 }
  0x24   :  { %s2992_s11 = smov 576   ;;  %79 = sst [smem:[#allocation16 + $0x7]] %s2989_s26 }
  0x25   :  { %77 = sst [smem:[#allocation16 + $0x6]] %s2992_s11  ;;  %s2993_s12 = smov 4  }
  0x26   :  { %81 = sst [smem:[#allocation16 + $0x8]] %s2993_s12  ;;  %s2994_s13 = smov [#allocation8]  }
  0x27   :  { %s2995_s14 = smov [#allocation15]  }
  0x28   :  { %83 = dma.general %s3527_s3, 27648, %s62_s23, %s2994_s13, %s2995_s14, [#allocation16], %s3069_s29, 0  }
  0x29   :  { %v122_v0 = vld [vmem:[%s3528_s4] sm:$0xff]  ;;  %v2538_v1 = vld [vmem:[%s3528_s4 + $0x8] sm:$0x1] }
  0x2a   :  { %123 = vst [vmem:[#allocation3] sm:$0xff] %v122_v0  ;;  %134 = vst [vmem:[#allocation3 + $0x8] sm:$0x1] %v2538_v1 }
  0x2b   :  { %138 = vsyncadd [#allocation8 + $0x1], 144  ;;  %155 = sst [smem:[#allocation19]] %s2987_s24  ;;  %s2996_s21 = smov [#allocation4]  }
  0x2c   :  { %s151_s1 = sshll.u32 %s2996_s21, 4  ;;  %157 = sst [smem:[#allocation19 + $0x1]] %s2987_s24  ;;  %s152_s1 = int_to_ptr.vmem [resolvable:$true] %s151_s1 }
  0x2d   :  { %159 = sst [smem:[#allocation19 + $0x2]] %s2988_s25  ;;  %s2997_s3 = smov [#allocation8 + $0x2]  }
  0x2e   :  { %161 = sst [smem:[#allocation19 + $0x3]] %s2989_s26  ;;  %s2998_s4 = smov [#allocation18]  }
  0x2f   :  { %163 = sst [smem:[#allocation19 + $0x4]] %s2990_s28 }
  0x30   :  { %165 = sst [smem:[#allocation19 + $0x5]] %s2991_s30 }
  0x31   :  { %167 = sst [smem:[#allocation19 + $0x6]] %s2992_s11 }
  0x32   :  { %169 = sst [smem:[#allocation19 + $0x7]] %s2989_s26 }
  0x33   :  { %171 = sst [smem:[#allocation19 + $0x8]] %s2993_s12 }
  0x34   :  { %173 = dma.general %s3529_s5, 27648, %s152_s1, %s2997_s3, %s2998_s4, [#allocation19], %s3069_s29, 0  }
  0x35   :  { %v212_v2 = vld [vmem:[%s3530_s6] sm:$0xff]  ;;  %v2541_v3 = vld [vmem:[%s3530_s6 + $0x8] sm:$0x1] }
  0x36   :  { %213 = vst [vmem:[#allocation5] sm:$0xff] %v212_v2  ;;  %224 = vst [vmem:[#allocation5 + $0x8] sm:$0x1] %v2541_v3 }
  0x37   :  { %228 = vsyncadd [#allocation8 + $0x3], 144  ;;  %v259_v4 = vld [vmem:[%s3532_s8] sm:$0x1]  ;;  %s2999_s30 = smov [#allocation6]   ;;  %s2922_s12 = scalar_lea.hbm %s3531_s7, 3072 }
  0x38   :  { %s237_s11 = sshll.u32 %s2999_s30, 4  ;;  %260 = vst [vmem:[#allocation7] sm:$0x1] %v259_v4  ;;  %p2923_p10 = scmp.ne.s32.totalorder %s3531_s7, %s2922_s12  ;;  %s238_s11 = int_to_ptr.vmem [resolvable:$true] %s237_s11 }
  0x39   :  { %p2926_p11 = scmp.lt.u32.totalorder %s2922_s12, %s3531_s7 }
  0x3b   :  { %p2928_p12 = pnand %p2926_p11, %p2923_p10 }
  0x3d   :  { %2931 = shalt.err (!%p2928_p12)  }
  0x3e   :  { %s2932_s16 = scalar_lea.vmem %s238_s11, 3072  ;;  %p2937_p0 = scmp.lt.s32.totalorder %s238_s11, %s238_s11 }
  0x3f   :  { %p2933_p13 = scmp.ne.s32.totalorder %s238_s11, %s2932_s16  ;;  %p2938_p1 = scmp.lt.s32.totalorder %s2932_s16, %s2932_s16 }
  0x41   :  { %p2939_p2 = por %p2938_p1, %p2937_p0 }
  0x43   :  { %p2940_p3 = pnand %p2939_p2, %p2933_p13 }
  0x45   :  { %2943 = shalt.err (!%p2940_p3)  }
  0x46   :  { %240 = dma.hbm_to_vmem [thread:$0]  %s3531_s7, 3072, %s238_s11, [#allocation8 + $0x4]  ;;  %v286_v5 = vlaneseq  ;;  %v3112_v6 = vld [vmem:[%s3524_s0 + $0x8] sm:$0xff]  ;;  %v3117_v7 = vld [vmem:[%s3524_s0] sm:$0xff]  ;;  %v3129_v13 = vld [vmem:[%s3524_s0 + $0x10] sm:$0xff] }
  0x47   :  { %s312_s20 = sld [smem:[#allocation9]]  ;;  %s2542_s21 = sld [smem:[#allocation9 + $0x3]]  ;;  %v301_v8 = vrot.slane %v3112_v6, 7  ;;  %v307_v9 = vrot.slane %v3112_v6, 1  ;;  %v300_v10 = vrot.slane %v3117_v7, 7  ;;  %v306_v12 = vrot.slane %v3117_v7, 1 }
  0x48   :  { %s2543_s4 = sld [smem:[#allocation9 + $0x6]]  ;;  %v3123_v11 = vshrl.u32 %v286_v5, 7  ;;  %s2547_s22 = sld [smem:[#allocation9 + $0x2]]  ;;  %v302_v14 = vrot.slane %v3129_v13, 7  ;;  %v308_v15 = vrot.slane %v3129_v13, 1 }
  0x49   :  { %s2548_s23 = sld [smem:[#allocation9 + $0x5]]  ;;  %s2549_s27 = sld [smem:[#allocation9 + $0x8]] }
  0x4a   :  { %vm295_vm0 = vcmp.eq.s32.totalorder %v3123_v11, 0  ;;  %vm296_vm1 = vcmp.eq.s32.totalorder %v3123_v11, 7  ;;  %s3145_s0 = sld [smem:[#allocation9 + $0x1]]  ;;  %s3151_s24 = sld [smem:[#allocation9 + $0x4]] }
  0x4b   :  { %v304_v16 = vsel %vm295_vm0, 0.0, %v301_v8  ;;  %v310_v17 = vsel %vm296_vm1, 0.0, %v307_v9  ;;  %v3141_v18 = vsel %vm295_vm0, 0.0, %v300_v10  ;;  %v309_v19 = vsel %vm296_vm1, 0.0, %v306_v12 }
  0x4c   :  { %v305_v22 = vsel %vm295_vm0, 0.0, %v302_v14  ;;  %v311_v23 = vsel %vm296_vm1, 0.0, %v308_v15 }
  0x4d   :  { %v313_v20 = vstv %s312_s20  ;;  %v318_v21 = vstv %s2542_s21 }
  0x4e   :  { %285 = vsyncadd [#allocation8 + $0x5], 16  ;;  %v315_v24 = vmul.f32 %v313_v20, %v304_v16  ;;  %v320_v25 = vmul.f32 %v318_v21, %v3112_v6  ;;  %v326_v26 = vstv %s2543_s4  ;;  %v314_v27 = vmul.f32 %v313_v20, %v3141_v18  ;;  %s3156_s25 = sld [smem:[#allocation9 + $0x7]]  ;;  %s3000_s28 = smov 1  }
  0x4f   :  { %v328_v28 = vmul.f32 %v326_v26, %v310_v17  ;;  %v319_v29 = vmul.f32 %v318_v21, %v3117_v7  ;;  %v327_v30 = vmul.f32 %v326_v26, %v309_v19  ;;  %v316_v31 = vmul.f32 %v313_v20, %v305_v22  ;;  %s3001_s26 = smov 127   ;;  %s401_s30 = sld [smem:[#allocation12]] }
  0x50   :  { %v323_v32 = vadd.f32 %v320_v25, %v315_v24  ;;  %v321_v33 = vmul.f32 %v318_v21, %v3129_v13  ;;  %v329_v34 = vmul.f32 %v326_v26, %v311_v23  ;;  %v355_v35 = vstv %s2547_s22  ;;  %s2557_s11 = sld [smem:[#allocation9 + $0xe]]  ;;  %s2551_s5 = sld [smem:[#allocation9 + $0xc]] }
  0x51   :  { %v322_v36 = vadd.f32 %v319_v29, %v314_v27  ;;  %v356_v37 = vmul.f32 %v355_v35, %v3141_v18  ;;  %v360_v38 = vstv %s2548_s23  ;;  %v368_v39 = vstv %s2549_s27  ;;  %s2556_s29 = sld [smem:[#allocation9 + $0xb]]  ;;  %s2558_s12 = sld [smem:[#allocation9 + $0x11]] }
  0x52   :  { %v331_v40 = vadd.f32 %v328_v28, %v323_v32  ;;  %v324_v41 = vadd.f32 %v321_v33, %v316_v31  ;;  %v361_v42 = vmul.f32 %v360_v38, %v3117_v7  ;;  %v369_v43 = vmul.f32 %v368_v39, %v309_v19  ;;  %s2550_s13 = sld [smem:[#allocation9 + $0x9]]  ;;  %s2552_s14 = sld [smem:[#allocation9 + $0xf]] }
  0x53   :  { %v330_v44 = vadd.f32 %v327_v30, %v322_v36  ;;  %v358_v45 = vmul.f32 %v355_v35, %v305_v22  ;;  %v363_v46 = vmul.f32 %v360_v38, %v3129_v13  ;;  %v371_v47 = vmul.f32 %v368_v39, %v311_v23  ;;  %s2554_s6 = sld [smem:[#allocation9 + $0xd]]  ;;  %s2553_s15 = sld [smem:[#allocation9 + $0xa]] }
  0x54   :  { %377 = vrot.lane.b32.xlu0 %v331_v40, %s3000_s28  ;;  %v332_v48 = vadd.f32 %v329_v34, %v324_v41  ;;  %v364_v49 = vadd.f32 %v361_v42, %v356_v37  ;;  %v357_v50 = vmul.f32 %v355_v35, %v304_v16  ;;  %v362_v51 = vmul.f32 %v360_v38, %v3112_v6  ;;  %s2555_s16 = sld [smem:[#allocation9 + $0x10]]  ;;  %s2559_s8 = sld [smem:[#allocation12 + $0x1]] }
  0x55   :  { %375 = vrot.lane.b32.xlu1 %v330_v44, %s3000_s28  ;;  %v366_v52 = vadd.f32 %v363_v46, %v358_v45  ;;  %v370_v53 = vmul.f32 %v368_v39, %v310_v17  ;;  %v334_v54 = vstv %s3145_s0  ;;  %v339_v55 = vstv %s3151_s24  ;;  %s2567_s17 = sld [smem:[#allocation9 + $0x17]]  ;;  %s2561_s18 = sld [smem:[#allocation9 + $0x15]] }
  0x56   :  { %v372_v56 = vadd.f32 %v369_v43, %v364_v49  ;;  %v365_v57 = vadd.f32 %v362_v51, %v357_v50  ;;  %v336_v58 = vmul.f32 %v334_v54, %v304_v16  ;;  %v341_v59 = vmul.f32 %v339_v55, %v3112_v6  ;;  %s2566_s19 = sld [smem:[#allocation9 + $0x14]]  ;;  %s2564_s20 = sld [smem:[#allocation9 + $0x16]] }
  0x57   :  { %v347_v60 = vstv %s3156_s25  ;;  %v337_v61 = vmul.f32 %v334_v54, %v305_v22  ;;  %v374_v62 = vadd.f32 %v371_v47, %v366_v52  ;;  %v340_v1 = vmul.f32 %v339_v55, %v3117_v7  ;;  %s2568_s21 = sld [smem:[#allocation9 + $0x1a]]  ;;  %s2562_s3 = sld [smem:[#allocation9 + $0x18]] }
  0x58   :  { %379 = vrot.lane.b32.xlu0 %v332_v48, %s3000_s28  ;;  %v344_v63 = vadd.f32 %v341_v59, %v336_v58  ;;  %v349_v0 = vmul.f32 %v347_v60, %v310_v17  ;;  %v373_v2 = vadd.f32 %v370_v53, %v365_v57  ;;  %v342_v3 = vmul.f32 %v339_v55, %v3129_v13  ;;  %s2560_s1 = sld [smem:[#allocation9 + $0x12]]  ;;  %s2563_s4 = sld [smem:[#allocation9 + $0x13]] }
  0x59   :  { %388 = vrot.lane.b32.xlu1 %v372_v56, %s3001_s26  ;;  %v350_v4 = vmul.f32 %v347_v60, %v311_v23  ;;  %v348_v9 = vmul.f32 %v347_v60, %v309_v19  ;;  %v335_v6 = vmul.f32 %v334_v54, %v3141_v18  ;;  %v3177_v7 = vand.u32 127, %v286_v5  ;;  %s2565_s7 = sld [smem:[#allocation9 + $0x19]]  ;;  %s2569_s2 = sld [smem:[#allocation12 + $0x2]] }
  0x5a   :  { %v352_v8 = vadd.f32 %v349_v0, %v344_v63  ;;  %v345_v10 = vadd.f32 %v342_v3, %v337_v61  ;;  %v402_v28 = vstv %s401_s30 }
  0x5b   :  { %v343_v12 = vadd.f32 %v340_v1, %v335_v6  ;;  %vm381_vm2 = vcmp.lt.s32.totalorder %v3177_v7, 1  ;;  %vm394_vm3 = vcmp.lt.s32.totalorder %v3177_v7, 127  ;;  %v3186_v21 = vadd.s32 256, %v3177_v7 }
  0x5c   :  { %392 = vrot.lane.b32.xlu0 %v374_v62, %s3001_s26  ;;  %v353_v14 = vadd.f32 %v350_v4, %v345_v10 }
  0x5d   :  { %390 = vrot.lane.b32.xlu1 %v373_v2, %s3001_s26  ;;  %v351_v15 = vadd.f32 %v348_v9, %v343_v12  ;;  %vm294_vm4 = vcmp.lt.s32.totalorder %v3186_v21, 300 }
  0xc6   :  { %v378_v16 = vpop.permute.xlu0 %377 }
  0xc7   :  { %v376_v17 = vpop.permute.xlu1 %375 }
  0xc8   :  { %v383_v20 = vsel %vm381_vm2, %v376_v17, %v378_v16 }
  0xc9   :  { %v386_v25 = vadd.f32 %v383_v20, %v352_v8 }
  0xca   :  { %v380_v13 = vpop.permute.xlu0 %379 }
  0xcb   :  { %v382_v18 = vsel %vm381_vm2, %v378_v16, %v380_v13  ;;  %v389_v19 = vpop.permute.xlu1 %388  ;;  %v384_v22 = vsel %vm381_vm2, %v380_v13, %v376_v17  ;;  %v509_v13 = vstv %s2556_s29 }
  0xcc   :  { %v387_v23 = vadd.f32 %v382_v18, %v353_v14  ;;  %v385_v32 = vadd.f32 %v384_v22, %v351_v15  ;;  %v514_v14 = vstv %s2557_s11  ;;  %v472_v15 = vstv %s2551_s5 }
  0xcd   :  { %v522_v18 = vstv %s2558_s12  ;;  %v480_v22 = vstv %s2552_s14 }
  0xce   :  { %v393_v24 = vpop.permute.xlu0 %392 }
  0xcf   :  { %v397_v26 = vsel %vm394_vm3, %v393_v24, %v389_v19  ;;  %v391_v27 = vpop.permute.xlu1 %390 }
  0xd0   :  { %v400_v29 = vadd.f32 %v397_v26, %v387_v23  ;;  %v395_v30 = vsel %vm394_vm3, %v391_v27, %v393_v24  ;;  %v396_v31 = vsel %vm394_vm3, %v389_v19, %v391_v27  ;;  %v467_v19 = vstv %s2550_s13 }
  0xd1   :  { %v399_v33 = vadd.f32 %v395_v30, %v386_v25  ;;  %v398_v35 = vadd.f32 %v396_v31, %v385_v32  ;;  %v493_v24 = vstv %s2554_s6  ;;  %v488_v27 = vstv %s2553_s15 }
  0xd2   :  { %v405_v34 = vadd.f32 %v402_v28, %v400_v29 }
  0xd3   :  { %v404_v36 = vadd.f32 %v402_v28, %v399_v33  ;;  %v403_v38 = vadd.f32 %v402_v28, %v398_v35  ;;  %v501_v28 = vstv %s2555_s16 }
  0xd4   :  { %v408_v37 = vsel %vm294_vm4, %v405_v34, -1e+30 }
  0xd5   :  { %411 = vrot.lane.b32.xlu0 %v404_v36, %s3000_s28  ;;  %413 = vrot.lane.b32.xlu1 %v408_v37, %s3000_s28 }
  0xd9   :  { %418 = vrot.lane.b32.xlu0 %v403_v38, %s3001_s26  ;;  %422 = vrot.lane.b32.xlu1 %v408_v37, %s3001_s26 }
  0xdd   :  { %409 = vrot.lane.b32.xlu0 %v403_v38, %s3000_s28  ;;  %420 = vrot.lane.b32.xlu1 %v404_v36, %s3001_s26 }
 0x147   :  { %v412_v39 = vpop.permute.xlu0 %411  ;;  %v414_v40 = vpop.permute.xlu1 %413 }
 0x148   :  { %v415_v43 = vsel %vm381_vm2, %v412_v39, %v414_v40 }
 0x14b   :  { %v419_v41 = vpop.permute.xlu0 %418  ;;  %v423_v42 = vpop.permute.xlu1 %422 }
 0x14c   :  { %v426_v44 = vsel %vm394_vm3, %v423_v42, %v419_v41 }
 0x14d   :  { %v429_v45 = vmax.f32 %v415_v43, %v426_v44 }
 0x14f   :  { %v432_v46 = vmax.f32 %v408_v37, %v429_v45  ;;  %v410_v47 = vpop.permute.xlu0 %409  ;;  %v421_v48 = vpop.permute.xlu1 %420 }
 0x150   :  { %v416_v49 = vsel %vm381_vm2, %v410_v47, %v412_v39  ;;  %v417_v50 = vsel %vm381_vm2, %v414_v40, %v410_v47  ;;  %v424_v51 = vsel %vm394_vm3, %v421_v48, %v423_v42  ;;  %v425_v52 = vsel %vm394_vm3, %v419_v41, %v421_v48 }
 0x151   :  { %v435_v53 = vrot.slane %v432_v46, 7  ;;  %v441_v54 = vrot.slane %v432_v46, 1  ;;  %v427_v55 = vmax.f32 %v417_v50, %v425_v52  ;;  %v428_v56 = vmax.f32 %v416_v49, %v424_v51 }
 0x153   :  { %v438_v57 = vsel %vm295_vm0, -1e+30, %v435_v53  ;;  %v444_v58 = vsel %vm296_vm1, -1e+30, %v441_v54  ;;  %v430_v59 = vmax.f32 %v403_v38, %v427_v55  ;;  %v431_v60 = vmax.f32 %v404_v36, %v428_v56 }
 0x154   :  { %v447_v61 = vmax.f32 %v438_v57, %v444_v58 }
 0x155   :  { %v433_v62 = vrot.slane %v430_v59, 7  ;;  %v434_v63 = vrot.slane %v431_v60, 7  ;;  %v439_v0 = vrot.slane %v430_v59, 1  ;;  %v440_v1 = vrot.slane %v431_v60, 1 }
 0x156   :  { %v450_v2 = vmax.f32 %v432_v46, %v447_v61 }
 0x157   :  { %v436_v3 = vsel %vm295_vm0, -1e+30, %v433_v62  ;;  %v437_v4 = vsel %vm295_vm0, -1e+30, %v434_v63  ;;  %v442_v8 = vsel %vm296_vm1, -1e+30, %v439_v0 }
 0x158   :  { %v453_v9 = vsel %vm294_vm4, %v450_v2, 0.0  ;;  %v443_v6 = vsel %vm296_vm1, -1e+30, %v440_v1  ;;  %v445_v10 = vmax.f32 %v436_v3, %v442_v8 }
 0x159   :  { %v446_v12 = vmax.f32 %v437_v4, %v443_v6  ;;  %v456_v16 = vrot.slane %v453_v9, 7  ;;  %v462_v31 = vrot.slane %v453_v9, 1  ;;  %v475_v32 = vmul.f32 %v472_v15, %v453_v9 }
 0x15a   :  { %v448_v17 = vmax.f32 %v430_v59, %v445_v10  ;;  %v517_v36 = vmul.f32 %v514_v14, %v453_v9  ;;  %v496_v44 = vmul.f32 %v493_v24, %v453_v9 }
 0x15b   :  { %v449_v20 = vmax.f32 %v431_v60, %v446_v12  ;;  %v459_v23 = vsel %vm295_vm0, 0.0, %v456_v16  ;;  %v465_v47 = vsel %vm296_vm1, 0.0, %v462_v31 }
 0x15c   :  { %v454_v25 = vrot.slane %v448_v17, 7  ;;  %v460_v26 = vrot.slane %v448_v17, 1  ;;  %v470_v35 = vmul.f32 %v467_v19, %v459_v23  ;;  %v515_v38 = vmul.f32 %v514_v14, %v448_v17 }
 0x15d   :  { %v455_v29 = vrot.slane %v449_v20, 7  ;;  %v461_v30 = vrot.slane %v449_v20, 1  ;;  %v474_v42 = vmul.f32 %v472_v15, %v449_v20  ;;  %v473_v48 = vmul.f32 %v472_v15, %v448_v17 }
 0x15e   :  { %v457_v33 = vsel %vm295_vm0, 0.0, %v454_v25  ;;  %v463_v34 = vsel %vm296_vm1, 0.0, %v460_v26  ;;  %v478_v51 = vadd.f32 %v475_v32, %v470_v35  ;;  %v512_v55 = vmul.f32 %v509_v13, %v459_v23 }
 0x15f   :  { %v510_v37 = vmul.f32 %v509_v13, %v457_v33  ;;  %v458_v39 = vsel %vm295_vm0, 0.0, %v455_v29  ;;  %v464_v40 = vsel %vm296_vm1, 0.0, %v461_v30  ;;  %v468_v43 = vmul.f32 %v467_v19, %v457_v33 }
 0x160   :  { %v469_v41 = vmul.f32 %v467_v19, %v458_v39  ;;  %v523_v46 = vmul.f32 %v522_v18, %v463_v34  ;;  %v482_v50 = vmul.f32 %v480_v22, %v464_v40  ;;  %v511_v52 = vmul.f32 %v509_v13, %v458_v39 }
 0x161   :  { %v518_v45 = vadd.f32 %v515_v38, %v510_v37  ;;  %v476_v54 = vadd.f32 %v473_v48, %v468_v43  ;;  %v491_v56 = vmul.f32 %v488_v27, %v459_v23  ;;  %v483_v58 = vmul.f32 %v480_v22, %v465_v47 }
 0x162   :  { %v477_v49 = vadd.f32 %v474_v42, %v469_v41  ;;  %v481_v59 = vmul.f32 %v480_v22, %v463_v34  ;;  %v516_v60 = vmul.f32 %v514_v14, %v449_v20  ;;  %v504_v62 = vmul.f32 %v501_v28, %v465_v47 }
 0x163   :  { %v526_v53 = vadd.f32 %v523_v46, %v518_v45  ;;  %v499_v61 = vadd.f32 %v496_v44, %v491_v56  ;;  %v489_v63 = vmul.f32 %v488_v27, %v457_v33  ;;  %v490_v0 = vmul.f32 %v488_v27, %v458_v39 }
 0x164   :  { %v485_v57 = vadd.f32 %v482_v50, %v477_v49  ;;  %v486_v1 = vadd.f32 %v483_v58, %v478_v51  ;;  %v494_v2 = vmul.f32 %v493_v24, %v448_v17  ;;  %v495_v3 = vmul.f32 %v493_v24, %v449_v20 }
 0x165   :  { %541 = vrot.lane.b32.xlu1 %v526_v53, %s3001_s26  ;;  %v484_v4 = vadd.f32 %v481_v59, %v476_v54  ;;  %v519_v8 = vadd.f32 %v516_v60, %v511_v52  ;;  %v520_v9 = vadd.f32 %v517_v36, %v512_v55  ;;  %v507_v6 = vadd.f32 %v504_v62, %v499_v61 }
 0x166   :  { %531 = vrot.lane.b32.xlu0 %v485_v57, %s3000_s28  ;;  %v497_v10 = vadd.f32 %v494_v2, %v489_v63  ;;  %v498_v12 = vadd.f32 %v495_v3, %v490_v0  ;;  %v502_v15 = vmul.f32 %v501_v28, %v463_v34  ;;  %v503_v16 = vmul.f32 %v501_v28, %v464_v40 }
 0x167   :  { %v524_v14 = vmul.f32 %v522_v18, %v464_v40  ;;  %v525_v13 = vmul.f32 %v522_v18, %v465_v47  ;;  %v554_v36 = vstv %s2559_s8 }
 0x168   :  { %v505_v19 = vadd.f32 %v502_v15, %v497_v10  ;;  %v506_v22 = vadd.f32 %v503_v16, %v498_v12 }
 0x169   :  { %533 = vrot.lane.b32.xlu1 %v486_v1, %s3000_s28  ;;  %v527_v23 = vadd.f32 %v524_v14, %v519_v8  ;;  %v528_v25 = vadd.f32 %v525_v13, %v520_v9 }
 0x16a   :  { %529 = vrot.lane.b32.xlu0 %v484_v4, %s3000_s28 }
 0x16d   :  { %543 = vrot.lane.b32.xlu1 %v527_v23, %s3001_s26  ;;  %v666_v23 = vstv %s2567_s17 }
 0x16e   :  { %545 = vrot.lane.b32.xlu0 %v528_v25, %s3001_s26  ;;  %v624_v25 = vstv %s2561_s18 }
 0x1d7   :  { %v542_v17 = vpop.permute.xlu1 %541 }
 0x1d8   :  { %v532_v20 = vpop.permute.xlu0 %531 }
 0x1db   :  { %v534_v24 = vpop.permute.xlu1 %533 }
 0x1dc   :  { %v530_v26 = vpop.permute.xlu0 %529  ;;  %v535_v27 = vsel %vm381_vm2, %v532_v20, %v534_v24 }
 0x1dd   :  { %v536_v28 = vsel %vm381_vm2, %v530_v26, %v532_v20  ;;  %v537_v18 = vsel %vm381_vm2, %v534_v24, %v530_v26  ;;  %v540_v30 = vadd.f32 %v535_v27, %v507_v6  ;;  %v661_v24 = vstv %s2566_s19 }
 0x1de   :  { %v539_v31 = vadd.f32 %v536_v28, %v506_v22  ;;  %v538_v37 = vadd.f32 %v537_v18, %v505_v19  ;;  %v674_v26 = vstv %s2568_s21  ;;  %v645_v27 = vstv %s2564_s20 }
 0x1df   :  { %v544_v29 = vpop.permute.xlu1 %543  ;;  %v619_v18 = vstv %s2560_s1 }
 0x1e0   :  { %v546_v32 = vpop.permute.xlu0 %545  ;;  %v548_v33 = vsel %vm394_vm3, %v542_v17, %v544_v29 }
 0x1e1   :  { %v547_v34 = vsel %vm394_vm3, %v544_v29, %v546_v32  ;;  %v549_v35 = vsel %vm394_vm3, %v546_v32, %v542_v17  ;;  %v550_v40 = vadd.f32 %v548_v33, %v538_v37  ;;  %v632_v29 = vstv %s2562_s3 }
 0x1e2   :  { %v551_v38 = vadd.f32 %v547_v34, %v539_v31  ;;  %v552_v39 = vadd.f32 %v549_v35, %v540_v30  ;;  %v640_v33 = vstv %s2563_s4  ;;  %v653_v34 = vstv %s2565_s7 }
 0x1e3   :  { %v555_v44 = vadd.f32 %v554_v36, %v550_v40 }
 0x1e4   :  { %v556_v41 = vadd.f32 %v554_v36, %v551_v38  ;;  %v557_v42 = vadd.f32 %v554_v36, %v552_v39 }
 0x1e6   :  { %563 = vrot.lane.b32.xlu0 %v556_v41, %s3000_s28  ;;  %v560_v43 = vsel %vm294_vm4, %v557_v42, -1e+30 }
 0x1e7   :  { %565 = vrot.lane.b32.xlu1 %v560_v43, %s3000_s28 }
 0x1ea   :  { %570 = vrot.lane.b32.xlu0 %v555_v44, %s3001_s26 }
 0x1eb   :  { %574 = vrot.lane.b32.xlu1 %v560_v43, %s3001_s26 }
 0x1ee   :  { %561 = vrot.lane.b32.xlu0 %v555_v44, %s3000_s28 }
 0x1ef   :  { %572 = vrot.lane.b32.xlu1 %v556_v41, %s3001_s26 }
 0x258   :  { %v564_v45 = vpop.permute.xlu0 %563 }
 0x259   :  { %v566_v46 = vpop.permute.xlu1 %565 }
 0x25a   :  { %v567_v49 = vsel %vm381_vm2, %v564_v45, %v566_v46 }
 0x25c   :  { %v571_v47 = vpop.permute.xlu0 %570 }
 0x25d   :  { %v575_v48 = vpop.permute.xlu1 %574 }
 0x25e   :  { %v578_v50 = vsel %vm394_vm3, %v575_v48, %v571_v47 }
 0x25f   :  { %v581_v51 = vmax.f32 %v567_v49, %v578_v50 }
 0x260   :  { %v562_v52 = vpop.permute.xlu0 %561 }
 0x261   :  { %v584_v53 = vmax.f32 %v560_v43, %v581_v51  ;;  %v568_v54 = vsel %vm381_vm2, %v562_v52, %v564_v45  ;;  %v569_v55 = vsel %vm381_vm2, %v566_v46, %v562_v52  ;;  %v573_v56 = vpop.permute.xlu1 %572 }
 0x262   :  { %v576_v57 = vsel %vm394_vm3, %v573_v56, %v575_v48  ;;  %v577_v58 = vsel %vm394_vm3, %v571_v47, %v573_v56 }
 0x263   :  { %v587_v59 = vrot.slane %v584_v53, 7  ;;  %v593_v60 = vrot.slane %v584_v53, 1  ;;  %v579_v61 = vmax.f32 %v569_v55, %v577_v58  ;;  %v580_v62 = vmax.f32 %v568_v54, %v576_v57 }
 0x265   :  { %v590_v63 = vsel %vm295_vm0, -1e+30, %v587_v59  ;;  %v596_v0 = vsel %vm296_vm1, -1e+30, %v593_v60  ;;  %v582_v1 = vmax.f32 %v555_v44, %v579_v61  ;;  %v583_v2 = vmax.f32 %v556_v41, %v580_v62 }
 0x266   :  { %v599_v3 = vmax.f32 %v590_v63, %v596_v0 }
 0x267   :  { %v585_v4 = vrot.slane %v582_v1, 7  ;;  %v586_v8 = vrot.slane %v583_v2, 7  ;;  %v591_v9 = vrot.slane %v582_v1, 1  ;;  %v592_v6 = vrot.slane %v583_v2, 1 }
 0x268   :  { %v602_v10 = vmax.f32 %v584_v53, %v599_v3 }
 0x269   :  { %v588_v12 = vsel %vm295_vm0, -1e+30, %v585_v4  ;;  %v589_v15 = vsel %vm295_vm0, -1e+30, %v586_v8  ;;  %v594_v16 = vsel %vm296_vm1, -1e+30, %v591_v9 }
 0x26a   :  { %v605_v14 = vsel %vm294_vm4, %v602_v10, 0.0  ;;  %v595_v13 = vsel %vm296_vm1, -1e+30, %v592_v6  ;;  %v597_v19 = vmax.f32 %v588_v12, %v594_v16 }
 0x26b   :  { %v598_v22 = vmax.f32 %v589_v15, %v595_v13  ;;  %v608_v17 = vrot.slane %v605_v14, 7  ;;  %v614_v37 = vrot.slane %v605_v14, 1  ;;  %v627_v38 = vmul.f32 %v624_v25, %v605_v14 }
 0x26c   :  { %v600_v20 = vmax.f32 %v582_v1, %v597_v19  ;;  %v669_v42 = vmul.f32 %v666_v23, %v605_v14  ;;  %v648_v50 = vmul.f32 %v645_v27, %v605_v14 }
 0x26d   :  { %v601_v28 = vmax.f32 %v583_v2, %v598_v22  ;;  %v611_v30 = vsel %vm295_vm0, 0.0, %v608_v17  ;;  %v617_v53 = vsel %vm296_vm1, 0.0, %v614_v37 }
 0x26e   :  { %v606_v31 = vrot.slane %v600_v20, 7  ;;  %v612_v32 = vrot.slane %v600_v20, 1  ;;  %v622_v41 = vmul.f32 %v619_v18, %v611_v30  ;;  %v667_v44 = vmul.f32 %v666_v23, %v600_v20 }
 0x26f   :  { %v607_v35 = vrot.slane %v601_v28, 7  ;;  %v613_v36 = vrot.slane %v601_v28, 1  ;;  %v626_v48 = vmul.f32 %v624_v25, %v601_v28  ;;  %v625_v54 = vmul.f32 %v624_v25, %v600_v20 }
 0x270   :  { %v609_v39 = vsel %vm295_vm0, 0.0, %v606_v31  ;;  %v615_v40 = vsel %vm296_vm1, 0.0, %v612_v32  ;;  %v630_v57 = vadd.f32 %v627_v38, %v622_v41  ;;  %v664_v61 = vmul.f32 %v661_v24, %v611_v30 }
 0x271   :  { %v662_v43 = vmul.f32 %v661_v24, %v609_v39  ;;  %v610_v45 = vsel %vm295_vm0, 0.0, %v607_v35  ;;  %v616_v46 = vsel %vm296_vm1, 0.0, %v613_v36  ;;  %v620_v49 = vmul.f32 %v619_v18, %v609_v39 }
 0x272   :  { %v621_v47 = vmul.f32 %v619_v18, %v610_v45  ;;  %v675_v52 = vmul.f32 %v674_v26, %v615_v40  ;;  %v634_v56 = vmul.f32 %v632_v29, %v616_v46  ;;  %v663_v58 = vmul.f32 %v661_v24, %v610_v45 }
 0x273   :  { %v670_v51 = vadd.f32 %v667_v44, %v662_v43  ;;  %v628_v60 = vadd.f32 %v625_v54, %v620_v49  ;;  %v643_v62 = vmul.f32 %v640_v33, %v611_v30  ;;  %v635_v0 = vmul.f32 %v632_v29, %v617_v53 }
 0x274   :  { %v629_v55 = vadd.f32 %v626_v48, %v621_v47  ;;  %v633_v1 = vmul.f32 %v632_v29, %v615_v40  ;;  %v668_v2 = vmul.f32 %v666_v23, %v601_v28  ;;  %v656_v4 = vmul.f32 %v653_v34, %v617_v53 }
 0x275   :  { %v678_v59 = vadd.f32 %v675_v52, %v670_v51  ;;  %v651_v3 = vadd.f32 %v648_v50, %v643_v62  ;;  %v641_v8 = vmul.f32 %v640_v33, %v609_v39  ;;  %v642_v9 = vmul.f32 %v640_v33, %v610_v45 }
 0x276   :  { %v637_v63 = vadd.f32 %v634_v56, %v629_v55  ;;  %v638_v6 = vadd.f32 %v635_v0, %v630_v57  ;;  %v646_v10 = vmul.f32 %v645_v27, %v600_v20  ;;  %v647_v12 = vmul.f32 %v645_v27, %v601_v28 }
 0x277   :  { %693 = vrot.lane.b32.xlu1 %v678_v59, %s3001_s26  ;;  %v636_v15 = vadd.f32 %v633_v1, %v628_v60  ;;  %v671_v16 = vadd.f32 %v668_v2, %v663_v58  ;;  %v672_v14 = vadd.f32 %v669_v42, %v664_v61  ;;  %v659_v13 = vadd.f32 %v656_v4, %v651_v3 }
 0x278   :  { %683 = vrot.lane.b32.xlu0 %v637_v63, %s3000_s28  ;;  %v649_v19 = vadd.f32 %v646_v10, %v641_v8  ;;  %v650_v22 = vadd.f32 %v647_v12, %v642_v9  ;;  %v654_v25 = vmul.f32 %v653_v34, %v615_v40  ;;  %v655_v17 = vmul.f32 %v653_v34, %v616_v46 }
 0x279   :  { %v676_v23 = vmul.f32 %v674_v26, %v616_v46  ;;  %v677_v24 = vmul.f32 %v674_v26, %v617_v53  ;;  %v706_v41 = vstv %s2569_s2 }
 0x27a   :  { %v657_v18 = vadd.f32 %v654_v25, %v649_v19  ;;  %v658_v29 = vadd.f32 %v655_v17, %v650_v22 }
 0x27b   :  { %685 = vrot.lane.b32.xlu1 %v638_v6, %s3000_s28  ;;  %v679_v30 = vadd.f32 %v676_v23, %v671_v16  ;;  %v680_v31 = vadd.f32 %v677_v24, %v672_v14 }
 0x27c   :  { %681 = vrot.lane.b32.xlu0 %v636_v15, %s3000_s28 }
 0x27f   :  { %695 = vrot.lane.b32.xlu1 %v679_v30, %s3001_s26 }
 0x280   :  { %697 = vrot.lane.b32.xlu0 %v680_v31, %s3001_s26 }
 0x2e9   :  { %v694_v20 = vpop.permute.xlu1 %693 }
 0x2ea   :  { %v684_v27 = vpop.permute.xlu0 %683 }
 0x2ed   :  { %v686_v28 = vpop.permute.xlu1 %685 }
 0x2ee   :  { %v682_v32 = vpop.permute.xlu0 %681  ;;  %v687_v33 = vsel %vm381_vm2, %v684_v27, %v686_v28 }
 0x2ef   :  { %v688_v34 = vsel %vm381_vm2, %v682_v32, %v684_v27  ;;  %v689_v26 = vsel %vm381_vm2, %v686_v28, %v682_v32  ;;  %v692_v37 = vadd.f32 %v687_v33, %v659_v13 }
 0x2f0   :  { %v690_v35 = vadd.f32 %v689_v26, %v657_v18  ;;  %v691_v38 = vadd.f32 %v688_v34, %v658_v29 }
 0x2f1   :  { %v696_v36 = vpop.permute.xlu1 %695 }
 0x2f2   :  { %v700_v39 = vsel %vm394_vm3, %v694_v20, %v696_v36  ;;  %v698_v40 = vpop.permute.xlu0 %697 }
 0x2f3   :  { %v702_v42 = vadd.f32 %v700_v39, %v690_v35  ;;  %v699_v43 = vsel %vm394_vm3, %v696_v36, %v698_v40  ;;  %v701_v44 = vsel %vm394_vm3, %v698_v40, %v694_v20 }
 0x2f4   :  { %v703_v45 = vadd.f32 %v699_v43, %v691_v38  ;;  %v704_v46 = vadd.f32 %v701_v44, %v692_v37 }
 0x2f5   :  { %v707_v47 = vadd.f32 %v706_v41, %v702_v42 }
 0x2f6   :  { %v708_v48 = vadd.f32 %v706_v41, %v703_v45  ;;  %v709_v49 = vadd.f32 %v706_v41, %v704_v46 }
 0x2f7   :  { %713 = vrot.lane.b32.xlu0 %v707_v47, %s3000_s28 }
 0x2f8   :  { %715 = vrot.lane.b32.xlu1 %v708_v48, %s3000_s28  ;;  %v712_v50 = vsel %vm294_vm4, %v709_v49, -1e+30 }
 0x2fb   :  { %717 = vrot.lane.b32.xlu0 %v712_v50, %s3000_s28 }
 0x2fc   :  { %722 = vrot.lane.b32.xlu1 %v707_v47, %s3001_s26 }
 0x2ff   :  { %724 = vrot.lane.b32.xlu0 %v708_v48, %s3001_s26 }
 0x300   :  { %726 = vrot.lane.b32.xlu1 %v712_v50, %s3001_s26 }
 0x369   :  { %v714_v51 = vpop.permute.xlu0 %713 }
 0x36a   :  { %v716_v52 = vpop.permute.xlu1 %715 }
 0x36b   :  { %v720_v56 = vsel %vm381_vm2, %v714_v51, %v716_v52 }
 0x36d   :  { %v718_v53 = vpop.permute.xlu0 %717 }
 0x36e   :  { %v723_v54 = vpop.permute.xlu1 %722  ;;  %v721_v57 = vsel %vm381_vm2, %v718_v53, %v714_v51  ;;  %v719_v60 = vsel %vm381_vm2, %v716_v52, %v718_v53 }
 0x371   :  { %v725_v55 = vpop.permute.xlu0 %724 }
 0x372   :  { %v727_v58 = vpop.permute.xlu1 %726  ;;  %v729_v59 = vsel %vm394_vm3, %v723_v54, %v725_v55 }
 0x373   :  { %v730_v61 = vsel %vm394_vm3, %v727_v58, %v723_v54  ;;  %v728_v62 = vsel %vm394_vm3, %v725_v55, %v727_v58  ;;  %v731_v63 = vmax.f32 %v721_v57, %v729_v59 }
 0x374   :  { %v733_v0 = vmax.f32 %v719_v60, %v730_v61  ;;  %v732_v1 = vmax.f32 %v720_v56, %v728_v62 }
 0x375   :  { %v734_v2 = vmax.f32 %v707_v47, %v731_v63 }
 0x376   :  { %v736_v3 = vmax.f32 %v712_v50, %v733_v0  ;;  %v735_v4 = vmax.f32 %v708_v48, %v732_v1 }
 0x377   :  { %v737_v8 = vrot.slane %v734_v2, 7  ;;  %v743_v9 = vrot.slane %v734_v2, 1 }
 0x378   :  { %v739_v6 = vrot.slane %v736_v3, 7  ;;  %v745_v10 = vrot.slane %v736_v3, 1  ;;  %v738_v12 = vrot.slane %v735_v4, 7  ;;  %v744_v15 = vrot.slane %v735_v4, 1 }
 0x379   :  { %v740_v16 = vsel %vm295_vm0, -1e+30, %v737_v8  ;;  %v746_v14 = vsel %vm296_vm1, -1e+30, %v743_v9 }
 0x37a   :  { %v741_v7 = vsel %vm295_vm0, -1e+30, %v738_v12  ;;  %v742_v13 = vsel %vm295_vm0, -1e+30, %v739_v6  ;;  %v747_v19 = vsel %vm296_vm1, -1e+30, %v744_v15  ;;  %v749_v22 = vmax.f32 %v740_v16, %v746_v14 }
 0x37b   :  { %v748_v25 = vsel %vm296_vm1, -1e+30, %v745_v10  ;;  %v750_v17 = vmax.f32 %v741_v7, %v747_v19 }
 0x37c   :  { %v751_v23 = vmax.f32 %v742_v13, %v748_v25  ;;  %v752_v24 = vmax.f32 %v734_v2, %v749_v22 }
 0x37d   :  { %v753_v18 = vmax.f32 %v735_v4, %v750_v17 }
 0x37e   :  { %v754_v29 = vmax.f32 %v736_v3, %v751_v23 }
 0x37f   :  { %v758_v30 = vadd.f32 %v753_v18, %v752_v24 }
 0x380   :  { %v757_v31 = vsel %vm294_vm4, %v754_v29, 0.0 }
 0x381   :  { %v759_v20 = vadd.f32 %v758_v30, %v757_v31 }
 0x383   :  { %760 = vadd.xlane.f32.xlu0 %v759_v20 }
 0x410   :  { %v761_v27 = vpop.xlane.xlu0 %760 }
 0x411   :  { %v762_v28 = vrot.slane %v761_v27, 4 }
 0x413   :  { %v763_v32 = vadd.f32 %v762_v28, %v761_v27 }
 0x415   :  { %v764_v33 = vrot.slane %v763_v32, 2 }
 0x417   :  { %v765_v34 = vadd.f32 %v764_v33, %v763_v32 }
 0x419   :  { %v766_v26 = vrot.slane %v765_v34, 1 }
 0x41b   :  { %v767_v35 = vadd.f32 %v766_v26, %v765_v34 }
 0x41d   :  { %2791 = vpush %v767_v35 }
 0x44e   :  { %s2792_s22 = spop %2791 }
 0x44f   :  { %s771_s23 = smul.f32 0.00041666668, %s2792_s22 }
 0x451   :  { %v772_v36 = vstv %s771_s23 }
 0x452   :  { %v773_v37 = vsub.f32 %v752_v24, %v772_v36  ;;  %v774_v38 = vsub.f32 %v753_v18, %v772_v36  ;;  %v775_v39 = vsub.f32 %v757_v31, %v772_v36 }
 0x454   :  { %v779_v40 = vmul.f32 %v773_v37, %v773_v37  ;;  %v780_v41 = vmul.f32 %v774_v38, %v774_v38  ;;  %v778_v42 = vsel %vm294_vm4, %v775_v39, 0.0 }
 0x455   :  { %v781_v43 = vmul.f32 %v778_v42, %v778_v42 }
 0x456   :  { %v782_v44 = vadd.f32 %v780_v41, %v779_v40 }
 0x458   :  { %v783_v45 = vadd.f32 %v782_v44, %v781_v43 }
 0x45a   :  { %784 = vadd.xlane.f32.xlu1 %v783_v45 }
 0x4e7   :  { %v785_v46 = vpop.xlane.xlu1 %784 }
 0x4e8   :  { %v786_v47 = vrot.slane %v785_v46, 4 }
 0x4ea   :  { %v787_v48 = vadd.f32 %v786_v47, %v785_v46 }
 0x4ec   :  { %v788_v49 = vrot.slane %v787_v48, 2 }
 0x4ee   :  { %v789_v50 = vadd.f32 %v788_v49, %v787_v48 }
 0x4f0   :  { %v790_v51 = vrot.slane %v789_v50, 1 }
 0x4f2   :  { %v791_v52 = vadd.f32 %v790_v51, %v789_v50 }
 0x4f4   :  { %2793 = vpush %v791_v52 }
 0x525   :  { %s2794_s27 = spop %2793 }
 0x526   :  { %s795_s0 = smul.f32 0.00041666668, %s2794_s27 }
 0x528   :  { %s796_s24 = sadd.f32 1e-05, %s795_s0 }
 0x52a   :  { %v797_v53 = vstv %s796_s24 }
 0x52b   :  { %2820 = vrsqrt.f32 %v797_v53 }
 0x535   :  { %v2821_v54 = vpop.eup %2820 }
 0x536   :  { %2795 = vpush %v2821_v54 }
 0x567   :  { %s2796_s25 = spop %2795 }
 0x568   :  { %v800_v21 = vstv %s2796_s25 }
 0x569   :  { %v3361_v55 = vmul.f32 %v800_v21, %v773_v37  ;;  %v802_v56 = vmul.f32 %v800_v21, %v774_v38  ;;  %v3363_v57 = vmul.f32 %v800_v21, %v775_v39 }
 0x56a   :  { %2970 = dma.done.wait [#allocation8], 27648 }
 0x56b   :  { %2971 = vsyncadd [#allocation8], 4294939648 }
 0x56c   :  { %2972 = dma.done.wait [#allocation8 + $0x1], 144 }
 0x56d   :  { %2973 = vsyncadd [#allocation8 + $0x1], 4294967152  ;;  %v812_v58 = vpack.c.bf16 %v802_v56, %v802_v56  ;;  %v815_v61 = vld [vmem:[#allocation2 + $0x8] sm:$0xff]  ;;  %v817_v62 = vld [vmem:[#allocation2 + $0x18] sm:$0xff]  ;;  %vm3004_vm5 = vmmov 0  }
 0x56e   :  { %v814_v63 = vld [vmem:[#allocation2] sm:$0xff]  ;;  %1094 = vmatprep.subr.bf16.mxu0 %v815_v61  ;;  %1176 = vmatprep.subr.bf16.mxu1 %v817_v62  ;;  %v816_v0 = vld [vmem:[#allocation2 + $0x10] sm:$0xff]  ;;  %v823_v3 = vld [vmem:[#allocation2 + $0x48] sm:$0xff] }
 0x56f   :  { %v1037_v59 = vshrl.u32 %v812_v58, 16  ;;  %v824_v1 = vld [vmem:[#allocation2 + $0x50] sm:$0xff]  ;;  %v826_v2 = vld [vmem:[#allocation2 + $0x60] sm:$0xff]  ;;  %1095 = vmatpush1.bf16.msra.mxu0 %v814_v63  ;;  %1177 = vmatpush1.bf16.msra.mxu1 %v816_v0  ;;  %v825_v4 = vld [vmem:[#allocation2 + $0x58] sm:$0xff] }
 0x570   :  { %1096 = vmatprep.subr.bf16.mxu0 %v824_v1  ;;  %1178 = vmatprep.subr.bf16.mxu1 %v826_v2  ;;  %v833_v8 = vld [vmem:[#allocation2 + $0x98] sm:$0xff]  ;;  %v835_v9 = vld [vmem:[#allocation2 + $0xa8] sm:$0xff]  ;;  %v832_v6 = vld [vmem:[#allocation2 + $0x90] sm:$0xff] }
 0x571   :  { %v3365_v60 = vrot.slane %v1037_v59, 3  ;;  %v834_v10 = vld [vmem:[#allocation2 + $0xa0] sm:$0xff]  ;;  %v844_v15 = vld [vmem:[#allocation2 + $0xf0] sm:$0xff]  ;;  %v841_v16 = vld [vmem:[#allocation2 + $0xd8] sm:$0xff]  ;;  %v811_v59 = vpack.c.bf16 %v3361_v55, %v3361_v55 }
 0x572   :  { %v842_v12 = vld [vmem:[#allocation2 + $0xe0] sm:$0xff]  ;;  %v843_v14 = vld [vmem:[#allocation2 + $0xe8] sm:$0xff]  ;;  %v853_v13 = vld [vmem:[#allocation2 + $0x138] sm:$0xff] }
 0x573   :  { %1126 = vmatprep.mubr.bf16.mxu0 %v3365_v60  ;;  %1208 = vmatprep.mubr.bf16.mxu1 %v3365_v60  ;;  %v851_v7 = vld [vmem:[#allocation2 + $0x128] sm:$0xff]  ;;  %v850_v19 = vld [vmem:[#allocation2 + $0x120] sm:$0xff]  ;;  %v852_v22 = vld [vmem:[#allocation2 + $0x130] sm:$0xff]  ;;  %v1033_v1 = vshrl.u32 %v811_v59, 16 }
 0x574   :  { %1097 = vmatpush1.bf16.msra.mxu0 %v823_v3  ;;  %1179 = vmatpush1.bf16.msra.mxu1 %v825_v4  ;;  %v860_v25 = vld [vmem:[#allocation2 + $0x170] sm:$0xff]  ;;  %v862_v17 = vld [vmem:[#allocation2 + $0x180] sm:$0xff]  ;;  %v859_v23 = vld [vmem:[#allocation2 + $0x168] sm:$0xff] }
 0x575   :  { %1098 = vmatprep.subr.bf16.mxu0 %v833_v8  ;;  %1180 = vmatprep.subr.bf16.mxu1 %v835_v9  ;;  %v861_v24 = vld [vmem:[#allocation2 + $0x178] sm:$0xff]  ;;  %v871_v29 = vld [vmem:[#allocation2 + $0x1c8] sm:$0xff]  ;;  %v868_v30 = vld [vmem:[#allocation2 + $0x1b0] sm:$0xff]  ;;  %v3371_v9 = vrot.slane %v1033_v1, 3 }
 0x576   :  { %v869_v18 = vld [vmem:[#allocation2 + $0x1b8] sm:$0xff]  ;;  %v870_v31 = vld [vmem:[#allocation2 + $0x1c0] sm:$0xff]  ;;  %v880_v27 = vld [vmem:[#allocation2 + $0x210] sm:$0xff] }
 0x577   :  { %v878_v20 = vld [vmem:[#allocation2 + $0x200] sm:$0xff]  ;;  %v877_v28 = vld [vmem:[#allocation2 + $0x1f8] sm:$0xff]  ;;  %v879_v32 = vld [vmem:[#allocation2 + $0x208] sm:$0xff] }
 0x578   :  { %1099 = vmatpush1.bf16.msra.mxu0 %v832_v6  ;;  %1181 = vmatpush1.bf16.msra.mxu1 %v834_v10  ;;  %v887_v33 = vld [vmem:[#allocation2 + $0x248] sm:$0xff]  ;;  %v889_v34 = vld [vmem:[#allocation2 + $0x258] sm:$0xff]  ;;  %v886_v26 = vld [vmem:[#allocation2 + $0x240] sm:$0xff] }
 0x579   :  { %1100 = vmatprep.subr.bf16.mxu0 %v842_v12  ;;  %1182 = vmatprep.subr.bf16.mxu1 %v844_v15  ;;  %v888_v35 = vld [vmem:[#allocation2 + $0x250] sm:$0xff]  ;;  %v898_v37 = vld [vmem:[#allocation2 + $0x2a0] sm:$0xff]  ;;  %v895_v38 = vld [vmem:[#allocation2 + $0x288] sm:$0xff] }
 0x57a   :  { %v896_v36 = vld [vmem:[#allocation2 + $0x290] sm:$0xff]  ;;  %v897_v39 = vld [vmem:[#allocation2 + $0x298] sm:$0xff]  ;;  %v907_v41 = vld [vmem:[#allocation2 + $0x2e8] sm:$0xff] }
 0x57b   :  { %v905_v40 = vld [vmem:[#allocation2 + $0x2d8] sm:$0xff]  ;;  %v904_v42 = vld [vmem:[#allocation2 + $0x2d0] sm:$0xff]  ;;  %v906_v43 = vld [vmem:[#allocation2 + $0x2e0] sm:$0xff] }
 0x57c   :  { %1101 = vmatpush1.bf16.msra.mxu0 %v841_v16  ;;  %1183 = vmatpush1.bf16.msra.mxu1 %v843_v14  ;;  %v914_v44 = vld [vmem:[#allocation2 + $0x320] sm:$0xff]  ;;  %v916_v45 = vld [vmem:[#allocation2 + $0x330] sm:$0xff]  ;;  %v913_v46 = vld [vmem:[#allocation2 + $0x318] sm:$0xff] }
 0x57d   :  { %1102 = vmatprep.subr.bf16.mxu0 %v851_v7  ;;  %1184 = vmatprep.subr.bf16.mxu1 %v853_v13  ;;  %v915_v47 = vld [vmem:[#allocation2 + $0x328] sm:$0xff]  ;;  %v925_v49 = vld [vmem:[#allocation2 + $0x378] sm:$0xff]  ;;  %v922_v50 = vld [vmem:[#allocation2 + $0x360] sm:$0xff]  ;;  %v3002_v13 = vmov 0  }
 0x57e   :  { %v923_v48 = vld [vmem:[#allocation2 + $0x368] sm:$0xff]  ;;  %v924_v51 = vld [vmem:[#allocation2 + $0x370] sm:$0xff]  ;;  %v934_v53 = vld [vmem:[#allocation2 + $0x3c0] sm:$0xff] }
 0x57f   :  { %v932_v52 = vld [vmem:[#allocation2 + $0x3b0] sm:$0xff]  ;;  %v931_v54 = vld [vmem:[#allocation2 + $0x3a8] sm:$0xff]  ;;  %v933_v21 = vld [vmem:[#allocation2 + $0x3b8] sm:$0xff] }
 0x580   :  { %1103 = vmatpush1.bf16.msra.mxu0 %v850_v19  ;;  %1185 = vmatpush1.bf16.msra.mxu1 %v852_v22  ;;  %v941_v56 = vld [vmem:[#allocation2 + $0x3f8] sm:$0xff]  ;;  %v943_v58 = vld [vmem:[#allocation2 + $0x408] sm:$0xff]  ;;  %v940_v61 = vld [vmem:[#allocation2 + $0x3f0] sm:$0xff] }
 0x581   :  { %1104 = vmatprep.subr.bf16.mxu0 %v860_v25  ;;  %1186 = vmatprep.subr.bf16.mxu1 %v862_v17  ;;  %v942_v62 = vld [vmem:[#allocation2 + $0x400] sm:$0xff]  ;;  %v952_v0 = vld [vmem:[#allocation2 + $0x450] sm:$0xff]  ;;  %v949_v2 = vld [vmem:[#allocation2 + $0x438] sm:$0xff] }
 0x582   :  { %v950_v63 = vld [vmem:[#allocation2 + $0x440] sm:$0xff]  ;;  %v951_v3 = vld [vmem:[#allocation2 + $0x448] sm:$0xff]  ;;  %v961_v8 = vld [vmem:[#allocation2 + $0x498] sm:$0xff] }
 0x583   :  { %v959_v4 = vld [vmem:[#allocation2 + $0x488] sm:$0xff]  ;;  %v958_v55 = vld [vmem:[#allocation2 + $0x480] sm:$0xff]  ;;  %v960_v6 = vld [vmem:[#allocation2 + $0x490] sm:$0xff] }
 0x584   :  { %1105 = vmatpush1.bf16.msra.mxu0 %v859_v23  ;;  %1187 = vmatpush1.bf16.msra.mxu1 %v861_v24  ;;  %v968_v10 = vld [vmem:[#allocation2 + $0x4d0] sm:$0xff]  ;;  %v970_v12 = vld [vmem:[#allocation2 + $0x4e0] sm:$0xff]  ;;  %v967_v15 = vld [vmem:[#allocation2 + $0x4c8] sm:$0xff] }
 0x585   :  { %1106 = vmatprep.subr.bf16.mxu0 %v869_v18  ;;  %1188 = vmatprep.subr.bf16.mxu1 %v871_v29  ;;  %v969_v16 = vld [vmem:[#allocation2 + $0x4d8] sm:$0xff]  ;;  %v979_v7 = vld [vmem:[#allocation2 + $0x528] sm:$0xff]  ;;  %v976_v19 = vld [vmem:[#allocation2 + $0x510] sm:$0xff] }
 0x586   :  { %v977_v14 = vld [vmem:[#allocation2 + $0x518] sm:$0xff]  ;;  %v978_v22 = vld [vmem:[#allocation2 + $0x520] sm:$0xff]  ;;  %v988_v17 = vld [vmem:[#allocation2 + $0x570] sm:$0xff] }
 0x587   :  { %v986_v25 = vld [vmem:[#allocation2 + $0x560] sm:$0xff]  ;;  %v985_v23 = vld [vmem:[#allocation2 + $0x558] sm:$0xff]  ;;  %v987_v24 = vld [vmem:[#allocation2 + $0x568] sm:$0xff] }
 0x588   :  { %1107 = vmatpush1.bf16.msra.mxu0 %v868_v30  ;;  %1189 = vmatpush1.bf16.msra.mxu1 %v870_v31  ;;  %v995_v18 = vld [vmem:[#allocation2 + $0x5a8] sm:$0xff]  ;;  %v997_v29 = vld [vmem:[#allocation2 + $0x5b8] sm:$0xff]  ;;  %v994_v30 = vld [vmem:[#allocation2 + $0x5a0] sm:$0xff] }
 0x589   :  { %1108 = vmatprep.subr.bf16.mxu0 %v878_v20  ;;  %1190 = vmatprep.subr.bf16.mxu1 %v880_v27  ;;  %v996_v31 = vld [vmem:[#allocation2 + $0x5b0] sm:$0xff]  ;;  %v1006_v27 = vld [vmem:[#allocation2 + $0x600] sm:$0xff]  ;;  %v855_v59 = vld [vmem:[#allocation2 + $0x148] sm:$0xff] }
 0x58a   :  { %v1004_v20 = vld [vmem:[#allocation2 + $0x5f0] sm:$0xff]  ;;  %v866_v1 = vld [vmem:[#allocation2 + $0x1a0] sm:$0xff] }
 0x58c   :  { %1109 = vmatpush1.bf16.msra.mxu0 %v877_v28  ;;  %1191 = vmatpush1.bf16.msra.mxu1 %v879_v32  ;;  %v1003_v28 = vld [vmem:[#allocation2 + $0x5e8] sm:$0xff]  ;;  %v1005_v32 = vld [vmem:[#allocation2 + $0x5f8] sm:$0xff] }
 0x58d   :  { %1110 = vmatprep.subr.bf16.mxu0 %v887_v33  ;;  %1192 = vmatprep.subr.bf16.mxu1 %v889_v34  ;;  %v1013_v33 = vld [vmem:[#allocation2 + $0x638] sm:$0xff]  ;;  %v1015_v34 = vld [vmem:[#allocation2 + $0x648] sm:$0xff] }
 0x590   :  { %1111 = vmatpush1.bf16.msra.mxu0 %v886_v26  ;;  %1193 = vmatpush1.bf16.msra.mxu1 %v888_v35  ;;  %v813_v26 = vpack.c.bf16 %v3363_v57, %v3363_v57  ;;  %v1012_v35 = vld [vmem:[#allocation2 + $0x630] sm:$0xff]  ;;  %v818_v57 = vld [vmem:[#allocation2 + $0x20] sm:$0xff] }
 0x591   :  { %1112 = vmatprep.subr.bf16.mxu0 %v896_v36  ;;  %1194 = vmatprep.subr.bf16.mxu1 %v898_v37  ;;  %v1014_v36 = vld [vmem:[#allocation2 + $0x640] sm:$0xff] }
 0x592   :  { %v1022_v37 = vld [vmem:[#allocation2 + $0x680] sm:$0xff] }
 0x594   :  { %1113 = vmatpush1.bf16.msra.mxu0 %v895_v38  ;;  %1195 = vmatpush1.bf16.msra.mxu1 %v897_v39  ;;  %v1024_v38 = vld [vmem:[#allocation2 + $0x690] sm:$0xff]  ;;  %v1041_v39 = vshrl.u32 %v813_v26, 16  ;;  %v926_v26 = vld [vmem:[#allocation2 + $0x380] sm:$0xff] }
 0x595   :  { %1114 = vmatprep.subr.bf16.mxu0 %v905_v40  ;;  %1196 = vmatprep.subr.bf16.mxu1 %v907_v41  ;;  %v1021_v40 = vld [vmem:[#allocation2 + $0x678] sm:$0xff]  ;;  %v1023_v41 = vld [vmem:[#allocation2 + $0x688] sm:$0xff] }
 0x598   :  { %1115 = vmatpush1.bf16.msra.mxu0 %v904_v42  ;;  %1197 = vmatpush1.bf16.msra.mxu1 %v906_v43  ;;  %v819_v42 = vld [vmem:[#allocation2 + $0x28] sm:$0xff]  ;;  %v821_v43 = vld [vmem:[#allocation2 + $0x38] sm:$0xff] }
 0x599   :  { %1116 = vmatprep.subr.bf16.mxu0 %v914_v44  ;;  %1198 = vmatprep.subr.bf16.mxu1 %v916_v45  ;;  %v3379_v44 = vrot.slane %v1041_v39, 3  ;;  %v820_v45 = vld [vmem:[#allocation2 + $0x30] sm:$0xff]  ;;  %v937_v39 = vld [vmem:[#allocation2 + $0x3d8] sm:$0xff] }
 0x59c   :  { %1117 = vmatpush1.bf16.msra.mxu0 %v913_v46  ;;  %1199 = vmatpush1.bf16.msra.mxu1 %v915_v47  ;;  %v828_v46 = vld [vmem:[#allocation2 + $0x70] sm:$0xff]  ;;  %v830_v47 = vld [vmem:[#allocation2 + $0x80] sm:$0xff] }
 0x59d   :  { %1118 = vmatprep.subr.bf16.mxu0 %v923_v48  ;;  %1200 = vmatprep.subr.bf16.mxu1 %v925_v49  ;;  %v827_v48 = vld [vmem:[#allocation2 + $0x68] sm:$0xff]  ;;  %v829_v49 = vld [vmem:[#allocation2 + $0x78] sm:$0xff] }
 0x5a0   :  { %1119 = vmatpush1.bf16.msra.mxu0 %v922_v50  ;;  %1201 = vmatpush1.bf16.msra.mxu1 %v924_v51  ;;  %v837_v50 = vld [vmem:[#allocation2 + $0xb8] sm:$0xff]  ;;  %v839_v51 = vld [vmem:[#allocation2 + $0xc8] sm:$0xff] }
 0x5a1   :  { %1120 = vmatprep.subr.bf16.mxu0 %v932_v52  ;;  %1202 = vmatprep.subr.bf16.mxu1 %v934_v53  ;;  %v836_v52 = vld [vmem:[#allocation2 + $0xb0] sm:$0xff]  ;;  %v838_v53 = vld [vmem:[#allocation2 + $0xc0] sm:$0xff] }
 0x5a4   :  { %1121 = vmatpush1.bf16.msra.mxu0 %v931_v54  ;;  %1203 = vmatpush1.bf16.msra.mxu1 %v933_v21  ;;  %v846_v54 = vld [vmem:[#allocation2 + $0x100] sm:$0xff]  ;;  %v848_v21 = vld [vmem:[#allocation2 + $0x110] sm:$0xff] }
 0x5a5   :  { %1122 = vmatprep.subr.bf16.mxu0 %v941_v56  ;;  %1204 = vmatprep.subr.bf16.mxu1 %v943_v58  ;;  %v845_v56 = vld [vmem:[#allocation2 + $0xf8] sm:$0xff]  ;;  %v847_v58 = vld [vmem:[#allocation2 + $0x108] sm:$0xff] }
 0x5a8   :  { %1123 = vmatpush1.bf16.msra.mxu0 %v940_v61  ;;  %1205 = vmatpush1.bf16.msra.mxu1 %v942_v62  ;;  %v857_v61 = vld [vmem:[#allocation2 + $0x158] sm:$0xff]  ;;  %v854_v62 = vld [vmem:[#allocation2 + $0x140] sm:$0xff] }
 0x5a9   :  { %1124 = vmatprep.subr.bf16.mxu0 %v950_v63  ;;  %1206 = vmatprep.subr.bf16.mxu1 %v952_v0  ;;  %v856_v63 = vld [vmem:[#allocation2 + $0x150] sm:$0xff] }
 0x5aa   :  { %v864_v0 = vld [vmem:[#allocation2 + $0x190] sm:$0xff] }
 0x5ac   :  { %1125 = vmatpush1.bf16.msra.mxu0 %v949_v2  ;;  %1207 = vmatpush1.bf16.msra.mxu1 %v951_v3  ;;  %v863_v2 = vld [vmem:[#allocation2 + $0x188] sm:$0xff]  ;;  %v865_v3 = vld [vmem:[#allocation2 + $0x198] sm:$0xff] }
 0x5ad   :  { %1135 = vmatprep.subr.bf16.mxu0 %v959_v4  ;;  %1217 = vmatprep.subr.bf16.mxu1 %v961_v8  ;;  %v873_v4 = vld [vmem:[#allocation2 + $0x1d8] sm:$0xff]  ;;  %v875_v8 = vld [vmem:[#allocation2 + $0x1e8] sm:$0xff] }
 0x5af   :  { %1127 = vmatmul.mubr.bf16.vlgmr.msra.gmra.mrb[0].mxu0 %v3371_v9  ;;  %1209 = vmatmul.mubr.bf16.vlgmr.msra.gmra.mrb[0].mxu1 %v3371_v9 }
 0x5b0   :  { %1136 = vmatpush1.bf16.msra.mxu0 %v958_v55  ;;  %1218 = vmatpush1.bf16.msra.mxu1 %v960_v6  ;;  %v872_v55 = vld [vmem:[#allocation2 + $0x1d0] sm:$0xff]  ;;  %v874_v6 = vld [vmem:[#allocation2 + $0x1e0] sm:$0xff] }
 0x5b1   :  { %1137 = vmatprep.subr.bf16.mxu0 %v968_v10  ;;  %1219 = vmatprep.subr.bf16.mxu1 %v970_v12  ;;  %v882_v10 = vld [vmem:[#allocation2 + $0x220] sm:$0xff]  ;;  %v884_v12 = vld [vmem:[#allocation2 + $0x230] sm:$0xff] }
 0x5b2   :  { %1167 = vmatprep.mubr.bf16.mxu0 %v3002_v13  ;;  %1249 = vmatprep.mubr.bf16.mxu1 %v3002_v13 }
 0x5b4   :  { %1138 = vmatpush1.bf16.msra.mxu0 %v967_v15  ;;  %1220 = vmatpush1.bf16.msra.mxu1 %v969_v16  ;;  %v881_v15 = vld [vmem:[#allocation2 + $0x218] sm:$0xff]  ;;  %v883_v16 = vld [vmem:[#allocation2 + $0x228] sm:$0xff] }
 0x5b5   :  { %1139 = vmatprep.subr.bf16.mxu0 %v977_v14  ;;  %1221 = vmatprep.subr.bf16.mxu1 %v979_v7  ;;  %v891_v14 = vld [vmem:[#allocation2 + $0x268] sm:$0xff]  ;;  %v893_v7 = vld [vmem:[#allocation2 + $0x278] sm:$0xff] }
 0x5b8   :  { %1140 = vmatpush1.bf16.msra.mxu0 %v976_v19  ;;  %1222 = vmatpush1.bf16.msra.mxu1 %v978_v22  ;;  %v890_v19 = vld [vmem:[#allocation2 + $0x260] sm:$0xff]  ;;  %v892_v22 = vld [vmem:[#allocation2 + $0x270] sm:$0xff] }
 0x5b9   :  { %1141 = vmatprep.subr.bf16.mxu0 %v986_v25  ;;  %1223 = vmatprep.subr.bf16.mxu1 %v988_v17  ;;  %v900_v25 = vld [vmem:[#allocation2 + $0x2b0] sm:$0xff]  ;;  %v902_v17 = vld [vmem:[#allocation2 + $0x2c0] sm:$0xff] }
 0x5bc   :  { %1142 = vmatpush1.bf16.msra.mxu0 %v985_v23  ;;  %1224 = vmatpush1.bf16.msra.mxu1 %v987_v24  ;;  %v899_v23 = vld [vmem:[#allocation2 + $0x2a8] sm:$0xff]  ;;  %v901_v24 = vld [vmem:[#allocation2 + $0x2b8] sm:$0xff] }
 0x5bd   :  { %1143 = vmatprep.subr.bf16.mxu0 %v995_v18  ;;  %1225 = vmatprep.subr.bf16.mxu1 %v997_v29  ;;  %v909_v18 = vld [vmem:[#allocation2 + $0x2f8] sm:$0xff]  ;;  %v911_v29 = vld [vmem:[#allocation2 + $0x308] sm:$0xff] }
 0x5c0   :  { %1144 = vmatpush1.bf16.msra.mxu0 %v994_v30  ;;  %1226 = vmatpush1.bf16.msra.mxu1 %v996_v31  ;;  %v908_v30 = vld [vmem:[#allocation2 + $0x2f0] sm:$0xff]  ;;  %v910_v31 = vld [vmem:[#allocation2 + $0x300] sm:$0xff] }
 0x5c1   :  { %1145 = vmatprep.subr.bf16.mxu0 %v1004_v20  ;;  %1227 = vmatprep.subr.bf16.mxu1 %v1006_v27  ;;  %v918_v20 = vld [vmem:[#allocation2 + $0x340] sm:$0xff]  ;;  %v920_v27 = vld [vmem:[#allocation2 + $0x350] sm:$0xff] }
 0x5c4   :  { %1146 = vmatpush1.bf16.msra.mxu0 %v1003_v28  ;;  %1228 = vmatpush1.bf16.msra.mxu1 %v1005_v32  ;;  %v917_v28 = vld [vmem:[#allocation2 + $0x338] sm:$0xff]  ;;  %v919_v32 = vld [vmem:[#allocation2 + $0x348] sm:$0xff] }
 0x5c5   :  { %1147 = vmatprep.subr.bf16.mxu0 %v1013_v33  ;;  %1229 = vmatprep.subr.bf16.mxu1 %v1015_v34  ;;  %v927_v33 = vld [vmem:[#allocation2 + $0x388] sm:$0xff]  ;;  %v929_v34 = vld [vmem:[#allocation2 + $0x398] sm:$0xff] }
 0x5c8   :  { %1148 = vmatpush1.bf16.msra.mxu0 %v1012_v35  ;;  %1230 = vmatpush1.bf16.msra.mxu1 %v1014_v36  ;;  %v928_v35 = vld [vmem:[#allocation2 + $0x390] sm:$0xff] }
 0x5c9   :  { %1149 = vmatprep.subr.bf16.mxu0 %v1022_v37  ;;  %1231 = vmatprep.subr.bf16.mxu1 %v1024_v38  ;;  %v936_v36 = vld [vmem:[#allocation2 + $0x3d0] sm:$0xff]  ;;  %v938_v37 = vld [vmem:[#allocation2 + $0x3e0] sm:$0xff]  ;;  %v935_v38 = vld [vmem:[#allocation2 + $0x3c8] sm:$0xff] }
 0x5cc   :  { %1150 = vmatpush1.bf16.msra.mxu0 %v1021_v40  ;;  %1232 = vmatpush1.bf16.msra.mxu1 %v1023_v41  ;;  %v945_v40 = vld [vmem:[#allocation2 + $0x418] sm:$0xff]  ;;  %v947_v41 = vld [vmem:[#allocation2 + $0x428] sm:$0xff] }
 0x5cd   :  { %1258 = vmatprep.subr.bf16.mxu0 %v819_v42  ;;  %1340 = vmatprep.subr.bf16.mxu1 %v821_v43  ;;  %v944_v42 = vld [vmem:[#allocation2 + $0x410] sm:$0xff]  ;;  %v946_v43 = vld [vmem:[#allocation2 + $0x420] sm:$0xff] }
 0x5cf   :  { %1168 = vmatmul.mubr.bf16.vlgmr.msra.gmra.mrb[0].mxu0 %v3379_v44  ;;  %1250 = vmatmul.mubr.bf16.vlgmr.msra.gmra.mrb[0].mxu1 %v3379_v44 }
 0x5d0   :  { %1259 = vmatpush1.bf16.msra.mxu0 %v818_v57  ;;  %1341 = vmatpush1.bf16.msra.mxu1 %v820_v45  ;;  %v954_v57 = vld [vmem:[#allocation2 + $0x460] sm:$0xff]  ;;  %v956_v45 = vld [vmem:[#allocation2 + $0x470] sm:$0xff] }
 0x5d1   :  { %1260 = vmatprep.subr.bf16.mxu0 %v828_v46  ;;  %1342 = vmatprep.subr.bf16.mxu1 %v830_v47  ;;  %v953_v46 = vld [vmem:[#allocation2 + $0x458] sm:$0xff]  ;;  %v955_v47 = vld [vmem:[#allocation2 + $0x468] sm:$0xff] }
 0x5d2   :  { %1290 = vmatprep.mubr.bf16.mxu0 %v3365_v60  ;;  %1372 = vmatprep.mubr.bf16.mxu1 %v3365_v60 }
 0x5d4   :  { %1261 = vmatpush1.bf16.msra.mxu0 %v827_v48  ;;  %1343 = vmatpush1.bf16.msra.mxu1 %v829_v49  ;;  %v963_v48 = vld [vmem:[#allocation2 + $0x4a8] sm:$0xff]  ;;  %v965_v49 = vld [vmem:[#allocation2 + $0x4b8] sm:$0xff] }
 0x5d5   :  { %1262 = vmatprep.subr.bf16.mxu0 %v837_v50  ;;  %1344 = vmatprep.subr.bf16.mxu1 %v839_v51  ;;  %v962_v50 = vld [vmem:[#allocation2 + $0x4a0] sm:$0xff]  ;;  %v964_v51 = vld [vmem:[#allocation2 + $0x4b0] sm:$0xff] }
 0x5d8   :  { %1263 = vmatpush1.bf16.msra.mxu0 %v836_v52  ;;  %1345 = vmatpush1.bf16.msra.mxu1 %v838_v53  ;;  %v972_v52 = vld [vmem:[#allocation2 + $0x4f0] sm:$0xff]  ;;  %v974_v53 = vld [vmem:[#allocation2 + $0x500] sm:$0xff] }
 0x5d9   :  { %1264 = vmatprep.subr.bf16.mxu0 %v846_v54  ;;  %1346 = vmatprep.subr.bf16.mxu1 %v848_v21  ;;  %v971_v54 = vld [vmem:[#allocation2 + $0x4e8] sm:$0xff]  ;;  %v973_v21 = vld [vmem:[#allocation2 + $0x4f8] sm:$0xff] }
 0x5dc   :  { %1265 = vmatpush1.bf16.msra.mxu0 %v845_v56  ;;  %1347 = vmatpush1.bf16.msra.mxu1 %v847_v58  ;;  %v981_v56 = vld [vmem:[#allocation2 + $0x538] sm:$0xff]  ;;  %v983_v58 = vld [vmem:[#allocation2 + $0x548] sm:$0xff] }
 0x5dd   :  { %1266 = vmatprep.subr.bf16.mxu0 %v855_v59  ;;  %1348 = vmatprep.subr.bf16.mxu1 %v857_v61  ;;  %v980_v59 = vld [vmem:[#allocation2 + $0x530] sm:$0xff]  ;;  %v982_v61 = vld [vmem:[#allocation2 + $0x540] sm:$0xff] }
 0x5e0   :  { %1267 = vmatpush1.bf16.msra.mxu0 %v854_v62  ;;  %1349 = vmatpush1.bf16.msra.mxu1 %v856_v63  ;;  %v990_v62 = vld [vmem:[#allocation2 + $0x580] sm:$0xff]  ;;  %v992_v63 = vld [vmem:[#allocation2 + $0x590] sm:$0xff] }
 0x5e1   :  { %1268 = vmatprep.subr.bf16.mxu0 %v864_v0  ;;  %1350 = vmatprep.subr.bf16.mxu1 %v866_v1  ;;  %v989_v0 = vld [vmem:[#allocation2 + $0x578] sm:$0xff]  ;;  %v991_v1 = vld [vmem:[#allocation2 + $0x588] sm:$0xff] }
 0x5e4   :  { %1269 = vmatpush1.bf16.msra.mxu0 %v863_v2  ;;  %1351 = vmatpush1.bf16.msra.mxu1 %v865_v3  ;;  %v999_v2 = vld [vmem:[#allocation2 + $0x5c8] sm:$0xff]  ;;  %v1001_v3 = vld [vmem:[#allocation2 + $0x5d8] sm:$0xff] }
 0x5e5   :  { %1270 = vmatprep.subr.bf16.mxu0 %v873_v4  ;;  %1352 = vmatprep.subr.bf16.mxu1 %v875_v8  ;;  %v998_v4 = vld [vmem:[#allocation2 + $0x5c0] sm:$0xff]  ;;  %v1000_v8 = vld [vmem:[#allocation2 + $0x5d0] sm:$0xff] }
 0x5e8   :  { %1271 = vmatpush1.bf16.msra.mxu0 %v872_v55  ;;  %1353 = vmatpush1.bf16.msra.mxu1 %v874_v6  ;;  %v1008_v55 = vld [vmem:[#allocation2 + $0x610] sm:$0xff]  ;;  %v1010_v6 = vld [vmem:[#allocation2 + $0x620] sm:$0xff] }
 0x5e9   :  { %1272 = vmatprep.subr.bf16.mxu0 %v882_v10  ;;  %1354 = vmatprep.subr.bf16.mxu1 %v884_v12  ;;  %v1007_v10 = vld [vmem:[#allocation2 + $0x608] sm:$0xff]  ;;  %v1009_v12 = vld [vmem:[#allocation2 + $0x618] sm:$0xff] }
 0x5ec   :  { %1273 = vmatpush1.bf16.msra.mxu0 %v881_v15  ;;  %1355 = vmatpush1.bf16.msra.mxu1 %v883_v16  ;;  %v1017_v15 = vld [vmem:[#allocation2 + $0x658] sm:$0xff]  ;;  %v1019_v16 = vld [vmem:[#allocation2 + $0x668] sm:$0xff] }
 0x5ed   :  { %1274 = vmatprep.subr.bf16.mxu0 %v891_v14  ;;  %1356 = vmatprep.subr.bf16.mxu1 %v893_v7  ;;  %v1016_v14 = vld [vmem:[#allocation2 + $0x650] sm:$0xff]  ;;  %v1018_v7 = vld [vmem:[#allocation2 + $0x660] sm:$0xff] }
 0x5f0   :  { %1275 = vmatpush1.bf16.msra.mxu0 %v890_v19  ;;  %1357 = vmatpush1.bf16.msra.mxu1 %v892_v22  ;;  %v1026_v19 = vld [vmem:[#allocation2 + $0x6a0] sm:$0xff]  ;;  %v1028_v22 = vld [vmem:[#allocation2 + $0x6b0] sm:$0xff] }
 0x5f1   :  { %1276 = vmatprep.subr.bf16.mxu0 %v900_v25  ;;  %1358 = vmatprep.subr.bf16.mxu1 %v902_v17  ;;  %v1025_v25 = vld [vmem:[#allocation2 + $0x698] sm:$0xff]  ;;  %v1027_v17 = vld [vmem:[#allocation2 + $0x6a8] sm:$0xff] }
 0x5f4   :  { %1277 = vmatpush1.bf16.msra.mxu0 %v899_v23  ;;  %1359 = vmatpush1.bf16.msra.mxu1 %v901_v24  ;;  %v894_v23 = vld [vmem:[#allocation2 + $0x280] sm:$0xff] }
 0x5f5   :  { %1278 = vmatprep.subr.bf16.mxu0 %v909_v18  ;;  %1360 = vmatprep.subr.bf16.mxu1 %v911_v29  ;;  %v822_v24 = vld [vmem:[#allocation2 + $0x40] sm:$0xff]  ;;  %v3003_v18 = vmov 0.0  }
 0x5f6   :  { %v966_v29 = vld [vmem:[#allocation2 + $0x4c0] sm:$0xff] }
 0x5f8   :  { %1279 = vmatpush1.bf16.msra.mxu0 %v908_v30  ;;  %1361 = vmatpush1.bf16.msra.mxu1 %v910_v31  ;;  %v903_v30 = vld [vmem:[#allocation2 + $0x2c8] sm:$0xff] }
 0x5f9   :  { %1280 = vmatprep.subr.bf16.mxu0 %v918_v20  ;;  %1362 = vmatprep.subr.bf16.mxu1 %v920_v27  ;;  %v831_v31 = vld [vmem:[#allocation2 + $0x88] sm:$0xff]  ;;  %v912_v27 = vld [vmem:[#allocation2 + $0x310] sm:$0xff] }
 0x5fa   :  { %v975_v20 = vld [vmem:[#allocation2 + $0x508] sm:$0xff] }
 0x5fc   :  { %1281 = vmatpush1.bf16.msra.mxu0 %v917_v28  ;;  %1363 = vmatpush1.bf16.msra.mxu1 %v919_v32  ;;  %v840_v28 = vld [vmem:[#allocation2 + $0xd0] sm:$0xff] }
 0x5fd   :  { %1282 = vmatprep.subr.bf16.mxu0 %v927_v33  ;;  %1364 = vmatprep.subr.bf16.mxu1 %v929_v34  ;;  %v984_v32 = vld [vmem:[#allocation2 + $0x550] sm:$0xff]  ;;  %v921_v33 = vld [vmem:[#allocation2 + $0x358] sm:$0xff] }
 0x5fe   :  { %v849_v34 = vld [vmem:[#allocation2 + $0x118] sm:$0xff] }
 0x600   :  { %1283 = vmatpush1.bf16.msra.mxu0 %v926_v26  ;;  %1365 = vmatpush1.bf16.msra.mxu1 %v928_v35  ;;  %v993_v26 = vld [vmem:[#allocation2 + $0x598] sm:$0xff]  ;;  %v858_v35 = vld [vmem:[#allocation2 + $0x160] sm:$0xff] }
 0x601   :  { %1284 = vmatprep.subr.bf16.mxu0 %v936_v36  ;;  %1366 = vmatprep.subr.bf16.mxu1 %v938_v37  ;;  %v1002_v36 = vld [vmem:[#allocation2 + $0x5e0] sm:$0xff]  ;;  %v939_v37 = vld [vmem:[#allocation2 + $0x3e8] sm:$0xff] }
 0x604   :  { %1285 = vmatpush1.bf16.msra.mxu0 %v935_v38  ;;  %1367 = vmatpush1.bf16.msra.mxu1 %v937_v39  ;;  %v867_v38 = vld [vmem:[#allocation2 + $0x1a8] sm:$0xff] }
 0x605   :  { %1286 = vmatprep.subr.bf16.mxu0 %v945_v40  ;;  %1368 = vmatprep.subr.bf16.mxu1 %v947_v41  ;;  %v1011_v39 = vld [vmem:[#allocation2 + $0x628] sm:$0xff]  ;;  %v948_v40 = vld [vmem:[#allocation2 + $0x430] sm:$0xff] }
 0x606   :  { %v876_v41 = vld [vmem:[#allocation2 + $0x1f0] sm:$0xff] }
 0x608   :  { %1287 = vmatpush1.bf16.msra.mxu0 %v944_v42  ;;  %1369 = vmatpush1.bf16.msra.mxu1 %v946_v43  ;;  %v1020_v42 = vld [vmem:[#allocation2 + $0x670] sm:$0xff]  ;;  %v957_v43 = vld [vmem:[#allocation2 + $0x478] sm:$0xff] }
 0x609   :  { %1288 = vmatprep.subr.bf16.mxu0 %v954_v57  ;;  %1370 = vmatprep.subr.bf16.mxu1 %v956_v45  ;;  %v885_v57 = vld [vmem:[#allocation2 + $0x238] sm:$0xff] }
 0x60a   :  { %v1029_v45 = vld [vmem:[#allocation2 + $0x6b8] sm:$0xff] }
 0x60c   :  { %1289 = vmatpush1.bf16.msra.mxu0 %v953_v46  ;;  %1371 = vmatpush1.bf16.msra.mxu1 %v955_v47  ;;  %v1051_v46 = vsub.s32 0, %v3123_v11  ;;  %v1030_v47 = vld [vmem:[#allocation3] sm:$0xff] }
 0x60d   :  { %1299 = vmatprep.subr.bf16.mxu0 %v963_v48  ;;  %1381 = vmatprep.subr.bf16.mxu1 %v965_v49 }
 0x60e   :  { %v1052_v48 = vrot.slane %v1030_v47, %v1051_v46 }
 0x60f   :  { %1291 = vmatmul.mubr.bf16.vlgmr.msra.gmra.mrb[4].mxu0 %v3371_v9  ;;  %1373 = vmatmul.mubr.bf16.vlgmr.msra.gmra.mrb[4].mxu1 %v3371_v9 }
 0x610   :  { %1300 = vmatpush1.bf16.msra.mxu0 %v962_v50  ;;  %1382 = vmatpush1.bf16.msra.mxu1 %v964_v51 }
 0x611   :  { %1301 = vmatprep.subr.bf16.mxu0 %v972_v52  ;;  %1383 = vmatprep.subr.bf16.mxu1 %v974_v53 }
 0x612   :  { %1331 = vmatprep.mubr.bf16.mxu0 %v3002_v13  ;;  %1413 = vmatprep.mubr.bf16.mxu1 %v3002_v13 }
 0x614   :  { %1302 = vmatpush1.bf16.msra.mxu0 %v971_v54  ;;  %1384 = vmatpush1.bf16.msra.mxu1 %v973_v21 }
 0x615   :  { %1303 = vmatprep.subr.bf16.mxu0 %v981_v56  ;;  %1385 = vmatprep.subr.bf16.mxu1 %v983_v58 }
 0x618   :  { %1304 = vmatpush1.bf16.msra.mxu0 %v980_v59  ;;  %1386 = vmatpush1.bf16.msra.mxu1 %v982_v61 }
 0x619   :  { %1305 = vmatprep.subr.bf16.mxu0 %v990_v62  ;;  %1387 = vmatprep.subr.bf16.mxu1 %v992_v63 }
 0x61c   :  { %1306 = vmatpush1.bf16.msra.mxu0 %v989_v0  ;;  %1388 = vmatpush1.bf16.msra.mxu1 %v991_v1 }
 0x61d   :  { %1307 = vmatprep.subr.bf16.mxu0 %v999_v2  ;;  %1389 = vmatprep.subr.bf16.mxu1 %v1001_v3  ;;  %v1059_v3 = vsub.s32 2, %v3123_v11 }
 0x620   :  { %1308 = vmatpush1.bf16.msra.mxu0 %v998_v4  ;;  %1390 = vmatpush1.bf16.msra.mxu1 %v1000_v8  ;;  %v1055_v4 = vsub.s32 1, %v3123_v11  ;;  %v1060_v8 = vrot.slane %v1030_v47, %v1059_v3 }
 0x621   :  { %1309 = vmatprep.subr.bf16.mxu0 %v1008_v55  ;;  %1391 = vmatprep.subr.bf16.mxu1 %v1010_v6 }
 0x622   :  { %v1056_v55 = vrot.slane %v1030_v47, %v1055_v4 }
 0x624   :  { %1310 = vmatpush1.bf16.msra.mxu0 %v1007_v10  ;;  %1392 = vmatpush1.bf16.msra.mxu1 %v1009_v12 }
 0x625   :  { %1311 = vmatprep.subr.bf16.mxu0 %v1017_v15  ;;  %1393 = vmatprep.subr.bf16.mxu1 %v1019_v16  ;;  %v1067_v16 = vsub.s32 4, %v3123_v11 }
 0x628   :  { %1312 = vmatpush1.bf16.msra.mxu0 %v1016_v14  ;;  %1394 = vmatpush1.bf16.msra.mxu1 %v1018_v7  ;;  %v1075_v14 = vsub.s32 6, %v3123_v11 }
 0x629   :  { %1313 = vmatprep.subr.bf16.mxu0 %v1026_v19  ;;  %1395 = vmatprep.subr.bf16.mxu1 %v1028_v22  ;;  %v1071_v19 = vsub.s32 5, %v3123_v11  ;;  %v1079_v22 = vsub.s32 7, %v3123_v11 }
 0x62c   :  { %1314 = vmatpush1.bf16.msra.mxu0 %v1025_v25  ;;  %1396 = vmatpush1.bf16.msra.mxu1 %v1027_v17 }
 0x62d   :  { %2590 = vmatprep.subr.bf16.mxu0 %v894_v23  ;;  %2683 = vmatprep.subr.bf16.mxu1 %v3003_v18  ;;  %v1068_v23 = vrot.slane %v1030_v47, %v1067_v16 }
 0x62f   :  { %1332 = vmatmul.mubr.bf16.vlgmr.msra.gmra.mrb[4].mxu0 %v3379_v44  ;;  %1414 = vmatmul.mubr.bf16.vlgmr.msra.gmra.mrb[4].mxu1 %v3379_v44 }
 0x630   :  { %2591 = vmatpush3.bf16.msra.mxu0 %v822_v24  ;;  %2684 = vmatpush3.bf16.msra.mxu1 %v966_v29  ;;  %v1076_v24 = vrot.slane %v1030_v47, %v1075_v14 }
 0x631   :  { %2592 = vmatprep.subr.bf16.mxu0 %v903_v30  ;;  %2685 = vmatprep.subr.bf16.mxu1 %v3003_v18  ;;  %v1072_v30 = vrot.slane %v1030_v47, %v1071_v19 }
 0x632   :  { %1454 = vmatprep.mubr.bf16.mxu0 %v3365_v60  ;;  %2699 = vmatprep.mubr.msk.bf16.mxu1 %vm3004_vm5, %v3003_v18  ;;  %v930_v60 = vld [vmem:[#allocation2 + $0x3a0] sm:$0xff] }
 0x634   :  { %2593 = vmatpush3.bf16.msra.mxu0 %v831_v31  ;;  %2686 = vmatpush3.bf16.msra.mxu1 %v975_v20  ;;  %v1080_v31 = vrot.slane %v1030_v47, %v1079_v22 }
 0x635   :  { %2594 = vmatprep.subr.bf16.mxu0 %v912_v27  ;;  %2687 = vmatprep.subr.bf16.mxu1 %v3003_v18 }
 0x638   :  { %2595 = vmatpush3.bf16.msra.mxu0 %v840_v28  ;;  %2688 = vmatpush3.bf16.msra.mxu1 %v984_v32 }
 0x639   :  { %2596 = vmatprep.subr.bf16.mxu0 %v921_v33  ;;  %2689 = vmatprep.subr.bf16.mxu1 %v3003_v18 }
 0x63c   :  { %2597 = vmatpush3.bf16.msra.mxu0 %v849_v34  ;;  %2690 = vmatpush3.bf16.msra.mxu1 %v993_v26 }
 0x63d   :  { %2598 = vmatprep.subr.bf16.mxu0 %v930_v60  ;;  %2691 = vmatprep.subr.bf16.mxu1 %v3003_v18 }
 0x640   :  { %2599 = vmatpush3.bf16.msra.mxu0 %v858_v35  ;;  %2692 = vmatpush3.bf16.msra.mxu1 %v1002_v36 }
 0x641   :  { %2600 = vmatprep.subr.bf16.mxu0 %v939_v37  ;;  %2693 = vmatprep.subr.bf16.mxu1 %v3003_v18 }
 0x644   :  { %2601 = vmatpush3.bf16.msra.mxu0 %v867_v38  ;;  %2694 = vmatpush3.bf16.msra.mxu1 %v1011_v39 }
 0x645   :  { %2602 = vmatprep.subr.bf16.mxu0 %v948_v40  ;;  %2695 = vmatprep.subr.bf16.mxu1 %v3003_v18 }
 0x648   :  { %2603 = vmatpush3.bf16.msra.mxu0 %v876_v41  ;;  %2696 = vmatpush3.bf16.msra.mxu1 %v1020_v42 }
 0x649   :  { %2604 = vmatprep.subr.bf16.mxu0 %v957_v43  ;;  %2697 = vmatprep.subr.bf16.mxu1 %v3003_v18 }
 0x64c   :  { %2605 = vmatpush3.bf16.msra.mxu0 %v885_v57  ;;  %2698 = vmatpush3.bf16.msra.mxu1 %v1029_v45 }
 0x64f   :  { %1455 = vmatmul.mubr.bf16.vlgmr.msra.gmra.mrb[8].mxu0 %v3371_v9  ;;  %2700 = vmatmul.mubr.bf16.vlgmr.msra.gmra.mrb[8].mxu1 %v3379_v44  ;;  %v1063_v9 = vsub.s32 3, %v3123_v11 }
 0x651   :  { %v1064_v44 = vrot.slane %v1030_v47, %v1063_v9 }
 0x6a2   :  { %v1169_v49 = vpop.f32.mrb[0].mxu0  ;;  %v1251_v50 = vpop.f32.mrb[0].mxu1 }
 0x6a3   :  { %v2743_v51 = vadd.f32 %v1169_v49, %v1052_v48  ;;  %v1171_v52 = vpop.f32.mrb[1].mxu0  ;;  %v1253_v53 = vpop.f32.mrb[1].mxu1  ;;  %v2745_v6 = vadd.f32 %v1251_v50, %v1060_v8 }
 0x6a4   :  { %v1173_v54 = vpop.f32.mrb[2].mxu0  ;;  %v1255_v21 = vpop.f32.mrb[2].mxu1  ;;  %v2746_v61 = vadd.f32 %v1253_v53, %v1064_v44  ;;  %v2744_v10 = vadd.f32 %v1171_v52, %v1056_v55 }
 0x6a5   :  { %v2574_v56 = vmul.f32 -1.442695, %v2743_v51  ;;  %v1174_v58 = vpop.f32.mrb[3].mxu0  ;;  %v1256_v59 = vpop.f32.mrb[3].mxu1  ;;  %v2576_v12 = vmul.f32 -1.442695, %v2745_v6 }
 0x6a6   :  { %v2575_v15 = vmul.f32 -1.442695, %v2744_v10 }
 0x6a7   :  { %2822 = vpow2.f32 %v2574_v56 }
 0x6a8   :  { %2824 = vtanh.f32 %v2746_v61 }
 0x6b1   :  { %v2823_v62 = vpop.eup %2822 }
 0x6b2   :  { %v1529_v63 = vadd.f32 1.0, %v2823_v62  ;;  %v2825_v0 = vpop.eup %2824  ;;  %v2570_v62 = vld [vmem:[#allocation3 + $0x8] ss:$0 sm:$0xff] }
 0x6b4   :  { %2826 = vrcp.f32 %v1529_v63 }
 0x6b5   :  { %2828 = vpow2.f32 %v2576_v12 }
 0x6b6   :  { %2830 = vpow2.f32 %v2575_v15 }
 0x6be   :  { %v2827_v1 = vpop.eup %2826 }
 0x6bf   :  { %v1541_v2 = vmul.f32 %v2827_v1, %v2825_v0  ;;  %v2829_v7 = vpop.eup %2828 }
 0x6c0   :  { %v2831_v25 = vpop.eup %2830  ;;  %v1531_v17 = vadd.f32 1.0, %v2829_v7 }
 0x6c1   :  { %v1530_v29 = vadd.f32 1.0, %v2831_v25 }
 0x6c2   :  { %2832 = vrcp.f32 %v1531_v17 }
 0x6c3   :  { %2834 = vrcp.f32 %v1530_v29 }
 0x6cc   :  { %v2833_v41 = vpop.eup %2832 }
 0x6cd   :  { %v2835_v42 = vpop.eup %2834 }
 0x702   :  { %v1333_v20 = vpop.f32.mrb[4].mxu0  ;;  %v1415_v27 = vpop.f32.mrb[4].mxu1 }
 0x703   :  { %v2747_v28 = vadd.f32 %v1333_v20, %v1068_v23  ;;  %v2749_v32 = vadd.f32 %v1415_v27, %v1076_v24  ;;  %v1335_v33 = vpop.f32.mrb[5].mxu0  ;;  %v1417_v34 = vpop.f32.mrb[5].mxu1 }
 0x704   :  { %v2748_v26 = vadd.f32 %v1335_v33, %v1072_v30  ;;  %v2750_v60 = vadd.f32 %v1417_v34, %v1080_v31  ;;  %v1337_v35 = vpop.f32.mrb[6].mxu0  ;;  %v1419_v36 = vpop.f32.mrb[6].mxu1 }
 0x705   :  { %2836 = vtanh.f32 %v2747_v28  ;;  %v2571_v37 = vmul.f32 -1.442695, %v2749_v32  ;;  %v1338_v38 = vpop.f32.mrb[7].mxu0  ;;  %v1420_v39 = vpop.f32.mrb[7].mxu1 }
 0x706   :  { %2838 = vtanh.f32 %v2748_v26  ;;  %v2572_v40 = vmul.f32 -1.442695, %v2750_v60 }
 0x707   :  { %2840 = vpow2.f32 %v2571_v37 }
 0x708   :  { %2842 = vpow2.f32 %v2572_v40 }
 0x709   :  { %2844 = vtanh.f32 %v1541_v2 }
 0x70f   :  { %v2837_v43 = vpop.eup %2836 }
 0x710   :  { %v2839_v57 = vpop.eup %2838  ;;  %v1542_v45 = vmul.f32 %v2837_v43, %v2835_v42 }
 0x711   :  { %v2841_v47 = vpop.eup %2840  ;;  %v1543_v48 = vmul.f32 %v2839_v57, %v2833_v41 }
 0x712   :  { %v2843_v49 = vpop.eup %2842  ;;  %v1511_v50 = vadd.f32 1.0, %v2841_v47  ;;  %2846 = vtanh.f32 %v1542_v45 }
 0x713   :  { %v1512_v51 = vadd.f32 1.0, %v2843_v49  ;;  %v2845_v52 = vpop.eup %2844 }
 0x714   :  { %2848 = vrcp.f32 %v1511_v50 }
 0x715   :  { %2850 = vrcp.f32 %v1512_v51 }
 0x71c   :  { %v2847_v53 = vpop.eup %2846 }
 0x71e   :  { %v2849_v54 = vpop.eup %2848 }
 0x71f   :  { %v2851_v21 = vpop.eup %2850  ;;  %v3428_v56 = vmul.f32 %v2849_v54, %v2845_v52 }
 0x720   :  { %v1548_v58 = vmul.f32 %v2851_v21, %v2847_v53 }
 0x722   :  { %v2606_v59 = vpop.f32.mrb[8].mxu0  ;;  %v1496_v44 = vpop.f32.mrb[8].mxu1 }
 0x723   :  { %v2607_v61 = vpop.f32.mrb[9].mxu0  ;;  %v2701_v63 = vpop.f32.mrb[9].mxu1 }
 0x724   :  { %v2608_v0 = vadd.f32 %v2607_v61, %v2606_v59  ;;  %v2609_v1 = vpop.f32.mrb[10].mxu0  ;;  %v1499_v2 = vpop.f32.mrb[10].mxu1 }
 0x725   :  { %v2610_v8 = vpop.f32.mrb[11].mxu0  ;;  %v2702_v55 = vpop.f32.mrb[11].mxu1 }
 0x726   :  { %v1457_v6 = vadd.f32 %v2608_v0, %v2570_v62 }
 0x728   :  { %v1497_v10 = vadd.f32 %v1496_v44, %v1457_v6 }
 0x72a   :  { %v2573_v12 = vmul.f32 -1.442695, %v1497_v10 }
 0x72c   :  { %2852 = vpow2.f32 %v2573_v12 }
 0x72d   :  { %2854 = vtanh.f32 %v1543_v48 }
 0x736   :  { %v2853_v15 = vpop.eup %2852 }
 0x737   :  { %v1513_v7 = vadd.f32 1.0, %v2853_v15  ;;  %v2855_v25 = vpop.eup %2854 }
 0x739   :  { %2856 = vrcp.f32 %v1513_v7 }
 0x743   :  { %v2857_v17 = vpop.eup %2856 }
 0x744   :  { %v3430_v23 = vmul.f32 %v2857_v17, %v2855_v25 }
 0x745   :  { %2974 = dma.done.wait [#allocation8 + $0x2], 27648 }
 0x746   :  { %2975 = vsyncadd [#allocation8 + $0x2], 4294939648 }
 0x747   :  { %2976 = dma.done.wait [#allocation8 + $0x3], 144 }
 0x748   :  { %2977 = vsyncadd [#allocation8 + $0x3], 4294967152  ;;  %v3432_v24 = vpack.c.bf16 %v1548_v58, %v1548_v58  ;;  %v1558_v29 = vld [vmem:[#allocation4 + $0x8] sm:$0xff]  ;;  %v1560_v30 = vld [vmem:[#allocation4 + $0x18] sm:$0xff]  ;;  %vm2307_vm6 = vcmp.lt.s32.totalorder %v286_v5, 384 }
 0x749   :  { %v1557_v31 = vld [vmem:[#allocation4] sm:$0xff]  ;;  %1822 = vmatprep.subr.bf16.mxu0 %v1558_v29  ;;  %1904 = vmatprep.subr.bf16.mxu1 %v1560_v30  ;;  %v1559_v20 = vld [vmem:[#allocation4 + $0x10] sm:$0xff]  ;;  %v1566_v32 = vld [vmem:[#allocation4 + $0x48] sm:$0xff] }
 0x74a   :  { %1854 = vmatprep.mubr.bf16.mxu0 %v3432_v24  ;;  %1936 = vmatprep.mubr.bf16.mxu1 %v3432_v24  ;;  %v1567_v27 = vld [vmem:[#allocation4 + $0x50] sm:$0xff]  ;;  %v1569_v28 = vld [vmem:[#allocation4 + $0x60] sm:$0xff]  ;;  %v1568_v33 = vld [vmem:[#allocation4 + $0x58] sm:$0xff] }
 0x74b   :  { %1823 = vmatpush1.bf16.msra.mxu0 %v1557_v31  ;;  %1905 = vmatpush1.bf16.msra.mxu1 %v1559_v20  ;;  %v1576_v34 = vld [vmem:[#allocation4 + $0x98] sm:$0xff]  ;;  %v1578_v26 = vld [vmem:[#allocation4 + $0xa8] sm:$0xff]  ;;  %v1575_v60 = vld [vmem:[#allocation4 + $0x90] sm:$0xff] }
 0x74c   :  { %1824 = vmatprep.subr.bf16.mxu0 %v1567_v27  ;;  %1906 = vmatprep.subr.bf16.mxu1 %v1569_v28  ;;  %v1577_v35 = vld [vmem:[#allocation4 + $0xa0] sm:$0xff]  ;;  %v1587_v37 = vld [vmem:[#allocation4 + $0xf0] sm:$0xff]  ;;  %v1584_v38 = vld [vmem:[#allocation4 + $0xd8] sm:$0xff] }
 0x74d   :  { %v1585_v36 = vld [vmem:[#allocation4 + $0xe0] sm:$0xff]  ;;  %v1586_v39 = vld [vmem:[#allocation4 + $0xe8] sm:$0xff]  ;;  %v1596_v41 = vld [vmem:[#allocation4 + $0x138] sm:$0xff] }
 0x74e   :  { %v1594_v40 = vld [vmem:[#allocation4 + $0x128] sm:$0xff]  ;;  %v1593_v42 = vld [vmem:[#allocation4 + $0x120] sm:$0xff]  ;;  %v1595_v43 = vld [vmem:[#allocation4 + $0x130] sm:$0xff] }
 0x74f   :  { %1825 = vmatpush1.bf16.msra.mxu0 %v1566_v32  ;;  %1907 = vmatpush1.bf16.msra.mxu1 %v1568_v33  ;;  %v1603_v57 = vld [vmem:[#allocation4 + $0x170] sm:$0xff]  ;;  %v1605_v45 = vld [vmem:[#allocation4 + $0x180] sm:$0xff]  ;;  %v1602_v47 = vld [vmem:[#allocation4 + $0x168] sm:$0xff] }
 0x750   :  { %1826 = vmatprep.subr.bf16.mxu0 %v1576_v34  ;;  %1908 = vmatprep.subr.bf16.mxu1 %v1578_v26  ;;  %v1604_v48 = vld [vmem:[#allocation4 + $0x178] sm:$0xff]  ;;  %v1614_v50 = vld [vmem:[#allocation4 + $0x1c8] sm:$0xff]  ;;  %v1611_v51 = vld [vmem:[#allocation4 + $0x1b0] sm:$0xff] }
 0x751   :  { %v1612_v49 = vld [vmem:[#allocation4 + $0x1b8] sm:$0xff]  ;;  %v1613_v52 = vld [vmem:[#allocation4 + $0x1c0] sm:$0xff]  ;;  %v1623_v54 = vld [vmem:[#allocation4 + $0x210] sm:$0xff] }
 0x752   :  { %v1621_v53 = vld [vmem:[#allocation4 + $0x200] sm:$0xff]  ;;  %v1620_v21 = vld [vmem:[#allocation4 + $0x1f8] sm:$0xff]  ;;  %v1622_v58 = vld [vmem:[#allocation4 + $0x208] sm:$0xff] }
 0x753   :  { %1827 = vmatpush1.bf16.msra.mxu0 %v1575_v60  ;;  %1909 = vmatpush1.bf16.msra.mxu1 %v1577_v35  ;;  %v1630_v59 = vld [vmem:[#allocation4 + $0x248] sm:$0xff]  ;;  %v1632_v44 = vld [vmem:[#allocation4 + $0x258] sm:$0xff]  ;;  %v1629_v61 = vld [vmem:[#allocation4 + $0x240] sm:$0xff] }
 0x754   :  { %1828 = vmatprep.subr.bf16.mxu0 %v1585_v36  ;;  %1910 = vmatprep.subr.bf16.mxu1 %v1587_v37  ;;  %v1631_v62 = vld [vmem:[#allocation4 + $0x250] sm:$0xff]  ;;  %v1641_v0 = vld [vmem:[#allocation4 + $0x2a0] sm:$0xff]  ;;  %v1638_v1 = vld [vmem:[#allocation4 + $0x288] sm:$0xff] }
 0x755   :  { %v1639_v63 = vld [vmem:[#allocation4 + $0x290] sm:$0xff]  ;;  %v1640_v2 = vld [vmem:[#allocation4 + $0x298] sm:$0xff]  ;;  %v1650_v55 = vld [vmem:[#allocation4 + $0x2e8] sm:$0xff] }
 0x756   :  { %v1648_v8 = vld [vmem:[#allocation4 + $0x2d8] sm:$0xff]  ;;  %v1647_v6 = vld [vmem:[#allocation4 + $0x2d0] sm:$0xff]  ;;  %v1649_v10 = vld [vmem:[#allocation4 + $0x2e0] sm:$0xff] }
 0x757   :  { %1829 = vmatpush1.bf16.msra.mxu0 %v1584_v38  ;;  %1911 = vmatpush1.bf16.msra.mxu1 %v1586_v39  ;;  %v1657_v12 = vld [vmem:[#allocation4 + $0x320] sm:$0xff]  ;;  %v1659_v15 = vld [vmem:[#allocation4 + $0x330] sm:$0xff]  ;;  %v1656_v7 = vld [vmem:[#allocation4 + $0x318] sm:$0xff] }
 0x758   :  { %1830 = vmatprep.subr.bf16.mxu0 %v1594_v40  ;;  %1912 = vmatprep.subr.bf16.mxu1 %v1596_v41  ;;  %v1658_v25 = vld [vmem:[#allocation4 + $0x328] sm:$0xff]  ;;  %v1668_v29 = vld [vmem:[#allocation4 + $0x378] sm:$0xff]  ;;  %v1665_v30 = vld [vmem:[#allocation4 + $0x360] sm:$0xff]  ;;  %v3438_v41 = vpack.c.bf16 %v3428_v56, %v3428_v56 }
 0x759   :  { %v1666_v17 = vld [vmem:[#allocation4 + $0x368] sm:$0xff]  ;;  %v1667_v31 = vld [vmem:[#allocation4 + $0x370] sm:$0xff]  ;;  %v1677_v27 = vld [vmem:[#allocation4 + $0x3c0] sm:$0xff] }
 0x75a   :  { %v1675_v20 = vld [vmem:[#allocation4 + $0x3b0] sm:$0xff]  ;;  %v1674_v28 = vld [vmem:[#allocation4 + $0x3a8] sm:$0xff]  ;;  %v1676_v32 = vld [vmem:[#allocation4 + $0x3b8] sm:$0xff] }
 0x75b   :  { %1831 = vmatpush1.bf16.msra.mxu0 %v1593_v42  ;;  %1913 = vmatpush1.bf16.msra.mxu1 %v1595_v43  ;;  %v1684_v33 = vld [vmem:[#allocation4 + $0x3f8] sm:$0xff]  ;;  %v1686_v34 = vld [vmem:[#allocation4 + $0x408] sm:$0xff]  ;;  %v1683_v26 = vld [vmem:[#allocation4 + $0x3f0] sm:$0xff] }
 0x75c   :  { %1832 = vmatprep.subr.bf16.mxu0 %v1603_v57  ;;  %1914 = vmatprep.subr.bf16.mxu1 %v1605_v45  ;;  %v1685_v60 = vld [vmem:[#allocation4 + $0x400] sm:$0xff]  ;;  %v1695_v36 = vld [vmem:[#allocation4 + $0x450] sm:$0xff]  ;;  %v1692_v37 = vld [vmem:[#allocation4 + $0x438] sm:$0xff] }
 0x75d   :  { %v1693_v35 = vld [vmem:[#allocation4 + $0x440] sm:$0xff]  ;;  %v1694_v38 = vld [vmem:[#allocation4 + $0x448] sm:$0xff]  ;;  %v1704_v40 = vld [vmem:[#allocation4 + $0x498] sm:$0xff] }
 0x75e   :  { %v1702_v39 = vld [vmem:[#allocation4 + $0x488] sm:$0xff]  ;;  %v1701_v42 = vld [vmem:[#allocation4 + $0x480] sm:$0xff]  ;;  %v1703_v43 = vld [vmem:[#allocation4 + $0x490] sm:$0xff] }
 0x75f   :  { %1833 = vmatpush1.bf16.msra.mxu0 %v1602_v47  ;;  %1915 = vmatpush1.bf16.msra.mxu1 %v1604_v48  ;;  %v1711_v57 = vld [vmem:[#allocation4 + $0x4d0] sm:$0xff]  ;;  %v1713_v45 = vld [vmem:[#allocation4 + $0x4e0] sm:$0xff]  ;;  %v1710_v47 = vld [vmem:[#allocation4 + $0x4c8] sm:$0xff] }
 0x760   :  { %1834 = vmatprep.subr.bf16.mxu0 %v1612_v49  ;;  %1916 = vmatprep.subr.bf16.mxu1 %v1614_v50  ;;  %v1712_v48 = vld [vmem:[#allocation4 + $0x4d8] sm:$0xff]  ;;  %v1722_v49 = vld [vmem:[#allocation4 + $0x528] sm:$0xff]  ;;  %v1719_v50 = vld [vmem:[#allocation4 + $0x510] sm:$0xff] }
 0x761   :  { %v1720_v56 = vld [vmem:[#allocation4 + $0x518] sm:$0xff] }
 0x763   :  { %1835 = vmatpush1.bf16.msra.mxu0 %v1611_v51  ;;  %1917 = vmatpush1.bf16.msra.mxu1 %v1613_v52  ;;  %v1721_v51 = vld [vmem:[#allocation4 + $0x520] sm:$0xff] }
 0x764   :  { %1836 = vmatprep.subr.bf16.mxu0 %v1621_v53  ;;  %1918 = vmatprep.subr.bf16.mxu1 %v1623_v54  ;;  %v1729_v52 = vld [vmem:[#allocation4 + $0x560] sm:$0xff]  ;;  %v1731_v53 = vld [vmem:[#allocation4 + $0x570] sm:$0xff]  ;;  %v1728_v54 = vld [vmem:[#allocation4 + $0x558] sm:$0xff] }
 0x767   :  { %1837 = vmatpush1.bf16.msra.mxu0 %v1620_v21  ;;  %1919 = vmatpush1.bf16.msra.mxu1 %v1622_v58  ;;  %v1730_v21 = vld [vmem:[#allocation4 + $0x568] sm:$0xff] }
 0x768   :  { %1838 = vmatprep.subr.bf16.mxu0 %v1630_v59  ;;  %1920 = vmatprep.subr.bf16.mxu1 %v1632_v44  ;;  %v1738_v58 = vld [vmem:[#allocation4 + $0x5a8] sm:$0xff]  ;;  %v1740_v59 = vld [vmem:[#allocation4 + $0x5b8] sm:$0xff]  ;;  %v1737_v44 = vld [vmem:[#allocation4 + $0x5a0] sm:$0xff] }
 0x76b   :  { %1839 = vmatpush1.bf16.msra.mxu0 %v1629_v61  ;;  %1921 = vmatpush1.bf16.msra.mxu1 %v1631_v62  ;;  %v1739_v61 = vld [vmem:[#allocation4 + $0x5b0] sm:$0xff] }
 0x76c   :  { %1840 = vmatprep.subr.bf16.mxu0 %v1639_v63  ;;  %1922 = vmatprep.subr.bf16.mxu1 %v1641_v0  ;;  %v1747_v62 = vld [vmem:[#allocation4 + $0x5f0] sm:$0xff]  ;;  %v1749_v63 = vld [vmem:[#allocation4 + $0x600] sm:$0xff]  ;;  %v1746_v0 = vld [vmem:[#allocation4 + $0x5e8] sm:$0xff] }
 0x76f   :  { %1841 = vmatpush1.bf16.msra.mxu0 %v1638_v1  ;;  %1923 = vmatpush1.bf16.msra.mxu1 %v1640_v2  ;;  %v1748_v1 = vld [vmem:[#allocation4 + $0x5f8] sm:$0xff] }
 0x770   :  { %1842 = vmatprep.subr.bf16.mxu0 %v1648_v8  ;;  %1924 = vmatprep.subr.bf16.mxu1 %v1650_v55  ;;  %v1756_v2 = vld [vmem:[#allocation4 + $0x638] sm:$0xff]  ;;  %v1758_v8 = vld [vmem:[#allocation4 + $0x648] sm:$0xff]  ;;  %v1755_v55 = vld [vmem:[#allocation4 + $0x630] sm:$0xff] }
 0x773   :  { %1843 = vmatpush1.bf16.msra.mxu0 %v1647_v6  ;;  %1925 = vmatpush1.bf16.msra.mxu1 %v1649_v10  ;;  %v1757_v6 = vld [vmem:[#allocation4 + $0x640] sm:$0xff] }
 0x774   :  { %1844 = vmatprep.subr.bf16.mxu0 %v1657_v12  ;;  %1926 = vmatprep.subr.bf16.mxu1 %v1659_v15  ;;  %v1765_v10 = vld [vmem:[#allocation4 + $0x680] sm:$0xff]  ;;  %v1767_v12 = vld [vmem:[#allocation4 + $0x690] sm:$0xff]  ;;  %v1764_v15 = vld [vmem:[#allocation4 + $0x678] sm:$0xff] }
 0x777   :  { %1845 = vmatpush1.bf16.msra.mxu0 %v1656_v7  ;;  %1927 = vmatpush1.bf16.msra.mxu1 %v1658_v25  ;;  %v1766_v7 = vld [vmem:[#allocation4 + $0x688] sm:$0xff] }
 0x778   :  { %1846 = vmatprep.subr.bf16.mxu0 %v1666_v17  ;;  %1928 = vmatprep.subr.bf16.mxu1 %v1668_v29  ;;  %v1562_v25 = vld [vmem:[#allocation4 + $0x28] sm:$0xff]  ;;  %v1564_v17 = vld [vmem:[#allocation4 + $0x38] sm:$0xff]  ;;  %v3446_v29 = vpack.c.bf16 %v3430_v23, %v3430_v23 }
 0x779   :  { %v1580_v23 = vld [vmem:[#allocation4 + $0xb8] sm:$0xff] }
 0x77b   :  { %1847 = vmatpush1.bf16.msra.mxu0 %v1665_v30  ;;  %1929 = vmatpush1.bf16.msra.mxu1 %v1667_v31  ;;  %v1561_v30 = vld [vmem:[#allocation4 + $0x20] sm:$0xff]  ;;  %v1563_v31 = vld [vmem:[#allocation4 + $0x30] sm:$0xff] }
 0x77c   :  { %1848 = vmatprep.subr.bf16.mxu0 %v1675_v20  ;;  %1930 = vmatprep.subr.bf16.mxu1 %v1677_v27  ;;  %v1571_v20 = vld [vmem:[#allocation4 + $0x70] sm:$0xff]  ;;  %v1573_v27 = vld [vmem:[#allocation4 + $0x80] sm:$0xff] }
 0x77f   :  { %1849 = vmatpush1.bf16.msra.mxu0 %v1674_v28  ;;  %1931 = vmatpush1.bf16.msra.mxu1 %v1676_v32  ;;  %v1570_v28 = vld [vmem:[#allocation4 + $0x68] sm:$0xff]  ;;  %v1572_v32 = vld [vmem:[#allocation4 + $0x78] sm:$0xff] }
 0x780   :  { %1850 = vmatprep.subr.bf16.mxu0 %v1684_v33  ;;  %1932 = vmatprep.subr.bf16.mxu1 %v1686_v34  ;;  %v1582_v33 = vld [vmem:[#allocation4 + $0xc8] sm:$0xff]  ;;  %v1579_v34 = vld [vmem:[#allocation4 + $0xb0] sm:$0xff] }
 0x783   :  { %1851 = vmatpush1.bf16.msra.mxu0 %v1683_v26  ;;  %1933 = vmatpush1.bf16.msra.mxu1 %v1685_v60  ;;  %v1581_v26 = vld [vmem:[#allocation4 + $0xc0] sm:$0xff] }
 0x784   :  { %1852 = vmatprep.subr.bf16.mxu0 %v1693_v35  ;;  %1934 = vmatprep.subr.bf16.mxu1 %v1695_v36  ;;  %v1589_v60 = vld [vmem:[#allocation4 + $0x100] sm:$0xff]  ;;  %v1591_v35 = vld [vmem:[#allocation4 + $0x110] sm:$0xff]  ;;  %v1588_v36 = vld [vmem:[#allocation4 + $0xf8] sm:$0xff] }
 0x787   :  { %1853 = vmatpush1.bf16.msra.mxu0 %v1692_v37  ;;  %1935 = vmatpush1.bf16.msra.mxu1 %v1694_v38  ;;  %v1590_v37 = vld [vmem:[#allocation4 + $0x108] sm:$0xff] }
 0x788   :  { %1863 = vmatprep.subr.bf16.mxu0 %v1702_v39  ;;  %1945 = vmatprep.subr.bf16.mxu1 %v1704_v40  ;;  %v1598_v38 = vld [vmem:[#allocation4 + $0x148] sm:$0xff]  ;;  %v1600_v39 = vld [vmem:[#allocation4 + $0x158] sm:$0xff]  ;;  %v1597_v40 = vld [vmem:[#allocation4 + $0x140] sm:$0xff] }
 0x78a   :  { %1855 = vmatmul.mubr.bf16.vlgmr.msra.gmra.mrb[12].mxu0 %v3438_v41  ;;  %1937 = vmatmul.mubr.bf16.vlgmr.msra.gmra.mrb[12].mxu1 %v3438_v41 }
 0x78b   :  { %1864 = vmatpush1.bf16.msra.mxu0 %v1701_v42  ;;  %1946 = vmatpush1.bf16.msra.mxu1 %v1703_v43  ;;  %v1599_v42 = vld [vmem:[#allocation4 + $0x150] sm:$0xff] }
 0x78c   :  { %1865 = vmatprep.subr.bf16.mxu0 %v1711_v57  ;;  %1947 = vmatprep.subr.bf16.mxu1 %v1713_v45  ;;  %v1607_v43 = vld [vmem:[#allocation4 + $0x190] sm:$0xff]  ;;  %v1609_v57 = vld [vmem:[#allocation4 + $0x1a0] sm:$0xff]  ;;  %v1606_v45 = vld [vmem:[#allocation4 + $0x188] sm:$0xff] }
 0x78d   :  { %1895 = vmatprep.mubr.bf16.mxu0 %v3002_v13  ;;  %1977 = vmatprep.mubr.bf16.mxu1 %v3002_v13 }
 0x78f   :  { %1866 = vmatpush1.bf16.msra.mxu0 %v1710_v47  ;;  %1948 = vmatpush1.bf16.msra.mxu1 %v1712_v48  ;;  %v1608_v47 = vld [vmem:[#allocation4 + $0x198] sm:$0xff] }
 0x790   :  { %1867 = vmatprep.subr.bf16.mxu0 %v1720_v56  ;;  %1949 = vmatprep.subr.bf16.mxu1 %v1722_v49  ;;  %v1616_v48 = vld [vmem:[#allocation4 + $0x1d8] sm:$0xff]  ;;  %v1618_v56 = vld [vmem:[#allocation4 + $0x1e8] sm:$0xff]  ;;  %v1615_v49 = vld [vmem:[#allocation4 + $0x1d0] sm:$0xff] }
 0x793   :  { %1868 = vmatpush1.bf16.msra.mxu0 %v1719_v50  ;;  %1950 = vmatpush1.bf16.msra.mxu1 %v1721_v51  ;;  %v1617_v50 = vld [vmem:[#allocation4 + $0x1e0] sm:$0xff] }
 0x794   :  { %1869 = vmatprep.subr.bf16.mxu0 %v1729_v52  ;;  %1951 = vmatprep.subr.bf16.mxu1 %v1731_v53  ;;  %v1625_v51 = vld [vmem:[#allocation4 + $0x220] sm:$0xff]  ;;  %v1627_v52 = vld [vmem:[#allocation4 + $0x230] sm:$0xff]  ;;  %v1624_v53 = vld [vmem:[#allocation4 + $0x218] sm:$0xff] }
 0x797   :  { %1870 = vmatpush1.bf16.msra.mxu0 %v1728_v54  ;;  %1952 = vmatpush1.bf16.msra.mxu1 %v1730_v21  ;;  %v1626_v54 = vld [vmem:[#allocation4 + $0x228] sm:$0xff] }
 0x798   :  { %1871 = vmatprep.subr.bf16.mxu0 %v1738_v58  ;;  %1953 = vmatprep.subr.bf16.mxu1 %v1740_v59  ;;  %v1634_v21 = vld [vmem:[#allocation4 + $0x268] sm:$0xff]  ;;  %v1636_v58 = vld [vmem:[#allocation4 + $0x278] sm:$0xff]  ;;  %v1633_v59 = vld [vmem:[#allocation4 + $0x260] sm:$0xff] }
 0x79b   :  { %1872 = vmatpush1.bf16.msra.mxu0 %v1737_v44  ;;  %1954 = vmatpush1.bf16.msra.mxu1 %v1739_v61  ;;  %v1635_v44 = vld [vmem:[#allocation4 + $0x270] sm:$0xff] }
 0x79c   :  { %1873 = vmatprep.subr.bf16.mxu0 %v1747_v62  ;;  %1955 = vmatprep.subr.bf16.mxu1 %v1749_v63  ;;  %v1643_v61 = vld [vmem:[#allocation4 + $0x2b0] sm:$0xff]  ;;  %v1645_v62 = vld [vmem:[#allocation4 + $0x2c0] sm:$0xff]  ;;  %v1642_v63 = vld [vmem:[#allocation4 + $0x2a8] sm:$0xff] }
 0x79f   :  { %1874 = vmatpush1.bf16.msra.mxu0 %v1746_v0  ;;  %1956 = vmatpush1.bf16.msra.mxu1 %v1748_v1  ;;  %v1644_v0 = vld [vmem:[#allocation4 + $0x2b8] sm:$0xff] }
 0x7a0   :  { %1875 = vmatprep.subr.bf16.mxu0 %v1756_v2  ;;  %1957 = vmatprep.subr.bf16.mxu1 %v1758_v8  ;;  %v1652_v1 = vld [vmem:[#allocation4 + $0x2f8] sm:$0xff]  ;;  %v1654_v2 = vld [vmem:[#allocation4 + $0x308] sm:$0xff]  ;;  %v1651_v8 = vld [vmem:[#allocation4 + $0x2f0] sm:$0xff] }
 0x7a3   :  { %1876 = vmatpush1.bf16.msra.mxu0 %v1755_v55  ;;  %1958 = vmatpush1.bf16.msra.mxu1 %v1757_v6  ;;  %v1653_v55 = vld [vmem:[#allocation4 + $0x300] sm:$0xff] }
 0x7a4   :  { %1877 = vmatprep.subr.bf16.mxu0 %v1765_v10  ;;  %1959 = vmatprep.subr.bf16.mxu1 %v1767_v12  ;;  %v1661_v6 = vld [vmem:[#allocation4 + $0x340] sm:$0xff]  ;;  %v1663_v10 = vld [vmem:[#allocation4 + $0x350] sm:$0xff]  ;;  %v1660_v12 = vld [vmem:[#allocation4 + $0x338] sm:$0xff] }
 0x7a7   :  { %1878 = vmatpush1.bf16.msra.mxu0 %v1764_v15  ;;  %1960 = vmatpush1.bf16.msra.mxu1 %v1766_v7  ;;  %v1662_v15 = vld [vmem:[#allocation4 + $0x348] sm:$0xff] }
 0x7a8   :  { %1986 = vmatprep.subr.bf16.mxu0 %v1562_v25  ;;  %2068 = vmatprep.subr.bf16.mxu1 %v1564_v17  ;;  %v1670_v7 = vld [vmem:[#allocation4 + $0x388] sm:$0xff]  ;;  %v1672_v25 = vld [vmem:[#allocation4 + $0x398] sm:$0xff]  ;;  %v1669_v17 = vld [vmem:[#allocation4 + $0x380] sm:$0xff] }
 0x7aa   :  { %1896 = vmatmul.mubr.bf16.vlgmr.msra.gmra.mrb[12].mxu0 %v3446_v29  ;;  %1978 = vmatmul.mubr.bf16.vlgmr.msra.gmra.mrb[12].mxu1 %v3446_v29 }
 0x7ab   :  { %1987 = vmatpush1.bf16.msra.mxu0 %v1561_v30  ;;  %2069 = vmatpush1.bf16.msra.mxu1 %v1563_v31  ;;  %v1671_v30 = vld [vmem:[#allocation4 + $0x390] sm:$0xff] }
 0x7ac   :  { %1988 = vmatprep.subr.bf16.mxu0 %v1571_v20  ;;  %2070 = vmatprep.subr.bf16.mxu1 %v1573_v27  ;;  %v1679_v31 = vld [vmem:[#allocation4 + $0x3d0] sm:$0xff]  ;;  %v1681_v20 = vld [vmem:[#allocation4 + $0x3e0] sm:$0xff]  ;;  %v1678_v27 = vld [vmem:[#allocation4 + $0x3c8] sm:$0xff] }
 0x7ad   :  { %2018 = vmatprep.mubr.bf16.mxu0 %v3432_v24  ;;  %2100 = vmatprep.mubr.bf16.mxu1 %v3432_v24 }
 0x7af   :  { %1989 = vmatpush1.bf16.msra.mxu0 %v1570_v28  ;;  %2071 = vmatpush1.bf16.msra.mxu1 %v1572_v32  ;;  %v1680_v28 = vld [vmem:[#allocation4 + $0x3d8] sm:$0xff] }
 0x7b0   :  { %1990 = vmatprep.subr.bf16.mxu0 %v1580_v23  ;;  %2072 = vmatprep.subr.bf16.mxu1 %v1582_v33  ;;  %v1688_v32 = vld [vmem:[#allocation4 + $0x418] sm:$0xff]  ;;  %v1690_v23 = vld [vmem:[#allocation4 + $0x428] sm:$0xff]  ;;  %v1687_v33 = vld [vmem:[#allocation4 + $0x410] sm:$0xff] }
 0x7b3   :  { %1991 = vmatpush1.bf16.msra.mxu0 %v1579_v34  ;;  %2073 = vmatpush1.bf16.msra.mxu1 %v1581_v26  ;;  %v1689_v34 = vld [vmem:[#allocation4 + $0x420] sm:$0xff] }
 0x7b4   :  { %1992 = vmatprep.subr.bf16.mxu0 %v1589_v60  ;;  %2074 = vmatprep.subr.bf16.mxu1 %v1591_v35  ;;  %v1697_v26 = vld [vmem:[#allocation4 + $0x460] sm:$0xff]  ;;  %v1699_v60 = vld [vmem:[#allocation4 + $0x470] sm:$0xff]  ;;  %v1696_v35 = vld [vmem:[#allocation4 + $0x458] sm:$0xff] }
 0x7b7   :  { %1993 = vmatpush1.bf16.msra.mxu0 %v1588_v36  ;;  %2075 = vmatpush1.bf16.msra.mxu1 %v1590_v37  ;;  %v1698_v36 = vld [vmem:[#allocation4 + $0x468] sm:$0xff] }
 0x7b8   :  { %1994 = vmatprep.subr.bf16.mxu0 %v1598_v38  ;;  %2076 = vmatprep.subr.bf16.mxu1 %v1600_v39  ;;  %v1706_v37 = vld [vmem:[#allocation4 + $0x4a8] sm:$0xff]  ;;  %v1708_v38 = vld [vmem:[#allocation4 + $0x4b8] sm:$0xff]  ;;  %v1705_v39 = vld [vmem:[#allocation4 + $0x4a0] sm:$0xff] }
 0x7bb   :  { %1995 = vmatpush1.bf16.msra.mxu0 %v1597_v40  ;;  %2077 = vmatpush1.bf16.msra.mxu1 %v1599_v42  ;;  %v1707_v40 = vld [vmem:[#allocation4 + $0x4b0] sm:$0xff] }
 0x7bc   :  { %1996 = vmatprep.subr.bf16.mxu0 %v1607_v43  ;;  %2078 = vmatprep.subr.bf16.mxu1 %v1609_v57  ;;  %v1715_v42 = vld [vmem:[#allocation4 + $0x4f0] sm:$0xff]  ;;  %v1717_v43 = vld [vmem:[#allocation4 + $0x500] sm:$0xff]  ;;  %v1714_v57 = vld [vmem:[#allocation4 + $0x4e8] sm:$0xff] }
 0x7bf   :  { %1997 = vmatpush1.bf16.msra.mxu0 %v1606_v45  ;;  %2079 = vmatpush1.bf16.msra.mxu1 %v1608_v47  ;;  %v1716_v45 = vld [vmem:[#allocation4 + $0x4f8] sm:$0xff] }
 0x7c0   :  { %1998 = vmatprep.subr.bf16.mxu0 %v1616_v48  ;;  %2080 = vmatprep.subr.bf16.mxu1 %v1618_v56  ;;  %v1724_v47 = vld [vmem:[#allocation4 + $0x538] sm:$0xff]  ;;  %v1726_v48 = vld [vmem:[#allocation4 + $0x548] sm:$0xff]  ;;  %v1723_v56 = vld [vmem:[#allocation4 + $0x530] sm:$0xff] }
 0x7c3   :  { %1999 = vmatpush1.bf16.msra.mxu0 %v1615_v49  ;;  %2081 = vmatpush1.bf16.msra.mxu1 %v1617_v50  ;;  %v1725_v49 = vld [vmem:[#allocation4 + $0x540] sm:$0xff] }
 0x7c4   :  { %2000 = vmatprep.subr.bf16.mxu0 %v1625_v51  ;;  %2082 = vmatprep.subr.bf16.mxu1 %v1627_v52  ;;  %v1733_v50 = vld [vmem:[#allocation4 + $0x580] sm:$0xff]  ;;  %v1735_v51 = vld [vmem:[#allocation4 + $0x590] sm:$0xff]  ;;  %v1732_v52 = vld [vmem:[#allocation4 + $0x578] sm:$0xff] }
 0x7c7   :  { %2001 = vmatpush1.bf16.msra.mxu0 %v1624_v53  ;;  %2083 = vmatpush1.bf16.msra.mxu1 %v1626_v54  ;;  %v1734_v53 = vld [vmem:[#allocation4 + $0x588] sm:$0xff] }
 0x7c8   :  { %2002 = vmatprep.subr.bf16.mxu0 %v1634_v21  ;;  %2084 = vmatprep.subr.bf16.mxu1 %v1636_v58  ;;  %v1742_v54 = vld [vmem:[#allocation4 + $0x5c8] sm:$0xff]  ;;  %v1744_v21 = vld [vmem:[#allocation4 + $0x5d8] sm:$0xff]  ;;  %v1743_v58 = vld [vmem:[#allocation4 + $0x5d0] sm:$0xff] }
 0x7cb   :  { %2003 = vmatpush1.bf16.msra.mxu0 %v1633_v59  ;;  %2085 = vmatpush1.bf16.msra.mxu1 %v1635_v44  ;;  %v1751_v59 = vld [vmem:[#allocation4 + $0x610] sm:$0xff]  ;;  %v1753_v44 = vld [vmem:[#allocation4 + $0x620] sm:$0xff] }
 0x7cc   :  { %2004 = vmatprep.subr.bf16.mxu0 %v1643_v61  ;;  %2086 = vmatprep.subr.bf16.mxu1 %v1645_v62  ;;  %v1750_v61 = vld [vmem:[#allocation4 + $0x608] sm:$0xff]  ;;  %v1752_v62 = vld [vmem:[#allocation4 + $0x618] sm:$0xff] }
 0x7cf   :  { %2005 = vmatpush1.bf16.msra.mxu0 %v1642_v63  ;;  %2087 = vmatpush1.bf16.msra.mxu1 %v1644_v0  ;;  %v1760_v63 = vld [vmem:[#allocation4 + $0x658] sm:$0xff]  ;;  %v1762_v0 = vld [vmem:[#allocation4 + $0x668] sm:$0xff] }
 0x7d0   :  { %2006 = vmatprep.subr.bf16.mxu0 %v1652_v1  ;;  %2088 = vmatprep.subr.bf16.mxu1 %v1654_v2  ;;  %v1759_v1 = vld [vmem:[#allocation4 + $0x650] sm:$0xff]  ;;  %v1761_v2 = vld [vmem:[#allocation4 + $0x660] sm:$0xff] }
 0x7d3   :  { %2007 = vmatpush1.bf16.msra.mxu0 %v1651_v8  ;;  %2089 = vmatpush1.bf16.msra.mxu1 %v1653_v55  ;;  %v1769_v8 = vld [vmem:[#allocation4 + $0x6a0] sm:$0xff]  ;;  %v1771_v55 = vld [vmem:[#allocation4 + $0x6b0] sm:$0xff] }
 0x7d4   :  { %2008 = vmatprep.subr.bf16.mxu0 %v1661_v6  ;;  %2090 = vmatprep.subr.bf16.mxu1 %v1663_v10  ;;  %v1768_v6 = vld [vmem:[#allocation4 + $0x698] sm:$0xff]  ;;  %v1770_v10 = vld [vmem:[#allocation4 + $0x6a8] sm:$0xff] }
 0x7d7   :  { %2009 = vmatpush1.bf16.msra.mxu0 %v1660_v12  ;;  %2091 = vmatpush1.bf16.msra.mxu1 %v1662_v15  ;;  %v1637_v12 = vld [vmem:[#allocation4 + $0x280] sm:$0xff] }
 0x7d8   :  { %2010 = vmatprep.subr.bf16.mxu0 %v1670_v7  ;;  %2092 = vmatprep.subr.bf16.mxu1 %v1672_v25  ;;  %v1565_v15 = vld [vmem:[#allocation4 + $0x40] sm:$0xff]  ;;  %v1646_v25 = vld [vmem:[#allocation4 + $0x2c8] sm:$0xff] }
 0x7d9   :  { %v1709_v7 = vld [vmem:[#allocation4 + $0x4c0] sm:$0xff] }
 0x7db   :  { %2011 = vmatpush1.bf16.msra.mxu0 %v1669_v17  ;;  %2093 = vmatpush1.bf16.msra.mxu1 %v1671_v30  ;;  %v1574_v17 = vld [vmem:[#allocation4 + $0x88] sm:$0xff] }
 0x7dc   :  { %2012 = vmatprep.subr.bf16.mxu0 %v1679_v31  ;;  %2094 = vmatprep.subr.bf16.mxu1 %v1681_v20  ;;  %v1718_v30 = vld [vmem:[#allocation4 + $0x508] sm:$0xff]  ;;  %v1655_v31 = vld [vmem:[#allocation4 + $0x310] sm:$0xff] }
 0x7dd   :  { %v1583_v20 = vld [vmem:[#allocation4 + $0xd0] sm:$0xff] }
 0x7df   :  { %2013 = vmatpush1.bf16.msra.mxu0 %v1678_v27  ;;  %2095 = vmatpush1.bf16.msra.mxu1 %v1680_v28  ;;  %v1727_v27 = vld [vmem:[#allocation4 + $0x550] sm:$0xff]  ;;  %v1664_v28 = vld [vmem:[#allocation4 + $0x358] sm:$0xff] }
 0x7e0   :  { %2014 = vmatprep.subr.bf16.mxu0 %v1688_v32  ;;  %2096 = vmatprep.subr.bf16.mxu1 %v1690_v23  ;;  %v1592_v32 = vld [vmem:[#allocation4 + $0x118] sm:$0xff] }
 0x7e1   :  { %v1736_v23 = vld [vmem:[#allocation4 + $0x598] sm:$0xff] }
 0x7e3   :  { %2015 = vmatpush1.bf16.msra.mxu0 %v1687_v33  ;;  %2097 = vmatpush1.bf16.msra.mxu1 %v1689_v34  ;;  %v1673_v33 = vld [vmem:[#allocation4 + $0x3a0] sm:$0xff] }
 0x7e4   :  { %2016 = vmatprep.subr.bf16.mxu0 %v1697_v26  ;;  %2098 = vmatprep.subr.bf16.mxu1 %v1699_v60  ;;  %v1745_v34 = vld [vmem:[#allocation4 + $0x5e0] sm:$0xff]  ;;  %v1682_v26 = vld [vmem:[#allocation4 + $0x3e8] sm:$0xff] }
 0x7e5   :  { %v1610_v60 = vld [vmem:[#allocation4 + $0x1a8] sm:$0xff] }
 0x7e7   :  { %2017 = vmatpush1.bf16.msra.mxu0 %v1696_v35  ;;  %2099 = vmatpush1.bf16.msra.mxu1 %v1698_v36  ;;  %v1754_v35 = vld [vmem:[#allocation4 + $0x628] sm:$0xff]  ;;  %v1691_v36 = vld [vmem:[#allocation4 + $0x430] sm:$0xff] }
 0x7e8   :  { %2027 = vmatprep.subr.bf16.mxu0 %v1706_v37  ;;  %2109 = vmatprep.subr.bf16.mxu1 %v1708_v38  ;;  %v1619_v37 = vld [vmem:[#allocation4 + $0x1f0] sm:$0xff] }
 0x7e9   :  { %v1763_v38 = vld [vmem:[#allocation4 + $0x670] sm:$0xff] }
 0x7ea   :  { %2019 = vmatmul.mubr.bf16.vlgmr.msra.gmra.mrb[16].mxu0 %v3438_v41  ;;  %2101 = vmatmul.mubr.bf16.vlgmr.msra.gmra.mrb[16].mxu1 %v3438_v41 }
 0x7eb   :  { %2028 = vmatpush1.bf16.msra.mxu0 %v1705_v39  ;;  %2110 = vmatpush1.bf16.msra.mxu1 %v1707_v40  ;;  %v1700_v39 = vld [vmem:[#allocation4 + $0x478] sm:$0xff] }
 0x7ec   :  { %2029 = vmatprep.subr.bf16.mxu0 %v1715_v42  ;;  %2111 = vmatprep.subr.bf16.mxu1 %v1717_v43  ;;  %v1628_v40 = vld [vmem:[#allocation4 + $0x238] sm:$0xff]  ;;  %v1773_v43 = vld [vmem:[#allocation5] sm:$0xff] }
 0x7ed   :  { %2059 = vmatprep.mubr.bf16.mxu0 %v3002_v13  ;;  %2141 = vmatprep.mubr.bf16.mxu1 %v3002_v13  ;;  %v1741_v13 = vld [vmem:[#allocation4 + $0x5c0] sm:$0xff]  ;;  %v1772_v42 = vld [vmem:[#allocation4 + $0x6b8] sm:$0xff] }
 0x7ef   :  { %2030 = vmatpush1.bf16.msra.mxu0 %v1714_v57  ;;  %2112 = vmatpush1.bf16.msra.mxu1 %v1716_v45  ;;  %v1780_v57 = vrot.slane %v1773_v43, %v1051_v46 }
 0x7f0   :  { %2031 = vmatprep.subr.bf16.mxu0 %v1724_v47  ;;  %2113 = vmatprep.subr.bf16.mxu1 %v1726_v48 }
 0x7f3   :  { %2032 = vmatpush1.bf16.msra.mxu0 %v1723_v56  ;;  %2114 = vmatpush1.bf16.msra.mxu1 %v1725_v49 }
 0x7f4   :  { %2033 = vmatprep.subr.bf16.mxu0 %v1733_v50  ;;  %2115 = vmatprep.subr.bf16.mxu1 %v1735_v51 }
 0x7f7   :  { %2034 = vmatpush1.bf16.msra.mxu0 %v1732_v52  ;;  %2116 = vmatpush1.bf16.msra.mxu1 %v1734_v53 }
 0x7f8   :  { %2035 = vmatprep.subr.bf16.mxu0 %v1742_v54  ;;  %2117 = vmatprep.subr.bf16.mxu1 %v1744_v21 }
 0x7fb   :  { %2036 = vmatpush1.bf16.msra.mxu0 %v1741_v13  ;;  %2118 = vmatpush1.bf16.msra.mxu1 %v1743_v58 }
 0x7fc   :  { %2037 = vmatprep.subr.bf16.mxu0 %v1751_v59  ;;  %2119 = vmatprep.subr.bf16.mxu1 %v1753_v44  ;;  %v1788_v44 = vrot.slane %v1773_v43, %v1059_v3  ;;  %v1800_v3 = vrot.slane %v1773_v43, %v1071_v19 }
 0x7ff   :  { %2038 = vmatpush1.bf16.msra.mxu0 %v1750_v61  ;;  %2120 = vmatpush1.bf16.msra.mxu1 %v1752_v62  ;;  %v1784_v61 = vrot.slane %v1773_v43, %v1055_v4  ;;  %v1808_v4 = vrot.slane %v1773_v43, %v1079_v22 }
 0x800   :  { %2039 = vmatprep.subr.bf16.mxu0 %v1760_v63  ;;  %2121 = vmatprep.subr.bf16.mxu1 %v1762_v0 }
 0x803   :  { %2040 = vmatpush1.bf16.msra.mxu0 %v1759_v1  ;;  %2122 = vmatpush1.bf16.msra.mxu1 %v1761_v2 }
 0x804   :  { %2041 = vmatprep.subr.bf16.mxu0 %v1769_v8  ;;  %2123 = vmatprep.subr.bf16.mxu1 %v1771_v55  ;;  %v1796_v55 = vrot.slane %v1773_v43, %v1067_v16 }
 0x807   :  { %2042 = vmatpush1.bf16.msra.mxu0 %v1768_v6  ;;  %2124 = vmatpush1.bf16.msra.mxu1 %v1770_v10  ;;  %v1804_v6 = vrot.slane %v1773_v43, %v1075_v14 }
 0x808   :  { %2621 = vmatprep.subr.bf16.mxu0 %v1637_v12  ;;  %2703 = vmatprep.subr.bf16.mxu1 %v3003_v18 }
 0x80a   :  { %2060 = vmatmul.mubr.bf16.vlgmr.msra.gmra.mrb[16].mxu0 %v3446_v29  ;;  %2142 = vmatmul.mubr.bf16.vlgmr.msra.gmra.mrb[16].mxu1 %v3446_v29 }
 0x80b   :  { %2622 = vmatpush3.bf16.msra.mxu0 %v1565_v15  ;;  %2704 = vmatpush3.bf16.msra.mxu1 %v1709_v7 }
 0x80c   :  { %2623 = vmatprep.subr.bf16.mxu0 %v1646_v25  ;;  %2705 = vmatprep.subr.bf16.mxu1 %v3003_v18 }
 0x80d   :  { %2182 = vmatprep.mubr.bf16.mxu0 %v3432_v24  ;;  %2719 = vmatprep.mubr.msk.bf16.mxu1 %vm3004_vm5, %v3003_v18  ;;  %v1601_v24 = vld [vmem:[#allocation4 + $0x160] sm:$0xff] }
 0x80f   :  { %2624 = vmatpush3.bf16.msra.mxu0 %v1574_v17  ;;  %2706 = vmatpush3.bf16.msra.mxu1 %v1718_v30 }
 0x810   :  { %2625 = vmatprep.subr.bf16.mxu0 %v1655_v31  ;;  %2707 = vmatprep.subr.bf16.mxu1 %v3003_v18 }
 0x813   :  { %2626 = vmatpush3.bf16.msra.mxu0 %v1583_v20  ;;  %2708 = vmatpush3.bf16.msra.mxu1 %v1727_v27 }
 0x814   :  { %2627 = vmatprep.subr.bf16.mxu0 %v1664_v28  ;;  %2709 = vmatprep.subr.bf16.mxu1 %v3003_v18 }
 0x817   :  { %2628 = vmatpush3.bf16.msra.mxu0 %v1592_v32  ;;  %2710 = vmatpush3.bf16.msra.mxu1 %v1736_v23 }
 0x818   :  { %2629 = vmatprep.subr.bf16.mxu0 %v1673_v33  ;;  %2711 = vmatprep.subr.bf16.mxu1 %v3003_v18 }
 0x81b   :  { %2630 = vmatpush3.bf16.msra.mxu0 %v1601_v24  ;;  %2712 = vmatpush3.bf16.msra.mxu1 %v1745_v34 }
 0x81c   :  { %2631 = vmatprep.subr.bf16.mxu0 %v1682_v26  ;;  %2713 = vmatprep.subr.bf16.mxu1 %v3003_v18 }
 0x81f   :  { %2632 = vmatpush3.bf16.msra.mxu0 %v1610_v60  ;;  %2714 = vmatpush3.bf16.msra.mxu1 %v1754_v35 }
 0x820   :  { %2633 = vmatprep.subr.bf16.mxu0 %v1691_v36  ;;  %2715 = vmatprep.subr.bf16.mxu1 %v3003_v18 }
 0x823   :  { %2634 = vmatpush3.bf16.msra.mxu0 %v1619_v37  ;;  %2716 = vmatpush3.bf16.msra.mxu1 %v1763_v38 }
 0x824   :  { %2635 = vmatprep.subr.bf16.mxu0 %v1700_v39  ;;  %2717 = vmatprep.subr.bf16.mxu1 %v3003_v18 }
 0x827   :  { %2636 = vmatpush3.bf16.msra.mxu0 %v1628_v40  ;;  %2718 = vmatpush3.bf16.msra.mxu1 %v1772_v42 }
 0x82a   :  { %2183 = vmatmul.mubr.bf16.vlgmr.msra.gmra.mrb[20].mxu0 %v3438_v41  ;;  %2720 = vmatmul.mubr.bf16.vlgmr.msra.gmra.mrb[20].mxu1 %v3446_v29  ;;  %v1792_v41 = vrot.slane %v1773_v43, %v1063_v9 }
 0x87d   :  { %v1897_v45 = vpop.f32.mrb[12].mxu0  ;;  %v1979_v47 = vpop.f32.mrb[12].mxu1 }
 0x87e   :  { %v2751_v48 = vadd.f32 %v1897_v45, %v1780_v57  ;;  %v1899_v56 = vpop.f32.mrb[13].mxu0  ;;  %v1981_v49 = vpop.f32.mrb[13].mxu1  ;;  %v2753_v62 = vadd.f32 %v1979_v47, %v1788_v44 }
 0x87f   :  { %v1901_v50 = vpop.f32.mrb[14].mxu0  ;;  %v1983_v51 = vpop.f32.mrb[14].mxu1  ;;  %v2754_v21 = vadd.f32 %v1981_v49, %v1792_v41  ;;  %v2752_v63 = vadd.f32 %v1899_v56, %v1784_v61  ;;  %v2577_v49 = vld [vmem:[#allocation5 + $0x8] ss:$0 sm:$0xff] }
 0x880   :  { %v2581_v52 = vmul.f32 -1.442695, %v2751_v48  ;;  %v1902_v53 = vpop.f32.mrb[15].mxu0  ;;  %v1984_v54 = vpop.f32.mrb[15].mxu1  ;;  %v2583_v0 = vmul.f32 -1.442695, %v2753_v62 }
 0x881   :  { %v2582_v1 = vmul.f32 -1.442695, %v2752_v63 }
 0x882   :  { %2858 = vpow2.f32 %v2581_v52 }
 0x883   :  { %2860 = vtanh.f32 %v2754_v21 }
 0x88c   :  { %v2859_v29 = vpop.eup %2858 }
 0x88d   :  { %v2257_v13 = vadd.f32 1.0, %v2859_v29  ;;  %v2861_v46 = vpop.eup %2860 }
 0x88f   :  { %2862 = vrcp.f32 %v2257_v13 }
 0x890   :  { %2864 = vpow2.f32 %v2583_v0 }
 0x891   :  { %2866 = vpow2.f32 %v2582_v1 }
 0x899   :  { %v2863_v58 = vpop.eup %2862 }
 0x89a   :  { %v2269_v59 = vmul.f32 %v2863_v58, %v2861_v46  ;;  %v2865_v9 = vpop.eup %2864 }
 0x89b   :  { %v2867_v2 = vpop.eup %2866  ;;  %v2259_v8 = vadd.f32 1.0, %v2865_v9 }
 0x89c   :  { %v2258_v10 = vadd.f32 1.0, %v2867_v2 }
 0x89d   :  { %2868 = vrcp.f32 %v2259_v8 }
 0x89e   :  { %2870 = vrcp.f32 %v2258_v10 }
 0x8a7   :  { %v2869_v22 = vpop.eup %2868 }
 0x8a8   :  { %v2871_v23 = vpop.eup %2870 }
 0x8dd   :  { %v2061_v12 = vpop.f32.mrb[16].mxu0  ;;  %v2143_v15 = vpop.f32.mrb[16].mxu1 }
 0x8de   :  { %v2755_v7 = vadd.f32 %v2061_v12, %v1796_v55  ;;  %v2757_v25 = vadd.f32 %v2143_v15, %v1804_v6  ;;  %v2063_v17 = vpop.f32.mrb[17].mxu0  ;;  %v2145_v30 = vpop.f32.mrb[17].mxu1 }
 0x8df   :  { %v2756_v31 = vadd.f32 %v2063_v17, %v1800_v3  ;;  %v2758_v16 = vadd.f32 %v2145_v30, %v1808_v4  ;;  %v2065_v20 = vpop.f32.mrb[18].mxu0  ;;  %v2147_v27 = vpop.f32.mrb[18].mxu1 }
 0x8e0   :  { %2872 = vtanh.f32 %v2755_v7  ;;  %v2578_v14 = vmul.f32 -1.442695, %v2757_v25  ;;  %v2066_v28 = vpop.f32.mrb[19].mxu0  ;;  %v2148_v32 = vpop.f32.mrb[19].mxu1 }
 0x8e1   :  { %2874 = vtanh.f32 %v2756_v31  ;;  %v2579_v19 = vmul.f32 -1.442695, %v2758_v16 }
 0x8e2   :  { %2876 = vpow2.f32 %v2578_v14 }
 0x8e3   :  { %2878 = vpow2.f32 %v2579_v19 }
 0x8e4   :  { %2880 = vtanh.f32 %v2269_v59  ;;  %v3005_v59 = vmov 1966171168  }
 0x8e5   :  { %v2283_v44 = vunpack.c.l.s4 %v3005_v59 }
 0x8e7   :  { %v2284_v61 = vunpack.c.0.s8 %v2283_v44 }
 0x8e9   :  { %v2287_v63 = vsub.s32 %v2284_v61, %v3123_v11 }
 0x8ea   :  { %v2873_v33 = vpop.eup %2872 }
 0x8eb   :  { %v2875_v24 = vpop.eup %2874  ;;  %v2270_v34 = vmul.f32 %v2873_v33, %v2871_v23 }
 0x8ec   :  { %v2877_v26 = vpop.eup %2876  ;;  %v2271_v60 = vmul.f32 %v2875_v24, %v2869_v22 }
 0x8ed   :  { %v2879_v35 = vpop.eup %2878  ;;  %v2239_v36 = vadd.f32 1.0, %v2877_v26  ;;  %2882 = vtanh.f32 %v2270_v34 }
 0x8ee   :  { %v2240_v37 = vadd.f32 1.0, %v2879_v35  ;;  %v2881_v38 = vpop.eup %2880 }
 0x8ef   :  { %2884 = vrcp.f32 %v2239_v36 }
 0x8f0   :  { %2886 = vrcp.f32 %v2240_v37 }
 0x8f7   :  { %v2883_v39 = vpop.eup %2882 }
 0x8f9   :  { %v2885_v40 = vpop.eup %2884 }
 0x8fa   :  { %v2887_v42 = vpop.eup %2886  ;;  %v3487_v43 = vmul.f32 %v2885_v40, %v2881_v38 }
 0x8fb   :  { %v2276_v57 = vmul.f32 %v2887_v42, %v2883_v39 }
 0x8fd   :  { %v2281_v45 = vcombine.low %v3487_v43, %v2276_v57  ;;  %v2637_v47 = vpop.f32.mrb[20].mxu0  ;;  %v2224_v48 = vpop.f32.mrb[20].mxu1 }
 0x8fe   :  { %v2638_v56 = vpop.f32.mrb[21].mxu0  ;;  %v2721_v50 = vpop.f32.mrb[21].mxu1 }
 0x8ff   :  { %v2639_v51 = vadd.f32 %v2638_v56, %v2637_v47  ;;  %v2640_v52 = vpop.f32.mrb[22].mxu0  ;;  %v2227_v53 = vpop.f32.mrb[22].mxu1  ;;  %v2288_v9 = vrot.slane %v2281_v45, %v2287_v63 }
 0x900   :  { %v2641_v54 = vpop.f32.mrb[23].mxu0  ;;  %v2722_v41 = vpop.f32.mrb[23].mxu1 }
 0x901   :  { %v2185_v21 = vadd.f32 %v2639_v51, %v2577_v49 }
 0x903   :  { %v2225_v29 = vadd.f32 %v2224_v48, %v2185_v21 }
 0x905   :  { %v2580_v13 = vmul.f32 -1.442695, %v2225_v29 }
 0x907   :  { %2888 = vpow2.f32 %v2580_v13 }
 0x908   :  { %2890 = vtanh.f32 %v2271_v60 }
 0x911   :  { %v2889_v46 = vpop.eup %2888 }
 0x912   :  { %v2241_v58 = vadd.f32 1.0, %v2889_v46  ;;  %v2891_v62 = vpop.eup %2890 }
 0x914   :  { %2892 = vrcp.f32 %v2241_v58 }
 0x91e   :  { %v2893_v0 = vpop.eup %2892 }
 0x91f   :  { %v3491_v1 = vmul.f32 %v2893_v0, %v2891_v62 }
 0x921   :  { %v2295_v2 = vrot.slane %v3491_v1, %v2287_v63 }
 0x923   :  { %v2296_v8 = vcombine.low %v2288_v9, %v2295_v2 }
 0x925   :  { %v2303_v55 = vrot.slane %v2296_v8, %v2287_v63 }
 0x927   :  { %2309 = vst.msk [vmem:[%s3533_s9] sm:$0x7] %vm2307_vm6, %v2303_v55 }
 0x928   :  { %2978 = dma.done.wait [#allocation8 + $0x4], 3072 }
 0x929   :  { %2979 = vsyncadd [#allocation8 + $0x4], 4294964224 }
 0x92a   :  { %2980 = dma.done.wait [#allocation8 + $0x5], 16 }
 0x92b   :  { %2981 = vsyncadd [#allocation8 + $0x5], 4294967280  ;;  %2723 = vmatprep.subr.bf16.mxu1 %v3003_v18  ;;  %v2317_v11 = vpack.c.bf16 %v2276_v57, %v2276_v57  ;;  %2739 = vmatprep.mubr.msk.bf16.mxu1 %vm3004_vm5, %v3003_v18  ;;  %v2327_v6 = vld [vmem:[#allocation6 + $0x40] sm:$0xff]  ;;  %v2328_v5 = vld [vmem:[#allocation6 + $0x48] sm:$0xff]  ;;  %v2318_v26 = vpack.c.bf16 %v3491_v1, %v3491_v1  ;;  %v2316_v60 = vpack.c.bf16 %v3487_v43, %v3487_v43  ;;  %vm2424_vm7 = vcmask 1040384   ;;  %s3006_s9 = smov [#allocation14]  }
 0x92c   :  { %v2319_v10 = vld [vmem:[#allocation6] sm:$0xff]  ;;  %2652 = vmatprep.subr.bf16.mxu0 %v2327_v6  ;;  %v2336_v4 = vld [vmem:[#allocation6 + $0x88] sm:$0xff]  ;;  %v2329_v15 = vld [vmem:[#allocation6 + $0x50] sm:$0xff]  ;;  %s2445_s30 = sshll.u32 %s3006_s9, 4  ;;  %s2446_s30 = int_to_ptr.vmem [resolvable:$true] %s2445_s30 }
 0x92d   :  { %2376 = vmatprep.mubr.bf16.mxu0 %v2317_v11  ;;  %v2335_v3 = vld [vmem:[#allocation6 + $0x80] sm:$0xff]  ;;  %2653 = vmatpush3.bf16.msra.mxu0 %v2319_v10  ;;  %v2320_v12 = vld [vmem:[#allocation6 + $0x8] sm:$0xff]  ;;  %v2337_v7 = vld [vmem:[#allocation6 + $0x90] sm:$0xff]  ;;  %s2944_s11 = scalar_lea.vmem %s2446_s30, 16  ;;  %s2948_s5 = scalar_lea.vmem %s2446_s30, 32 }
 0x92e   :  { %2724 = vmatpush3.bf16.msra.mxu1 %v2335_v3  ;;  %2654 = vmatprep.subr.bf16.mxu0 %v2328_v5  ;;  %v2321_v25 = vld [vmem:[#allocation6 + $0x10] sm:$0xff]  ;;  %v2330_v17 = vld [vmem:[#allocation6 + $0x58] sm:$0xff]  ;;  %v2331_v16 = vld [vmem:[#allocation6 + $0x60] sm:$0xff]  ;;  %p2945_p4 = scmp.ne.s32.totalorder %s2446_s30, %s2944_s11  ;;  %p2949_p5 = scmp.lt.s32.totalorder %s2446_s30, %s2446_s30 }
 0x92f   :  { %2725 = vmatprep.subr.bf16.mxu1 %v3003_v18  ;;  %v2338_v30 = vld [vmem:[#allocation6 + $0x98] sm:$0xff]  ;;  %v2339_v20 = vld [vmem:[#allocation6 + $0xa0] sm:$0xff]  ;;  %v2332_v14 = vld [vmem:[#allocation6 + $0x68] sm:$0xff]  ;;  %p2950_p6 = scmp.lt.s32.totalorder %s2948_s5, %s2944_s11 }
 0x930   :  { %v2322_v31 = vld [vmem:[#allocation6 + $0x18] sm:$0xff]  ;;  %v2323_v27 = vld [vmem:[#allocation6 + $0x20] sm:$0xff]  ;;  %v2340_v28 = vld [vmem:[#allocation6 + $0xa8] sm:$0xff] }
 0x931   :  { %2655 = vmatpush3.bf16.msra.mxu0 %v2320_v12  ;;  %v2324_v32 = vld [vmem:[#allocation6 + $0x28] sm:$0xff]  ;;  %v2333_v19 = vld [vmem:[#allocation6 + $0x70] sm:$0xff]  ;;  %v2334_v33 = vld [vmem:[#allocation6 + $0x78] sm:$0xff]  ;;  %p2951_p7 = por %p2950_p6, %p2949_p5 }
 0x932   :  { %2726 = vmatpush3.bf16.msra.mxu1 %v2336_v4  ;;  %2656 = vmatprep.subr.bf16.mxu0 %v2329_v15  ;;  %v2341_v22 = vld [vmem:[#allocation6 + $0xb0] sm:$0xff]  ;;  %v2342_v24 = vld [vmem:[#allocation6 + $0xb8] sm:$0xff]  ;;  %v2343_v39 = vld [vmem:[#allocation7] sm:$0x1] }
 0x933   :  { %2727 = vmatprep.subr.bf16.mxu1 %v3003_v18  ;;  %v2325_v23 = vld [vmem:[#allocation6 + $0x30] sm:$0xff]  ;;  %v2326_v34 = vld [vmem:[#allocation6 + $0x38] sm:$0xff]  ;;  %p2952_p8 = pnand %p2951_p7, %p2945_p4 }
 0x935   :  { %2657 = vmatpush3.bf16.msra.mxu0 %v2321_v25 }
 0x936   :  { %2728 = vmatpush3.bf16.msra.mxu1 %v2337_v7  ;;  %2658 = vmatprep.subr.bf16.mxu0 %v2330_v17 }
 0x937   :  { %2729 = vmatprep.subr.bf16.mxu1 %v3003_v18 }
 0x939   :  { %2659 = vmatpush3.bf16.msra.mxu0 %v2322_v31 }
 0x93a   :  { %2730 = vmatpush3.bf16.msra.mxu1 %v2338_v30  ;;  %2660 = vmatprep.subr.bf16.mxu0 %v2331_v16 }
 0x93b   :  { %2731 = vmatprep.subr.bf16.mxu1 %v3003_v18 }
 0x93d   :  { %2661 = vmatpush3.bf16.msra.mxu0 %v2323_v27 }
 0x93e   :  { %2732 = vmatpush3.bf16.msra.mxu1 %v2339_v20  ;;  %2662 = vmatprep.subr.bf16.mxu0 %v2332_v14 }
 0x93f   :  { %2733 = vmatprep.subr.bf16.mxu1 %v3003_v18 }
 0x941   :  { %2663 = vmatpush3.bf16.msra.mxu0 %v2324_v32 }
 0x942   :  { %2734 = vmatpush3.bf16.msra.mxu1 %v2340_v28  ;;  %2664 = vmatprep.subr.bf16.mxu0 %v2333_v19 }
 0x943   :  { %2735 = vmatprep.subr.bf16.mxu1 %v3003_v18 }
 0x945   :  { %2665 = vmatpush3.bf16.msra.mxu0 %v2325_v23 }
 0x946   :  { %2736 = vmatpush3.bf16.msra.mxu1 %v2341_v22  ;;  %2666 = vmatprep.subr.bf16.mxu0 %v2334_v33 }
 0x947   :  { %2737 = vmatprep.subr.bf16.mxu1 %v3003_v18 }
 0x949   :  { %2667 = vmatpush3.bf16.msra.mxu0 %v2326_v34 }
 0x94a   :  { %2738 = vmatpush3.bf16.msra.mxu1 %v2342_v24 }
 0x94c   :  { %2377 = vmatmul.mubr.bf16.vlgmr.msra.gmra.mrb[24].mxu0 %v2316_v60 }
 0x94d   :  { %2740 = vmatmul.mubr.bf16.vlgmr.msra.gmra.mrb[24].mxu1 %v2318_v26 }
 0xa1f   :  { %v2668_v36 = vpop.f32.mrb[24].mxu0 }
 0xa20   :  { %v2418_v35 = vpop.f32.mrb[24].mxu1  ;;  %v2669_v38 = vpop.f32.mrb[25].mxu0 }
 0xa21   :  { %v2741_v37 = vpop.f32.mrb[25].mxu1  ;;  %v2670_v18 = vadd.f32 %v2669_v38, %v2668_v36  ;;  %v2671_v42 = vpop.f32.mrb[26].mxu0 }
 0xa22   :  { %v2421_v40 = vpop.f32.mrb[26].mxu1  ;;  %v2672_v45 = vpop.f32.mrb[27].mxu0 }
 0xa23   :  { %v2742_v57 = vpop.f32.mrb[27].mxu1  ;;  %v2379_v47 = vadd.f32 %v2670_v18, %v2343_v39 }
 0xa25   :  { %v2419_v48 = vadd.f32 %v2418_v35, %v2379_v47 }
 0xa27   :  { %v2425_v56 = vsel %vm2424_vm7, %v2419_v48, -inf }
 0xa28   :  { %2426 = vmax.xlane.f32.xlu0 %v2425_v56 }
 0xab5   :  { %v2427_v49 = vpop.xlane.xlu0 %2426 }
 0xab6   :  { %v2428_v43 = vsub.f32 %v2419_v48, %v2427_v49 }
 0xab8   :  { %v2429_v50 = vmul.f32 1.442695, %v2428_v43 }
 0xaba   :  { %2894 = vpow2.f32 %v2429_v50 }
 0xac4   :  { %v2895_v51 = vpop.eup %2894 }
 0xac5   :  { %v2431_v52 = vsel %vm2424_vm7, %v2895_v51, 0.0 }
 0xac6   :  { %2432 = vadd.xlane.f32.xlu0 %v2431_v52 }
 0xb53   :  { %v2433_v53 = vpop.xlane.xlu0 %2432 }
 0xb54   :  { %2896 = vrcp.f32 %v2433_v53 }
 0xb5e   :  { %v2897_v54 = vpop.eup %2896 }
 0xb5f   :  { %v2435_v41 = vmul.f32 %v2897_v54, %v2895_v51 }
 0xb61   :  { %2436 = vst [vmem:[#allocation14] sm:$0x1] %v2435_v41 }
 0xb62   :  { %2955 = shalt.err (!%p2952_p8)
}
 0xb63   :  { %s2956_s13 = scalar_lea.hbm %s3534_s10, 16 }
 0xb64   :  { %p2957_p9 = scmp.ne.s32.totalorder %s3534_s10, %s2956_s13  ;;  %p2960_p10 = scmp.lt.u32.totalorder %s2956_s13, %s3534_s10 }
 0xb66   :  { %p2962_p11 = pnand %p2960_p10, %p2957_p9 }
 0xb68   :  { %2965 = shalt.err (!%p2962_p11)
}
 0xb69   :  { %2448 = dma.vmem_to_hbm [thread:$0]  %s2446_s30, 16, %s3534_s10, [#allocation10]  }
 0xb6a   :  { %2982 = dma.done.wait [#allocation10], 16  }
 0xb6b   :  { %2983 = vsyncadd [#allocation10], 4294967280 }
 0xb6c   :  { %2454 = vsyncpa [#allocation10], 1 }
 0xb6d   :  { %2455 = vsyncpa [#allocation11], 1 }
 0xb6e   :  { %2456 = vsyncpa [#allocation13], 1 }
 0xb6f   :  { %2457 = vsyncmov [#allocation8] }
 0xb72   :  { %s2458_s18 = vpop.sfrf %2457 }
 0xb73   :  { %p2584_p12 = scmp.ne.s32.totalorder %s2458_s18, 0 }
 0xb75   :  { %2462 = shalt.err (%p2584_p12)  }
 0xb76   :  { %2464 = vsyncmov [#allocation8 + $0x1] }
 0xb79   :  { %s2465_s19 = vpop.sfrf %2464 }
 0xb7a   :  { %p2585_p13 = scmp.ne.s32.totalorder %s2465_s19, 0 }
 0xb7c   :  { %2469 = shalt.err (%p2585_p13)  }
 0xb7d   :  { %2471 = vsyncmov [#allocation8 + $0x2] }
 0xb80   :  { %s2472_s20 = vpop.sfrf %2471 }
 0xb81   :  { %p2586_p0 = scmp.ne.s32.totalorder %s2472_s20, 0 }
 0xb83   :  { %2476 = shalt.err (%p2586_p0)  }
 0xb84   :  { %2478 = vsyncmov [#allocation8 + $0x3] }
 0xb87   :  { %s2479_s21 = vpop.sfrf %2478 }
 0xb88   :  { %p2587_p1 = scmp.ne.s32.totalorder %s2479_s21, 0 }
 0xb8a   :  { %2483 = shalt.err (%p2587_p1)  }
 0xb8b   :  { %2485 = vsyncmov [#allocation8 + $0x4] }
 0xb8e   :  { %s2486_s10 = vpop.sfrf %2485 }
 0xb8f   :  { %p2588_p2 = scmp.ne.s32.totalorder %s2486_s10, 0 }
 0xb91   :  { %2490 = shalt.err (%p2588_p2)  }
 0xb92   :  { %2492 = vsyncmov [#allocation8 + $0x5] }
 0xb95   :  { %s2493_s1 = vpop.sfrf %2492 }
 0xb96   :  { %p2589_p3 = scmp.ne.s32.totalorder %s2493_s1, 0 }
 0xb98   :  { %2497 = shalt.err (%p2589_p3)  }

</bundles_post_ra>
